<compile_context>
chip_gen: v6e
topology: v6e:2x2x1
jax: 0.10.0
libtpu: 0.0.40
codegen_flags: <defaults>
</compile_context>

<pallas_src>
import functools

import jax
import jax.numpy as jnp
from jax.experimental import pallas as pl
from jax.experimental.pallas import tpu as pltpu


def _softplus(v):
    # Numerically stable softplus with exactly one exp + one log1p (EUP-minimal).
    return jnp.maximum(v, 0.0) + jnp.log1p(jnp.exp(-jnp.abs(v)))


def _drpn_kernel(x_ref,
                 w1_ref, b1_ref,
                 w2_ref, b2_ref,
                 w3_ref, b3_ref,
                 w4_ref, b4_ref,
                 w5_ref, b5_ref,
                 wl_ref, bl_ref,
                 o_ref):
    """One lane-tile of pixels through the whole per-pixel MLP."""
    act_dtype = x_ref.dtype            # f32, or bf16 on v6e/v7x
    x = x_ref[...]                     # (3, TILE)
    wl = wl_ref[...]                   # (160, 1) f32

    def layer(inp, w_ref, b_ref):
        # (C_out, C_in) @ (C_in, TILE) -> f32 accumulate, bias on sublanes.
        pre = jnp.dot(w_ref[...], inp,
                      preferred_element_type=jnp.float32) + b_ref[...]
        return _softplus(pre.astype(act_dtype))          # (32, TILE)

    def tap(acc, o, lo):
        # last_conv partial sum: (32,1) weights broadcast over lanes (VPU mul)
        # + sublane reduce (XLU); accumulation stays f32.
        return acc + jnp.sum(wl[lo:lo + 32, :] * o, axis=0, keepdims=True)

    o = layer(x, w1_ref, b1_ref)
    acc = tap(bl_ref[...], o, 0)       # bl (1,1) broadcasts to (1, TILE)
    o = layer(o, w2_ref, b2_ref)
    acc = tap(acc, o, 32)
    o = layer(o, w3_ref, b3_ref)
    acc = tap(acc, o, 64)
    o = layer(o, w4_ref, b4_ref)
    acc = tap(acc, o, 96)
    o = layer(o, w5_ref, b5_ref)
    acc = tap(acc, o, 128)

    o_ref[...] = _softplus(acc).astype(o_ref.dtype)      # (1, TILE) f32


def init_params(key):
    """Deterministic xavier-uniform weights / PyTorch-default biases (synthetic).

    Weights are stored channel-major as (C_out, C_in) so the kernel computes
    W @ act; the last-conv weight is stored as (160, 1) for in-kernel 32-row
    slabs.
    """
    def xavier(key, c_out, c_in):
        bound = (6.0 / (c_in + c_out)) ** 0.5
        return jax.random.uniform(key, (c_out, c_in), jnp.float32,
                                  minval=-bound, maxval=bound)

    def bias(key, c_out, c_in):
        bound = 1.0 / (c_in ** 0.5)
        return jax.random.uniform(key, (c_out, 1), jnp.float32,
                                  minval=-bound, maxval=bound)

    keys = jax.random.split(key, 12)
    dims = [(32, 3), (32, 32), (32, 32), (32, 32), (32, 32), (1, 160)]
    params = []
    for i, (c_out, c_in) in enumerate(dims):
        params.append(xavier(keys[2 * i], c_out, c_in))
        params.append(bias(keys[2 * i + 1], c_out, c_in))
    # [w1, b1, w2, b2, w3, b3, w4, b4, w5, b5, wl, bl]
    params[10] = params[10].T          # (1,160) -> (160,1)
    return params


def _round_up(n, m):
    return (n + m - 1) // m * m


def _pick_act_dtype():
    """bf16 activations on v6e / v7x (bf16 VPU/EUP), f32 elsewhere (v5e etc.)."""
    try:
        kind = jax.devices()[0].device_kind.lower()
    except Exception:
        return jnp.float32
    if any(tag in kind for tag in ("v6", "v7", "7x")):
        return jnp.bfloat16
    return jnp.float32


@functools.partial(jax.jit, static_argnames=("tile", "act_dtype"))
def direct_reflectance_forward(x_nchw, params, tile=4096, act_dtype=jnp.float32):
    """x_nchw: (N, 3, H, W) float32  ->  (N, 1, H, W) float32."""
    N, C, H, W = x_nchw.shape
    P = N * H * W

    # Channel-major, lane-dense layout: NCHW -> (C, P), pixels on lanes.
    x_cp = jnp.transpose(x_nchw, (1, 0, 2, 3)).reshape(C, P)

    # Ragged pixel count: pad the lane axis up to a multiple of the tile.
    tile_eff = min(tile, _round_up(P, 128))
    P_pad = _round_up(P, tile_eff)
    if P_pad != P:
        x_cp = jnp.pad(x_cp, ((0, 0), (0, P_pad - P)))

    x_cp = x_cp.astype(act_dtype)

    # Layer matmul weights in the activation dtype (bf16 MXU on v6e/v7x);
    # biases and the last-conv taps stay f32 (f32 accumulation throughout).
    w1, b1, w2, b2, w3, b3, w4, b4, w5, b5, wl, bl = params
    kernel_params = [w1.astype(act_dtype), b1,
                     w2.astype(act_dtype), b2,
                     w3.astype(act_dtype), b3,
                     w4.astype(act_dtype), b4,
                     w5.astype(act_dtype), b5,
                     wl, bl]

    weight_specs = [pl.BlockSpec(p.shape, lambda i: (0, 0))
                    for p in kernel_params]

    out_cp = pl.pallas_call(
        _drpn_kernel,
        grid=(P_pad // tile_eff,),
        in_specs=[pl.BlockSpec((C, tile_eff), lambda i: (0, i))] + weight_specs,
        out_specs=pl.BlockSpec((1, tile_eff), lambda i: (0, i)),
        out_shape=jax.ShapeDtypeStruct((1, P_pad), jnp.float32),
        compiler_params=pltpu.CompilerParams(
            dimension_semantics=("parallel",)),
    )(x_cp, *kernel_params)

    # (1, P) -> (N, 1, H, W); the size-1 channel axis makes this a free reshape.
    out = out_cp[:, :P].reshape(1, N, H, W)
    return jnp.transpose(out, (1, 0, 2, 3))


def _reference_forward(x_nchw, params):
    """Pure-JAX f32 reference (matches the PyTorch forward)."""
    w1, b1, w2, b2, w3, b3, w4, b4, w5, b5, wl, bl = params
    N, C, H, W = x_nchw.shape
    x = jnp.transpose(x_nchw, (1, 0, 2, 3)).reshape(C, -1)      # (3, P)
    sp = lambda v: jnp.logaddexp(v, 0.0)
    o1 = sp(w1 @ x + b1)
    o2 = sp(w2 @ o1 + b2)
    o3 = sp(w3 @ o2 + b3)
    o4 = sp(w4 @ o3 + b4)
    o5 = sp(w5 @ o4 + b5)
    cat = jnp.concatenate([o1, o2, o3, o4, o5], axis=0)          # (160, P)
    out = sp(wl.T @ cat + bl)                                    # (1, P)
    return jnp.transpose(out.reshape(1, N, H, W), (1, 0, 2, 3))


if __name__ == "__main__":
    key = jax.random.PRNGKey(0)
    pkey, xkey = jax.random.split(key)

    params = init_params(pkey)

    # Small deterministic input consistent with the module: NCHW, 3 channels.
    x = jax.random.normal(xkey, (2, 3, 16, 16), dtype=jnp.float32)

    act_dtype = _pick_act_dtype()
    out = direct_reflectance_forward(x, params, act_dtype=act_dtype)
    out = jax.block_until_ready(out)

    assert out.shape == (2, 1, 16, 16), out.shape
    assert bool(jnp.all(jnp.isfinite(out)))
    # Softplus output must be strictly positive.
    assert bool(jnp.all(out > 0.0))

    # Cross-check against the pure-JAX reference.
    ref = _reference_forward(x, params)
    if act_dtype == jnp.float32:
        atol, rtol = 1e-5, 1e-5
    else:  # bf16 activations on v6e/v7x: small expected drift.
        atol, rtol = 1e-1, 1e-1
    assert bool(jnp.allclose(out, ref, atol=atol, rtol=rtol))

    print("KERNEL_OK")
</pallas_src>

<mosaic_0001>
module attributes {stable_mosaic.version = 11 : i64} {
  func.func @_drpn_kernel(%arg0: i32, %arg1: memref<3x512xf32, #tpu.memory_space<vmem>>, %arg2: memref<32x3xf32, #tpu.memory_space<vmem>>, %arg3: memref<32x1xf32, #tpu.memory_space<vmem>>, %arg4: memref<32x32xf32, #tpu.memory_space<vmem>>, %arg5: memref<32x1xf32, #tpu.memory_space<vmem>>, %arg6: memref<32x32xf32, #tpu.memory_space<vmem>>, %arg7: memref<32x1xf32, #tpu.memory_space<vmem>>, %arg8: memref<32x32xf32, #tpu.memory_space<vmem>>, %arg9: memref<32x1xf32, #tpu.memory_space<vmem>>, %arg10: memref<32x32xf32, #tpu.memory_space<vmem>>, %arg11: memref<32x1xf32, #tpu.memory_space<vmem>>, %arg12: memref<160x1xf32, #tpu.memory_space<vmem>>, %arg13: memref<1x1xf32, #tpu.memory_space<vmem>>, %arg14: memref<1x512xf32, #tpu.memory_space<vmem>>) attributes {dimension_semantics = [#tpu.dimension_semantics<parallel>], iteration_bounds = array<i64: 1>, scalar_prefetch = 0 : i64, scratch_operands = 0 : i64, tpu.core_type = #tpu.core_type<tc>, window_params = [{transform_indices = @transform_0, window_bounds = array<i64: 3, 512>}, {pipeline_mode = #tpu.pipeline_mode<synchronous>, transform_indices = @transform_1, window_bounds = array<i64: 32, 3>}, {pipeline_mode = #tpu.pipeline_mode<synchronous>, transform_indices = @transform_2, window_bounds = array<i64: 32, 1>}, {pipeline_mode = #tpu.pipeline_mode<synchronous>, transform_indices = @transform_3, window_bounds = array<i64: 32, 32>}, {pipeline_mode = #tpu.pipeline_mode<synchronous>, transform_indices = @transform_4, window_bounds = array<i64: 32, 1>}, {pipeline_mode = #tpu.pipeline_mode<synchronous>, transform_indices = @transform_5, window_bounds = array<i64: 32, 32>}, {pipeline_mode = #tpu.pipeline_mode<synchronous>, transform_indices = @transform_6, window_bounds = array<i64: 32, 1>}, {pipeline_mode = #tpu.pipeline_mode<synchronous>, transform_indices = @transform_7, window_bounds = array<i64: 32, 32>}, {pipeline_mode = #tpu.pipeline_mode<synchronous>, transform_indices = @transform_8, window_bounds = array<i64: 32, 1>}, {pipeline_mode = #tpu.pipeline_mode<synchronous>, transform_indices = @transform_9, window_bounds = array<i64: 32, 32>}, {pipeline_mode = #tpu.pipeline_mode<synchronous>, transform_indices = @transform_10, window_bounds = array<i64: 32, 1>}, {pipeline_mode = #tpu.pipeline_mode<synchronous>, transform_indices = @transform_11, window_bounds = array<i64: 160, 1>}, {pipeline_mode = #tpu.pipeline_mode<synchronous>, transform_indices = @transform_12, window_bounds = array<i64: 1, 1>}, {transform_indices = @transform_13, window_bounds = array<i64: 1, 512>}]} {
    %c0 = arith.constant 0 : index
    %c0_0 = arith.constant 0 : index
    %0 = vector.load %arg1[%c0, %c0_0] : memref<3x512xf32, #tpu.memory_space<vmem>>, vector<3x512xf32>
    %c0_1 = arith.constant 0 : index
    %c0_2 = arith.constant 0 : index
    %1 = vector.load %arg12[%c0_1, %c0_2] : memref<160x1xf32, #tpu.memory_space<vmem>>, vector<160x1xf32>
    %c0_3 = arith.constant 0 : index
    %c0_4 = arith.constant 0 : index
    %2 = vector.load %arg2[%c0_3, %c0_4] : memref<32x3xf32, #tpu.memory_space<vmem>>, vector<32x3xf32>
    %cst = arith.constant dense<0.000000e+00> : vector<32x512xf32>
    %3 = tpu.matmul %2, %0, %cst {dimension_numbers = #tpu.dot_dimension_numbers<[1], [0], [0], [1], [0, 0, 1, 1], [], []>} : vector<32x3xf32>, vector<3x512xf32>, vector<32x512xf32> -> vector<32x512xf32>
    %c0_5 = arith.constant 0 : index
    %c0_6 = arith.constant 0 : index
    %4 = vector.load %arg3[%c0_5, %c0_6] : memref<32x1xf32, #tpu.memory_space<vmem>>, vector<32x1xf32>
    %5 = vector.broadcast %4 : vector<32x1xf32> to vector<32x512xf32>
    %6 = arith.addf %3, %5 : vector<32x512xf32>
    %cst_7 = arith.constant 0.000000e+00 : f32
    %7 = vector.broadcast %cst_7 : f32 to vector<32x512xf32>
    %8 = arith.maximumf %6, %7 : vector<32x512xf32>
    %9 = math.absf %6 : vector<32x512xf32>
    %cst_8 = arith.constant 0.000000e+00 : f32
    %10 = vector.broadcast %cst_8 : f32 to vector<32x512xf32>
    %11 = arith.subf %10, %9 : vector<32x512xf32>
    %12 = math.exp %11 : vector<32x512xf32>
    %13 = math.log1p %12 : vector<32x512xf32>
    %14 = arith.addf %8, %13 : vector<32x512xf32>
    %c0_9 = arith.constant 0 : index
    %c0_10 = arith.constant 0 : index
    %15 = vector.load %arg13[%c0_9, %c0_10] : memref<1x1xf32, #tpu.memory_space<vmem>>, vector<1x1xf32>
    %16 = vector.extract_strided_slice %1 {offsets = [0, 0], sizes = [32, 1], strides = [1, 1]} : vector<160x1xf32> to vector<32x1xf32>
    %17 = vector.broadcast %16 : vector<32x1xf32> to vector<32x512xf32>
    %18 = arith.mulf %17, %14 : vector<32x512xf32>
    %cst_11 = arith.constant dense<0.000000e+00> : vector<512xf32>
    %19 = vector.multi_reduction <add>, %18, %cst_11 [0] : vector<32x512xf32> to vector<512xf32>
    %20 = vector.shape_cast %19 : vector<512xf32> to vector<1x512xf32>
    %21 = vector.broadcast %15 : vector<1x1xf32> to vector<1x512xf32>
    %22 = arith.addf %21, %20 : vector<1x512xf32>
    %c0_12 = arith.constant 0 : index
    %c0_13 = arith.constant 0 : index
    %23 = vector.load %arg4[%c0_12, %c0_13] : memref<32x32xf32, #tpu.memory_space<vmem>>, vector<32x32xf32>
    %cst_14 = arith.constant dense<0.000000e+00> : vector<32x512xf32>
    %24 = tpu.matmul %23, %14, %cst_14 {dimension_numbers = #tpu.dot_dimension_numbers<[1], [0], [0], [1], [0, 0, 1, 1], [], []>} : vector<32x32xf32>, vector<32x512xf32>, vector<32x512xf32> -> vector<32x512xf32>
    %c0_15 = arith.constant 0 : index
    %c0_16 = arith.constant 0 : index
    %25 = vector.load %arg5[%c0_15, %c0_16] : memref<32x1xf32, #tpu.memory_space<vmem>>, vector<32x1xf32>
    %26 = vector.broadcast %25 : vector<32x1xf32> to vector<32x512xf32>
    %27 = arith.addf %24, %26 : vector<32x512xf32>
    %cst_17 = arith.constant 0.000000e+00 : f32
    %28 = vector.broadcast %cst_17 : f32 to vector<32x512xf32>
    %29 = arith.maximumf %27, %28 : vector<32x512xf32>
    %30 = math.absf %27 : vector<32x512xf32>
    %cst_18 = arith.constant 0.000000e+00 : f32
    %31 = vector.broadcast %cst_18 : f32 to vector<32x512xf32>
    %32 = arith.subf %31, %30 : vector<32x512xf32>
    %33 = math.exp %32 : vector<32x512xf32>
    %34 = math.log1p %33 : vector<32x512xf32>
    %35 = arith.addf %29, %34 : vector<32x512xf32>
    %36 = vector.extract_strided_slice %1 {offsets = [32, 0], sizes = [32, 1], strides = [1, 1]} : vector<160x1xf32> to vector<32x1xf32>
    %37 = vector.broadcast %36 : vector<32x1xf32> to vector<32x512xf32>
    %38 = arith.mulf %37, %35 : vector<32x512xf32>
    %cst_19 = arith.constant dense<0.000000e+00> : vector<512xf32>
    %39 = vector.multi_reduction <add>, %38, %cst_19 [0] : vector<32x512xf32> to vector<512xf32>
    %40 = vector.shape_cast %39 : vector<512xf32> to vector<1x512xf32>
    %41 = arith.addf %22, %40 : vector<1x512xf32>
    %c0_20 = arith.constant 0 : index
    %c0_21 = arith.constant 0 : index
    %42 = vector.load %arg6[%c0_20, %c0_21] : memref<32x32xf32, #tpu.memory_space<vmem>>, vector<32x32xf32>
    %cst_22 = arith.constant dense<0.000000e+00> : vector<32x512xf32>
    %43 = tpu.matmul %42, %35, %cst_22 {dimension_numbers = #tpu.dot_dimension_numbers<[1], [0], [0], [1], [0, 0, 1, 1], [], []>} : vector<32x32xf32>, vector<32x512xf32>, vector<32x512xf32> -> vector<32x512xf32>
    %c0_23 = arith.constant 0 : index
    %c0_24 = arith.constant 0 : index
    %44 = vector.load %arg7[%c0_23, %c0_24] : memref<32x1xf32, #tpu.memory_space<vmem>>, vector<32x1xf32>
    %45 = vector.broadcast %44 : vector<32x1xf32> to vector<32x512xf32>
    %46 = arith.addf %43, %45 : vector<32x512xf32>
    %cst_25 = arith.constant 0.000000e+00 : f32
    %47 = vector.broadcast %cst_25 : f32 to vector<32x512xf32>
    %48 = arith.maximumf %46, %47 : vector<32x512xf32>
    %49 = math.absf %46 : vector<32x512xf32>
    %cst_26 = arith.constant 0.000000e+00 : f32
    %50 = vector.broadcast %cst_26 : f32 to vector<32x512xf32>
    %51 = arith.subf %50, %49 : vector<32x512xf32>
    %52 = math.exp %51 : vector<32x512xf32>
    %53 = math.log1p %52 : vector<32x512xf32>
    %54 = arith.addf %48, %53 : vector<32x512xf32>
    %55 = vector.extract_strided_slice %1 {offsets = [64, 0], sizes = [32, 1], strides = [1, 1]} : vector<160x1xf32> to vector<32x1xf32>
    %56 = vector.broadcast %55 : vector<32x1xf32> to vector<32x512xf32>
    %57 = arith.mulf %56, %54 : vector<32x512xf32>
    %cst_27 = arith.constant dense<0.000000e+00> : vector<512xf32>
    %58 = vector.multi_reduction <add>, %57, %cst_27 [0] : vector<32x512xf32> to vector<512xf32>
    %59 = vector.shape_cast %58 : vector<512xf32> to vector<1x512xf32>
    %60 = arith.addf %41, %59 : vector<1x512xf32>
    %c0_28 = arith.constant 0 : index
    %c0_29 = arith.constant 0 : index
    %61 = vector.load %arg8[%c0_28, %c0_29] : memref<32x32xf32, #tpu.memory_space<vmem>>, vector<32x32xf32>
    %cst_30 = arith.constant dense<0.000000e+00> : vector<32x512xf32>
    %62 = tpu.matmul %61, %54, %cst_30 {dimension_numbers = #tpu.dot_dimension_numbers<[1], [0], [0], [1], [0, 0, 1, 1], [], []>} : vector<32x32xf32>, vector<32x512xf32>, vector<32x512xf32> -> vector<32x512xf32>
    %c0_31 = arith.constant 0 : index
    %c0_32 = arith.constant 0 : index
    %63 = vector.load %arg9[%c0_31, %c0_32] : memref<32x1xf32, #tpu.memory_space<vmem>>, vector<32x1xf32>
    %64 = vector.broadcast %63 : vector<32x1xf32> to vector<32x512xf32>
    %65 = arith.addf %62, %64 : vector<32x512xf32>
    %cst_33 = arith.constant 0.000000e+00 : f32
    %66 = vector.broadcast %cst_33 : f32 to vector<32x512xf32>
    %67 = arith.maximumf %65, %66 : vector<32x512xf32>
    %68 = math.absf %65 : vector<32x512xf32>
    %cst_34 = arith.constant 0.000000e+00 : f32
    %69 = vector.broadcast %cst_34 : f32 to vector<32x512xf32>
    %70 = arith.subf %69, %68 : vector<32x512xf32>
    %71 = math.exp %70 : vector<32x512xf32>
    %72 = math.log1p %71 : vector<32x512xf32>
    %73 = arith.addf %67, %72 : vector<32x512xf32>
    %74 = vector.extract_strided_slice %1 {offsets = [96, 0], sizes = [32, 1], strides = [1, 1]} : vector<160x1xf32> to vector<32x1xf32>
    %75 = vector.broadcast %74 : vector<32x1xf32> to vector<32x512xf32>
    %76 = arith.mulf %75, %73 : vector<32x512xf32>
    %cst_35 = arith.constant dense<0.000000e+00> : vector<512xf32>
    %77 = vector.multi_reduction <add>, %76, %cst_35 [0] : vector<32x512xf32> to vector<512xf32>
    %78 = vector.shape_cast %77 : vector<512xf32> to vector<1x512xf32>
    %79 = arith.addf %60, %78 : vector<1x512xf32>
    %c0_36 = arith.constant 0 : index
    %c0_37 = arith.constant 0 : index
    %80 = vector.load %arg10[%c0_36, %c0_37] : memref<32x32xf32, #tpu.memory_space<vmem>>, vector<32x32xf32>
    %cst_38 = arith.constant dense<0.000000e+00> : vector<32x512xf32>
    %81 = tpu.matmul %80, %73, %cst_38 {dimension_numbers = #tpu.dot_dimension_numbers<[1], [0], [0], [1], [0, 0, 1, 1], [], []>} : vector<32x32xf32>, vector<32x512xf32>, vector<32x512xf32> -> vector<32x512xf32>
    %c0_39 = arith.constant 0 : index
    %c0_40 = arith.constant 0 : index
    %82 = vector.load %arg11[%c0_39, %c0_40] : memref<32x1xf32, #tpu.memory_space<vmem>>, vector<32x1xf32>
    %83 = vector.broadcast %82 : vector<32x1xf32> to vector<32x512xf32>
    %84 = arith.addf %81, %83 : vector<32x512xf32>
    %cst_41 = arith.constant 0.000000e+00 : f32
    %85 = vector.broadcast %cst_41 : f32 to vector<32x512xf32>
    %86 = arith.maximumf %84, %85 : vector<32x512xf32>
    %87 = math.absf %84 : vector<32x512xf32>
    %cst_42 = arith.constant 0.000000e+00 : f32
    %88 = vector.broadcast %cst_42 : f32 to vector<32x512xf32>
    %89 = arith.subf %88, %87 : vector<32x512xf32>
    %90 = math.exp %89 : vector<32x512xf32>
    %91 = math.log1p %90 : vector<32x512xf32>
    %92 = arith.addf %86, %91 : vector<32x512xf32>
    %93 = vector.extract_strided_slice %1 {offsets = [128, 0], sizes = [32, 1], strides = [1, 1]} : vector<160x1xf32> to vector<32x1xf32>
    %94 = vector.broadcast %93 : vector<32x1xf32> to vector<32x512xf32>
    %95 = arith.mulf %94, %92 : vector<32x512xf32>
    %cst_43 = arith.constant dense<0.000000e+00> : vector<512xf32>
    %96 = vector.multi_reduction <add>, %95, %cst_43 [0] : vector<32x512xf32> to vector<512xf32>
    %97 = vector.shape_cast %96 : vector<512xf32> to vector<1x512xf32>
    %98 = arith.addf %79, %97 : vector<1x512xf32>
    %cst_44 = arith.constant 0.000000e+00 : f32
    %99 = vector.broadcast %cst_44 : f32 to vector<1x512xf32>
    %100 = arith.maximumf %98, %99 : vector<1x512xf32>
    %101 = math.absf %98 : vector<1x512xf32>
    %cst_45 = arith.constant 0.000000e+00 : f32
    %102 = vector.broadcast %cst_45 : f32 to vector<1x512xf32>
    %103 = arith.subf %102, %101 : vector<1x512xf32>
    %104 = math.exp %103 : vector<1x512xf32>
    %105 = math.log1p %104 : vector<1x512xf32>
    %106 = arith.addf %100, %105 : vector<1x512xf32>
    %c0_46 = arith.constant 0 : index
    %c0_47 = arith.constant 0 : index
    %107 = vector.load %arg14[%c0_46, %c0_47] : memref<1x512xf32, #tpu.memory_space<vmem>>, vector<1x512xf32>
    tpu.vector_store %arg14[%c0_46, %c0_47], %106 {strides = array<i32>} : memref<1x512xf32, #tpu.memory_space<vmem>>, vector<1x512xf32>,
    return
  }
  func.func @transform_0(%arg0: i32) -> (i32, i32) {
    %c0_i32 = arith.constant 0 : i32
    %c0_i32_0 = arith.constant 0 : i32
    return %c0_i32, %arg0 : i32, i32
  }
  func.func @transform_1(%arg0: i32) -> (i32, i32) {
    %c0_i32 = arith.constant 0 : i32
    %c0_i32_0 = arith.constant 0 : i32
    %c0_i32_1 = arith.constant 0 : i32
    return %c0_i32, %c0_i32_0 : i32, i32
  }
  func.func @transform_2(%arg0: i32) -> (i32, i32) {
    %c0_i32 = arith.constant 0 : i32
    %c0_i32_0 = arith.constant 0 : i32
    %c0_i32_1 = arith.constant 0 : i32
    return %c0_i32, %c0_i32_0 : i32, i32
  }
  func.func @transform_3(%arg0: i32) -> (i32, i32) {
    %c0_i32 = arith.constant 0 : i32
    %c0_i32_0 = arith.constant 0 : i32
    %c0_i32_1 = arith.constant 0 : i32
    return %c0_i32, %c0_i32_0 : i32, i32
  }
  func.func @transform_4(%arg0: i32) -> (i32, i32) {
    %c0_i32 = arith.constant 0 : i32
    %c0_i32_0 = arith.constant 0 : i32
    %c0_i32_1 = arith.constant 0 : i32
    return %c0_i32, %c0_i32_0 : i32, i32
  }
  func.func @transform_5(%arg0: i32) -> (i32, i32) {
    %c0_i32 = arith.constant 0 : i32
    %c0_i32_0 = arith.constant 0 : i32
    %c0_i32_1 = arith.constant 0 : i32
    return %c0_i32, %c0_i32_0 : i32, i32
  }
  func.func @transform_6(%arg0: i32) -> (i32, i32) {
    %c0_i32 = arith.constant 0 : i32
    %c0_i32_0 = arith.constant 0 : i32
    %c0_i32_1 = arith.constant 0 : i32
    return %c0_i32, %c0_i32_0 : i32, i32
  }
  func.func @transform_7(%arg0: i32) -> (i32, i32) {
    %c0_i32 = arith.constant 0 : i32
    %c0_i32_0 = arith.constant 0 : i32
    %c0_i32_1 = arith.constant 0 : i32
    return %c0_i32, %c0_i32_0 : i32, i32
  }
  func.func @transform_8(%arg0: i32) -> (i32, i32) {
    %c0_i32 = arith.constant 0 : i32
    %c0_i32_0 = arith.constant 0 : i32
    %c0_i32_1 = arith.constant 0 : i32
    return %c0_i32, %c0_i32_0 : i32, i32
  }
  func.func @transform_9(%arg0: i32) -> (i32, i32) {
    %c0_i32 = arith.constant 0 : i32
    %c0_i32_0 = arith.constant 0 : i32
    %c0_i32_1 = arith.constant 0 : i32
    return %c0_i32, %c0_i32_0 : i32, i32
  }
  func.func @transform_10(%arg0: i32) -> (i32, i32) {
    %c0_i32 = arith.constant 0 : i32
    %c0_i32_0 = arith.constant 0 : i32
    %c0_i32_1 = arith.constant 0 : i32
    return %c0_i32, %c0_i32_0 : i32, i32
  }
  func.func @transform_11(%arg0: i32) -> (i32, i32) {
    %c0_i32 = arith.constant 0 : i32
    %c0_i32_0 = arith.constant 0 : i32
    %c0_i32_1 = arith.constant 0 : i32
    return %c0_i32, %c0_i32_0 : i32, i32
  }
  func.func @transform_12(%arg0: i32) -> (i32, i32) {
    %c0_i32 = arith.constant 0 : i32
    %c0_i32_0 = arith.constant 0 : i32
    %c0_i32_1 = arith.constant 0 : i32
    return %c0_i32, %c0_i32_0 : i32, i32
  }
  func.func @transform_13(%arg0: i32) -> (i32, i32) {
    %c0_i32 = arith.constant 0 : i32
    %c0_i32_0 = arith.constant 0 : i32
    return %c0_i32, %arg0 : i32, i32
  }
}

</mosaic_0001>

<bundles_post_ra>
// kernel: direct_reflectance_forward.1
= control target key start
LH: loop header
LB: loop body
LE: loop exit
PB: predicated region body
PF: predicated region fallthrough
CT: control target
= control target key end

     0   :  { %vm113_vm0 = vcmask 1042432   ;;  %v5337_v2 = vmov 0.0   ;;  %v3249_v6 = vmov 0   ;;  %vm100_vm1 = vcmask 23552   ;;  %s5323_s0 = inlined_call_operand.vmem [shape: f32[3,512], index: 0, kind: input, shape index: {}]   ;;  %s5324_s1 = inlined_call_operand.vmem [shape: f32[32,3], index: 1, kind: input, shape index: {}]   ;;  %s5325_s2 = inlined_call_operand.vmem [shape: f32[32,1], index: 2, kind: input, shape index: {}]   ;;  %s5326_s12 = inlined_call_operand.<no memory space> [shape: f32[1,1], index: 12, kind: input, shape index: {}]   ;;  %s5327_s4 = inlined_call_operand.vmem [shape: f32[32,1], index: 4, kind: input, shape index: {}]   ;;  %s5328_s6 = inlined_call_operand.vmem [shape: f32[32,1], index: 6, kind: input, shape index: {}]   ;;  %s5329_s8 = inlined_call_operand.vmem [shape: f32[32,1], index: 8, kind: input, shape index: {}]   ;;  %s5330_s10 = inlined_call_operand.vmem [shape: f32[32,1], index: 10, kind: input, shape index: {}]   ;;  %s5331_s11 = inlined_call_operand.vmem [shape: f32[160,1], index: 11, kind: input, shape index: {}]   ;;  %s5332_s3 = inlined_call_operand.vmem [shape: f32[32,32], index: 3, kind: input, shape index: {}]   ;;  %s5333_s5 = inlined_call_operand.vmem [shape: f32[32,32], index: 5, kind: input, shape index: {}]   ;;  %s5334_s7 = inlined_call_operand.vmem [shape: f32[32,32], index: 7, kind: input, shape index: {}]   ;;  %s5335_s9 = inlined_call_operand.vmem [shape: f32[32,32], index: 9, kind: input, shape index: {}]   ;;  %s5336_s13 = inlined_call_operand.vmem [shape: f32[1,512], index: 13, kind: output, shape index: {}]  }
   0x1   :  { %v46_v0 = vld [vmem:[%s5323_s0] sm:$0x77]  ;;  %v47_v1 = vld [vmem:[%s5323_s0 + $0x8] sm:$0x77]  ;;  %186 = vmatprep.mubr.f32.mxu0 %v5337_v2  ;;  %275 = vmatprep.mubr.f32.mxu1 %v5337_v2  ;;  %v18_v3 = vstv %s5326_s12  ;;  %v75_v7 = vld [vmem:[%s5325_s2 + $0x18] sm:$0xff] }
   0x2   :  { %v98_v4 = vcombine.high %v46_v0, %v46_v0  ;;  %v99_v5 = vcombine.high %v47_v1, %v47_v1  ;;  %2908 = vset.pattern.permute.xlu0 %v3249_v6  ;;  %2909 = vset.pattern.permute.xlu1 %v3249_v6  ;;  %19 = vst [vmem:[#allocation2] sm:$0x1] %v18_v3  ;;  %v68_v8 = vld [vmem:[%s5324_s1] sm:$0xff]  ;;  %v74_v9 = vld [vmem:[%s5325_s2 + $0x10] sm:$0xff]  ;;  %v73_v10 = vld [vmem:[%s5325_s2 + $0x8] sm:$0xff] }
   0x3   :  { %93 = vperm.xlu0 %2908, %v75_v7   ;;  %v69_v11 = vld [vmem:[%s5324_s1 + $0x8] sm:$0xff]  ;;  %83 = vperm.xlu1 %2909, %v73_v10   ;;  %v633_v12 = vld [vmem:[%s5327_s4 + $0x18] sm:$0xff]  ;;  %v72_v13 = vld [vmem:[%s5325_s2] sm:$0xff] }
   0x4   :  { %2861 = vmatprep.subr.msk.mxu0 %vm113_vm0, %v98_v4  ;;  %2867 = vmatprep.subr.msk.mxu1 %vm113_vm0, %v99_v5  ;;  %v70_v14 = vld [vmem:[%s5324_s1 + $0x10] sm:$0xff]  ;;  %v631_v15 = vld [vmem:[%s5327_s4 + $0x8] sm:$0xff]  ;;  %v71_v17 = vld [vmem:[%s5324_s1 + $0x18] sm:$0xff] }
   0x5   :  { %2862 = vmatpush1.msk.msra.mxu0 %vm113_vm0, %v46_v0  ;;  %2868 = vmatpush1.msk.msra.mxu1 %vm113_vm0, %v47_v1  ;;  %v632_v16 = vld [vmem:[%s5327_s4 + $0x10] sm:$0xff]  ;;  %v1168_v18 = vld [vmem:[%s5328_s6 + $0x18] sm:$0xff]  ;;  %v630_v19 = vld [vmem:[%s5327_s4] sm:$0xff] }
   0x6   :  { %2863 = vmatmul.mubr.msk.f32.vlgmr.msra.gmra.mxu0 %vm100_vm1, %v68_v8  ;;  %2869 = vmatmul.mubr.msk.f32.vlgmr.msra.gmra.mxu1 %vm100_vm1, %v68_v8  ;;  %v1166_v20 = vld [vmem:[%s5328_s6 + $0x8] sm:$0xff]  ;;  %v1167_v21 = vld [vmem:[%s5328_s6 + $0x10] sm:$0xff]  ;;  %v1702_v22 = vld [vmem:[%s5329_s8 + $0x18] sm:$0xff] }
   0x7   :  { %192 = vmatprep.mubr.f32.mxu0 %v5337_v2  ;;  %281 = vmatprep.mubr.f32.mxu1 %v5337_v2  ;;  %v1165_v23 = vld [vmem:[%s5328_s6] sm:$0xff]  ;;  %v1700_v24 = vld [vmem:[%s5329_s8 + $0x8] sm:$0xff]  ;;  %v1701_v25 = vld [vmem:[%s5329_s8 + $0x10] sm:$0xff] }
   0x8   :  { %88 = vperm.xlu0 %2908, %v74_v9   ;;  %78 = vperm.xlu1 %2909, %v72_v13   ;;  %v2233_v26 = vld [vmem:[%s5330_s10] sm:$0xff]  ;;  %v2235_v28 = vld [vmem:[%s5330_s10 + $0x10] sm:$0xff]  ;;  %v2234_v29 = vld [vmem:[%s5330_s10 + $0x8] sm:$0xff] }
   0x9   :  { %v1699_v27 = vld [vmem:[%s5329_s8] sm:$0xff]  ;;  %v2236_v31 = vld [vmem:[%s5330_s10 + $0x18] sm:$0xff]  ;;  %v50_v32 = vld [vmem:[%s5331_s11 + $0x10] sm:$0xff] }
   0xa   :  { %2864 = vmatmul.mubr.msk.f32.gmra.mxu0 %vm100_vm1, %v69_v11  ;;  %2870 = vmatmul.mubr.msk.f32.gmra.mxu1 %vm100_vm1, %v69_v11  ;;  %v48_v30 = vld [vmem:[%s5331_s11] sm:$0xff]  ;;  %v49_v33 = vld [vmem:[%s5331_s11 + $0x8] sm:$0xff]  ;;  %v54_v36 = vld [vmem:[%s5331_s11 + $0x30] sm:$0xff] }
   0xb   :  { %198 = vmatprep.mubr.f32.mxu0 %v5337_v2  ;;  %287 = vmatprep.mubr.f32.mxu1 %v5337_v2  ;;  %v53_v34 = vld [vmem:[%s5331_s11 + $0x28] sm:$0xff]  ;;  %v52_v35 = vld [vmem:[%s5331_s11 + $0x20] sm:$0xff]  ;;  %v51_v37 = vld [vmem:[%s5331_s11 + $0x18] sm:$0xff] }
   0xc   :  { %651 = vperm.xlu0 %2908, %v633_v12   ;;  %646 = vperm.xlu1 %2909, %v632_v16   ;;  %v57_v38 = vld [vmem:[%s5331_s11 + $0x48] sm:$0xff]  ;;  %v56_v39 = vld [vmem:[%s5331_s11 + $0x40] sm:$0xff]  ;;  %v58_v40 = vld [vmem:[%s5331_s11 + $0x50] sm:$0xff] }
   0xd   :  { %v55_v41 = vld [vmem:[%s5331_s11 + $0x38] sm:$0xff]  ;;  %v61_v42 = vld [vmem:[%s5331_s11 + $0x68] sm:$0xff]  ;;  %v60_v43 = vld [vmem:[%s5331_s11 + $0x60] sm:$0xff] }
   0xe   :  { %2865 = vmatmul.mubr.msk.f32.gmra.mxu0 %vm100_vm1, %v70_v14  ;;  %2871 = vmatmul.mubr.msk.f32.gmra.mxu1 %vm100_vm1, %v70_v14  ;;  %v62_v44 = vld [vmem:[%s5331_s11 + $0x70] sm:$0xff]  ;;  %v59_v45 = vld [vmem:[%s5331_s11 + $0x58] sm:$0xff]  ;;  %v65_v46 = vld [vmem:[%s5331_s11 + $0x88] sm:$0xff] }
   0xf   :  { %204 = vmatprep.mubr.f32.mxu0 %v5337_v2  ;;  %293 = vmatprep.mubr.f32.mxu1 %v5337_v2  ;;  %v64_v47 = vld [vmem:[%s5331_s11 + $0x80] sm:$0xff]  ;;  %v66_v48 = vld [vmem:[%s5331_s11 + $0x90] sm:$0xff]  ;;  %v63_v49 = vld [vmem:[%s5331_s11 + $0x78] sm:$0xff] }
  0x10   :  { %641 = vperm.xlu0 %2908, %v631_v15   ;;  %636 = vperm.xlu1 %2909, %v630_v19   ;;  %v540_v50 = vld [vmem:[#allocation2] sm:$0x1]  ;;  %v67_v51 = vld [vmem:[%s5331_s11 + $0x98] sm:$0xff] }
  0x12   :  { %2866 = vmatmul.mubr.msk.f32.gmra.mxu0 %vm100_vm1, %v71_v17  ;;  %2872 = vmatmul.mubr.msk.f32.gmra.mxu1 %vm100_vm1, %v71_v17 }
  0x13   :  { %731 = vmatprep.mubr.f32.mxu0 %v5337_v2  ;;  %820 = vmatprep.mubr.f32.mxu1 %v5337_v2 }
  0x14   :  { %1186 = vperm.xlu0 %2908, %v1168_v18   ;;  %1181 = vperm.xlu1 %2909, %v1167_v21  }
  0x18   :  { %1176 = vperm.xlu0 %2908, %v1166_v20   ;;  %1171 = vperm.xlu1 %2909, %v1165_v23  }
  0x1c   :  { %1720 = vperm.xlu0 %2908, %v1702_v22   ;;  %1715 = vperm.xlu1 %2909, %v1701_v25  }
  0x20   :  { %1710 = vperm.xlu0 %2908, %v1700_v24   ;;  %1705 = vperm.xlu1 %2909, %v1699_v27  }
  0x24   :  { %2239 = vperm.xlu0 %2908, %v2233_v26   ;;  %2244 = vperm.xlu1 %2909, %v2234_v29  }
  0x28   :  { %2249 = vperm.xlu0 %2908, %v2235_v28   ;;  %2254 = vperm.xlu1 %2909, %v2236_v31  }
  0x2c   :  { %543 = vperm.xlu0 %2908, %v48_v30   ;;  %548 = vperm.xlu1 %2909, %v49_v33  }
  0x30   :  { %553 = vperm.xlu0 %2908, %v50_v32   ;;  %1087 = vperm.xlu1 %2909, %v52_v35  }
  0x34   :  { %1092 = vperm.xlu0 %2908, %v53_v34   ;;  %558 = vperm.xlu1 %2909, %v51_v37  }
  0x38   :  { %1097 = vperm.xlu0 %2908, %v54_v36   ;;  %1621 = vperm.xlu1 %2909, %v56_v39  }
  0x3c   :  { %1626 = vperm.xlu0 %2908, %v57_v38   ;;  %1102 = vperm.xlu1 %2909, %v55_v41  }
  0x40   :  { %1631 = vperm.xlu0 %2908, %v58_v40   ;;  %2155 = vperm.xlu1 %2909, %v60_v43  }
  0x44   :  { %2160 = vperm.xlu0 %2908, %v61_v42   ;;  %1636 = vperm.xlu1 %2909, %v59_v45  }
  0x48   :  { %2165 = vperm.xlu0 %2908, %v62_v44   ;;  %2689 = vperm.xlu1 %2909, %v64_v47  }
  0x4c   :  { %2694 = vperm.xlu0 %2908, %v65_v46   ;;  %2170 = vperm.xlu1 %2909, %v63_v49  }
  0x50   :  { %2699 = vperm.xlu0 %2908, %v66_v48   ;;  %2704 = vperm.xlu1 %2909, %v67_v51  }
  0x54   :  { %615 = vperm.xlu0 %2908, %v540_v50  }
  0x7e   :  { %v3484_v52 = vpop.permute.xlu0 %93  ;;  %v3486_v53 = vpop.permute.xlu1 %83 }
  0x83   :  { %v89_v54 = vpop.permute.xlu0 %88  ;;  %v79_v55 = vpop.permute.xlu1 %78 }
  0x87   :  { %v3488_v56 = vpop.permute.xlu0 %651  ;;  %v3490_v57 = vpop.permute.xlu1 %646 }
  0x8b   :  { %v3498_v5 = vpop.permute.xlu0 %641  ;;  %v3500_v6 = vpop.permute.xlu1 %636 }
  0x8f   :  { %v3518_v24 = vpop.permute.xlu0 %1186  ;;  %v3520_v27 = vpop.permute.xlu1 %1181 }
  0x90   :  { %5358 = vst [vmem:[#allocation3_spill] sm:$0xff] %v3518_v24  ;;  %5359 = vst [vmem:[#allocation4_spill] sm:$0xff] %v3520_v27 }
  0x93   :  { %v3531_v42 = vpop.permute.xlu0 %1176  ;;  %v3534_v45 = vpop.permute.xlu1 %1171 }
  0xc6   :  { %v188_v58 = vpop.f32.mrf.mxu0  ;;  %v277_v59 = vpop.f32.mrf.mxu1 }
  0xc7   :  { %v3492_v60 = vadd.f32 %v188_v58, %v79_v55  ;;  %v3494_v61 = vadd.f32 %v277_v59, %v79_v55 }
  0xc8   :  { %v190_v62 = vpop.f32.mrf.mxu0  ;;  %v279_v63 = vpop.f32.mrf.mxu1 }
  0xc9   :  { %v316_v0 = vand.u32 2147483647, %v3492_v60  ;;  %v318_v1 = vand.u32 2147483647, %v3494_v61  ;;  %v3508_v11 = vadd.f32 %v190_v62, %v79_v55  ;;  %v3536_v47 = vadd.f32 %v279_v63, %v79_v55 }
  0xca   :  { %v194_v3 = vpop.f32.mrf.mxu0  ;;  %v283_v4 = vpop.f32.mrf.mxu1 }
  0xcb   :  { %v332_v7 = vsub.f32 0.0, %v316_v0  ;;  %v334_v8 = vsub.f32 0.0, %v318_v1  ;;  %v3503_v9 = vadd.f32 %v194_v3, %v3486_v53  ;;  %v3506_v10 = vadd.f32 %v283_v4, %v3486_v53 }
  0xcc   :  { %v196_v12 = vpop.f32.mrf.mxu0  ;;  %v285_v13 = vpop.f32.mrf.mxu1  ;;  %v317_v22 = vand.u32 2147483647, %v3508_v11  ;;  %v319_v3 = vand.u32 2147483647, %v3536_v47 }
  0xcd   :  { %v348_v14 = vmul.f32 1.442695, %v332_v7  ;;  %v352_v15 = vmul.f32 1.442695, %v334_v8  ;;  %v320_v16 = vand.u32 2147483647, %v3503_v9  ;;  %v3513_v20 = vadd.f32 %v196_v12, %v3486_v53  ;;  %v3555_v8 = vpop.permute.xlu0 %1720 }
  0xce   :  { %v322_v17 = vand.u32 2147483647, %v3506_v10  ;;  %v200_v18 = vpop.f32.mrf.mxu0  ;;  %v289_v19 = vpop.f32.mrf.mxu1  ;;  %v333_v33 = vsub.f32 0.0, %v317_v22  ;;  %v3546_v1 = vadd.f32 %v285_v13, %v3486_v53  ;;  %5360 = vst [vmem:[#allocation5_spill] sm:$0xff] %v3555_v8  ;;  %v335_v22 = vsub.f32 0.0, %v319_v3 }
  0xcf   :  { %2912 = vpow2.f32 %v348_v14  ;;  %v3515_v21 = vadd.f32 %v200_v18, %v89_v54  ;;  %v336_v23 = vsub.f32 0.0, %v320_v16  ;;  %v321_v29 = vand.u32 2147483647, %v3513_v20  ;;  %v3561_v13 = vpop.permute.xlu1 %1715 }
  0xd0   :  { %2914 = vpow2.f32 %v352_v15  ;;  %v338_v25 = vsub.f32 0.0, %v322_v17  ;;  %v202_v26 = vpop.f32.mrf.mxu0  ;;  %v291_v30 = vpop.f32.mrf.mxu1  ;;  %v3524_v34 = vadd.f32 %v289_v19, %v89_v54  ;;  %v350_v46 = vmul.f32 1.442695, %v333_v33  ;;  %5361 = vst [vmem:[#allocation6_spill] sm:$0xff] %v3561_v13 }
  0xd1   :  { %v356_v28 = vmul.f32 1.442695, %v336_v23  ;;  %v324_v32 = vand.u32 2147483647, %v3515_v21  ;;  %v3526_v35 = vadd.f32 %v202_v26, %v89_v54  ;;  %v3528_v37 = vadd.f32 %v291_v30, %v89_v54 }
  0xd2   :  { %v360_v31 = vmul.f32 1.442695, %v338_v25  ;;  %v337_v38 = vsub.f32 0.0, %v321_v29  ;;  %v326_v39 = vand.u32 2147483647, %v3524_v34  ;;  %v206_v40 = vpop.f32.mrf.mxu0  ;;  %v295_v41 = vpop.f32.mrf.mxu1  ;;  %v300_v33 = vmax.f32 %v3492_v60, 0.0 }
  0xd3   :  { %2916 = vpow2.f32 %v356_v28  ;;  %v340_v36 = vsub.f32 0.0, %v324_v32  ;;  %v325_v44 = vand.u32 2147483647, %v3526_v35  ;;  %v327_v49 = vand.u32 2147483647, %v3528_v37  ;;  %v3574_v32 = vpop.permute.xlu0 %1710 }
  0xd4   :  { %2918 = vpow2.f32 %v360_v31  ;;  %v342_v48 = vsub.f32 0.0, %v326_v39  ;;  %v3540_v51 = vadd.f32 %v206_v40, %v3484_v52  ;;  %v3543_v54 = vadd.f32 %v295_v41, %v3484_v52  ;;  %v208_v0 = vpop.f32.mrf.mxu0  ;;  %v297_v19 = vpop.f32.mrf.mxu1  ;;  %5362 = vst [vmem:[#allocation7_spill] sm:$0xff] %v3574_v32 }
  0xd5   :  { %v364_v43 = vmul.f32 1.442695, %v340_v36  ;;  %v341_v50 = vsub.f32 0.0, %v325_v44  ;;  %v358_v58 = vmul.f32 1.442695, %v337_v38  ;;  %v343_v62 = vsub.f32 0.0, %v327_v49  ;;  %v3578_v39 = vpop.permute.xlu1 %1705 }
  0xd6   :  { %v368_v59 = vmul.f32 1.442695, %v342_v48  ;;  %v328_v55 = vand.u32 2147483647, %v3540_v51  ;;  %v330_v4 = vand.u32 2147483647, %v3543_v54  ;;  %v3559_v53 = vadd.f32 %v208_v0, %v3484_v52 }
  0xd7   :  { %2920 = vpow2.f32 %v364_v43  ;;  %v366_v14 = vmul.f32 1.442695, %v341_v50  ;;  %v370_v16 = vmul.f32 1.442695, %v343_v62  ;;  %v323_v17 = vand.u32 2147483647, %v3546_v1 }
  0xd8   :  { %2922 = vpow2.f32 %v368_v59  ;;  %v344_v18 = vsub.f32 0.0, %v328_v55  ;;  %v346_v23 = vsub.f32 0.0, %v330_v4  ;;  %v329_v28 = vand.u32 2147483647, %v3559_v53  ;;  %5363 = vst [vmem:[#allocation8_spill] sm:$0xff] %v3578_v39 }
  0xd9   :  { %2924 = vpow2.f32 %v350_v46  ;;  %v3572_v31 = vadd.f32 %v297_v19, %v3484_v52  ;;  %v339_v38 = vsub.f32 0.0, %v323_v17  ;;  %v354_v41 = vmul.f32 1.442695, %v335_v22  ;;  %v3600_v22 = vpop.permute.xlu1 %2244 }
  0xda   :  { %2926 = vpow2.f32 %v358_v58  ;;  %v372_v26 = vmul.f32 1.442695, %v344_v18  ;;  %v376_v43 = vmul.f32 1.442695, %v346_v23  ;;  %v345_v46 = vsub.f32 0.0, %v329_v28  ;;  %5365 = vst [vmem:[#allocation10_spill] sm:$0xff] %v3600_v22 }
  0xdb   :  { %v331_v58 = vand.u32 2147483647, %v3572_v31  ;;  %v362_v62 = vmul.f32 1.442695, %v339_v38 }
  0xdc   :  { %v3549_v63 = vpop.eup %2912  ;;  %v374_v4 = vmul.f32 1.442695, %v345_v46 }
  0xdd   :  { %v3553_v7 = vpop.eup %2914  ;;  %v380_v12 = vadd.f32 1.0, %v3549_v63  ;;  %v383_v44 = vmul.f32 -0.5, %v3549_v63  ;;  %v386_v23 = vand.u32 2147483647, %v3549_v63 }
  0xde   :  { %v398_v15 = vadd.f32 1.0, %v3553_v7  ;;  %v401_v59 = vmul.f32 -0.5, %v3553_v7  ;;  %v404_v38 = vand.u32 2147483647, %v3553_v7 }
  0xdf   :  { %2928 = vlog2.f32 %v380_v12  ;;  %v347_v12 = vsub.f32 0.0, %v331_v58  ;;  %vm3620_vm2 = vcmp.lt.f32.partialorder %v386_v23, 0.0004427343 }
  0xe0   :  { %2930 = vlog2.f32 %v398_v15  ;;  %v3565_v25 = vpop.eup %2916  ;;  %v3594_v15 = vpop.permute.xlu0 %2239  ;;  %vm3625_vm3 = vcmp.lt.f32.partialorder %v404_v38, 0.0004427343 }
  0xe1   :  { %2932 = vpow2.f32 %v366_v14  ;;  %v3568_v29 = vpop.eup %2918  ;;  %v416_v30 = vadd.f32 1.0, %v3565_v25  ;;  %5364 = vst [vmem:[#allocation9_spill] sm:$0xff] %v3594_v15  ;;  %v419_v17 = vmul.f32 -0.5, %v3565_v25 }
  0xe2   :  { %2934 = vpow2.f32 %v370_v16  ;;  %v434_v36 = vadd.f32 1.0, %v3568_v29  ;;  %v384_v16 = vadd.f32 1.0, %v383_v44  ;;  %v422_v44 = vand.u32 2147483647, %v3565_v25 }
  0xe3   :  { %2936 = vpow2.f32 %v372_v26  ;;  %v437_v26 = vmul.f32 -0.5, %v3568_v29  ;;  %v440_v46 = vand.u32 2147483647, %v3568_v29 }
  0xe4   :  { %2938 = vlog2.f32 %v416_v30  ;;  %v3583_v48 = vpop.eup %2920  ;;  %v385_v50 = vmul.f32 %v3549_v63, %v384_v16  ;;  %v3618_v49 = vpop.permute.xlu0 %2249  ;;  %vm3636_vm4 = vcmp.lt.f32.partialorder %v422_v44, 0.0004427343 }
  0xe5   :  { %2940 = vlog2.f32 %v434_v36  ;;  %v452_v55 = vadd.f32 1.0, %v3583_v48  ;;  %v3592_v14 = vpop.eup %2922  ;;  %v402_v36 = vadd.f32 1.0, %v401_v59  ;;  %v438_v3 = vadd.f32 1.0, %v437_v26  ;;  %5366 = vst [vmem:[#allocation11_spill] sm:$0xff] %v3618_v49 }
  0xe6   :  { %2942 = vpow2.f32 %v376_v43  ;;  %v3598_v19 = vpop.eup %2924  ;;  %v470_v28 = vadd.f32 1.0, %v3592_v14  ;;  %vm3640_vm5 = vcmp.lt.f32.partialorder %v440_v46, 0.0004427343 }
  0xe7   :  { %2944 = vpow2.f32 %v354_v41  ;;  %v3605_v30 = vpop.eup %2926  ;;  %v378_v41 = vmul.f32 1.442695, %v347_v12  ;;  %v403_v63 = vmul.f32 %v3553_v7, %v402_v36  ;;  %v473_v7 = vmul.f32 -0.5, %v3592_v14 }
  0xe8   :  { %2946 = vlog2.f32 %v452_v55  ;;  %v425_v12 = vadd.f32 1.0, %v3605_v30  ;;  %v3670_v60 = vpop.permute.xlu0 %543 }
  0xe9   :  { %2948 = vpow2.f32 %v374_v4  ;;  %v420_v4 = vadd.f32 1.0, %v419_v17  ;;  %v458_v17 = vand.u32 2147483647, %v3583_v48 }
  0xea   :  { %2950 = vpow2.f32 %v362_v62  ;;  %v455_v62 = vmul.f32 -0.5, %v3583_v48 }
  0xeb   :  { %2952 = vlog2.f32 %v470_v28  ;;  %v421_v58 = vmul.f32 %v3565_v25, %v420_v4  ;;  %v439_v28 = vmul.f32 %v3568_v29, %v438_v3  ;;  %vm3657_vm6 = vcmp.lt.f32.partialorder %v458_v17, 0.0004427343 }
  0xec   :  { %v2929_v43 = vpop.eup %2928  ;;  %2954 = vpow2.f32 %v378_v41  ;;  %v3632_v41 = vpop.permute.xlu1 %2254  ;;  %v456_v46 = vadd.f32 1.0, %v455_v62  ;;  %v5378_v25 = vmax.f32 %v3494_v61, 0.0  ;;  %v474_v3 = vadd.f32 1.0, %v473_v7 }
  0xed   :  { %v2931_v55 = vpop.eup %2930  ;;  %v382_v2 = vmul.f32 0.6931472, %v2929_v43  ;;  %5371 = vst [vmem:[#allocation12_spill] sm:$0xff] %v3632_v41  ;;  %2956 = vlog2.f32 %v425_v12 }
  0xee   :  { %v3612_v18 = vpop.eup %2932  ;;  %v400_v59 = vmul.f32 0.6931472, %v2931_v55  ;;  %v457_v7 = vmul.f32 %v3583_v48, %v456_v46 }
  0xef   :  { %v3616_v0 = vpop.eup %2934  ;;  %v388_v43 = vsel %vm3620_vm2, %v385_v50, %v382_v2  ;;  %v461_v2 = vadd.f32 1.0, %v3612_v18  ;;  %vm654_vm2 = vcmask 261120  }
  0xf0   :  { %v3630_v26 = vpop.eup %2936  ;;  %v406_v38 = vsel %vm3625_vm3, %v403_v63, %v400_v59  ;;  %v3655_v41 = vadd.f32 %v388_v43, %v300_v33  ;;  %v5379_v33 = vmax.f32 %v3503_v9, 0.0  ;;  %v479_v61 = vadd.f32 1.0, %v3616_v0  ;;  %v3679_v43 = vpop.permute.xlu1 %548 }
  0xf1   :  { %v2939_v36 = vpop.eup %2938  ;;  %v488_v52 = vadd.f32 1.0, %v3630_v26  ;;  %v3663_v4 = vadd.f32 %v406_v38, %v5378_v25 }
  0xf2   :  { %v2941_v50 = vpop.eup %2940  ;;  %v418_v44 = vmul.f32 0.6931472, %v2939_v36  ;;  %v476_v36 = vand.u32 2147483647, %v3592_v14  ;;  %v561_v55 = vmul.f32 %v3670_v60, %v3655_v41 }
  0xf3   :  { %v3651_v40 = vpop.eup %2942  ;;  %v436_v16 = vmul.f32 0.6931472, %v2941_v50  ;;  %2958 = vlog2.f32 %v488_v52  ;;  %v464_v50 = vmul.f32 -0.5, %v3612_v18 }
  0xf4   :  { %v424_v29 = vsel %vm3636_vm4, %v421_v58, %v418_v44  ;;  %v506_v62 = vadd.f32 1.0, %v3651_v40  ;;  %v3668_v12 = vpop.eup %2944  ;;  %2960 = vlog2.f32 %v461_v2  ;;  %v5380_v58 = vmax.f32 %v3506_v10, 0.0 }
  0xf5   :  { %v3674_v63 = vadd.f32 %v424_v29, %v5379_v33  ;;  %v442_v52 = vsel %vm3640_vm5, %v439_v28, %v436_v16  ;;  %v2947_v17 = vpop.eup %2946  ;;  %v563_v10 = vmul.f32 %v3670_v60, %v3663_v4  ;;  %v475_v28 = vmul.f32 %v3592_v14, %v474_v3  ;;  %v3711_v14 = vpop.permute.xlu0 %553 }
  0xf6   :  { %v3683_v23 = vadd.f32 %v442_v52, %v5380_v58  ;;  %2962 = vlog2.f32 %v506_v62  ;;  %v3687_v9 = vpop.eup %2948  ;;  %v454_v2 = vmul.f32 0.6931472, %v2947_v17  ;;  %v491_v62 = vmul.f32 -0.5, %v3630_v26 }
  0xf7   :  { %v565_v38 = vmul.f32 %v3679_v43, %v3674_v63  ;;  %v3694_v44 = vpop.eup %2950  ;;  %v497_v46 = vadd.f32 1.0, %v3687_v9  ;;  %2964 = vlog2.f32 %v479_v61  ;;  %v5381_v17 = vmax.f32 %v3515_v21, 0.0 }
  0xf8   :  { %v567_v48 = vmul.f32 %v3679_v43, %v3683_v23  ;;  %v2953_v16 = vpop.eup %2952  ;;  %v460_v29 = vsel %vm3657_vm6, %v457_v7, %v454_v2  ;;  %vm477_vm7 = vcmp.lt.f32.partialorder %v476_v36, 0.0004427343  ;;  %v314_v3 = vmax.f32 %v3543_v54, 0.0 }
  0xf9   :  { %v577_v25 = vadd.f32 %v565_v38, %v561_v55  ;;  %v3705_v33 = vpop.eup %2954  ;;  %v3709_v58 = vadd.f32 %v460_v29, %v5381_v17  ;;  %v472_v49 = vmul.f32 0.6931472, %v2953_v16  ;;  %2966 = vlog2.f32 %v497_v46 }
  0xfa   :  { %v595_v52 = vadd.f32 %v567_v48, %v563_v10  ;;  %v515_v59 = vadd.f32 1.0, %v3705_v33  ;;  %v465_v7 = vadd.f32 1.0, %v464_v50  ;;  %v509_v38 = vmul.f32 -0.5, %v3651_v40 }
  0xfb   :  { %v569_v61 = vmul.f32 %v3711_v14, %v3709_v58  ;;  %v478_v55 = vsel %vm477_vm7, %v475_v28, %v472_v49  ;;  %v482_v21 = vmul.f32 -0.5, %v3616_v0  ;;  %v5382_v2 = vmax.f32 %v3524_v34, 0.0  ;;  %v2957_v49 = vpop.eup %2956  ;;  %v3727_v28 = vpop.permute.xlu1 %1087 }
  0xfc   :  { %v492_v48 = vadd.f32 1.0, %v491_v62  ;;  %2968 = vlog2.f32 %v515_v59  ;;  %v467_v36 = vand.u32 2147483647, %v3612_v18  ;;  %v494_v46 = vand.u32 2147483647, %v3630_v26 }
  0xfd   :  { %v3721_v10 = vadd.f32 %v478_v55, %v5382_v2  ;;  %v578_v54 = vadd.f32 %v577_v25, %v569_v61  ;;  %v313_v50 = vmax.f32 %v3559_v53, 0.0  ;;  %v500_v34 = vmul.f32 -0.5, %v3687_v9 }
  0xfe   :  { %v428_v62 = vmul.f32 -0.5, %v3605_v30  ;;  %v431_v17 = vand.u32 2147483647, %v3605_v30  ;;  %v510_v25 = vadd.f32 1.0, %v509_v38  ;;  %v466_v61 = vmul.f32 %v3612_v18, %v465_v7 }
  0xff   :  { %v571_v29 = vmul.f32 %v3711_v14, %v3721_v10  ;;  %v483_v55 = vadd.f32 1.0, %v482_v21  ;;  %v443_v53 = vadd.f32 1.0, %v3694_v44  ;;  %v493_v22 = vmul.f32 %v3630_v26, %v492_v48 }
 0x100   :  { %v2959_v59 = vpop.eup %2958  ;;  %v512_v15 = vand.u32 2147483647, %v3651_v40  ;;  %vm3738_vm8 = vcmp.lt.f32.partialorder %v467_v36, 0.0004427343  ;;  %vm495_vm9 = vcmp.lt.f32.partialorder %v494_v46, 0.0004427343  ;;  %v3749_v46 = vpop.permute.xlu1 %558 }
 0x101   :  { %v596_v2 = vadd.f32 %v595_v52, %v571_v29  ;;  %v490_v16 = vmul.f32 0.6931472, %v2959_v59  ;;  %v2961_v13 = vpop.eup %2960  ;;  %v518_v32 = vmul.f32 -0.5, %v3705_v33  ;;  %v485_v38 = vand.u32 2147483647, %v3616_v0 }
 0x102   :  { %2970 = vlog2.f32 %v443_v53  ;;  %v501_v21 = vadd.f32 1.0, %v500_v34  ;;  %v429_v52 = vadd.f32 1.0, %v428_v62  ;;  %v389_v29 = vadd.f32 1.0, %v3598_v19 }
 0x103   :  { %v2963_v18 = vpop.eup %2962  ;;  %v496_v7 = vsel %vm495_vm9, %v493_v22, %v490_v16  ;;  %v5385_v26 = vmax.f32 %v3540_v51, 0.0  ;;  %v511_v59 = vmul.f32 %v3651_v40, %v510_v25  ;;  %v484_v39 = vmul.f32 %v3616_v0, %v483_v55 }
 0x104   :  { %v508_v36 = vmul.f32 0.6931472, %v2963_v18  ;;  %vm513_vm10 = vcmp.lt.f32.partialorder %v512_v15, 0.0004427343  ;;  %v503_v24 = vand.u32 2147483647, %v3687_v9  ;;  %2972 = vlog2.f32 %v389_v29  ;;  %v2965_v22 = vpop.eup %2964 }
 0x105   :  { %v536_v48 = vadd.f32 %v496_v7, %v5385_v26  ;;  %v463_v53 = vmul.f32 0.6931472, %v2961_v13  ;;  %v519_v62 = vadd.f32 1.0, %v518_v32  ;;  %v407_v51 = vadd.f32 1.0, %v3668_v12 }
 0x106   :  { %v514_v34 = vsel %vm513_vm10, %v511_v59, %v508_v36  ;;  %v2967_v7 = vpop.eup %2966  ;;  %v502_v40 = vmul.f32 %v3687_v9, %v501_v21  ;;  %v521_v0 = vand.u32 2147483647, %v3705_v33  ;;  %v427_v25 = vmul.f32 0.6931472, %v2957_v49 }
 0x107   :  { %v573_v16 = vmul.f32 %v3749_v46, %v536_v48  ;;  %v538_v18 = vadd.f32 %v514_v34, %v314_v3  ;;  %v499_v15 = vmul.f32 0.6931472, %v2967_v7  ;;  %v446_v13 = vmul.f32 -0.5, %v3694_v44 }
 0x108   :  { %2974 = vlog2.f32 %v407_v51  ;;  %vm504_vm11 = vcmp.lt.f32.partialorder %v503_v24, 0.0004427343  ;;  %v481_v26 = vmul.f32 0.6931472, %v2965_v22  ;;  %v430_v32 = vmul.f32 %v3605_v30, %v429_v52  ;;  %v627_v30 = vld [vmem:[%s5332_s3 + $0x8] sm:$0xff] }
 0x109   :  { %v3756_v55 = vadd.f32 %v578_v54, %v573_v16  ;;  %v575_v29 = vmul.f32 %v3749_v46, %v538_v18  ;;  %v2969_v36 = vpop.eup %2968  ;;  %v505_v59 = vsel %vm504_vm11, %v502_v40, %v499_v15  ;;  %v520_v3 = vmul.f32 %v3705_v33, %v519_v62 }
 0x10a   :  { %v469_v9 = vsel %vm3738_vm8, %v466_v61, %v463_v53  ;;  %vm3764_vm12 = vcmp.lt.f32.partialorder %v431_v17, 0.0004427343  ;;  %v537_v21 = vadd.f32 %v505_v59, %v313_v50  ;;  %v517_v16 = vmul.f32 0.6931472, %v2969_v36 }
 0x10b   :  { %v3768_v49 = vadd.f32 %v596_v2, %v575_v29  ;;  %v392_v24 = vmul.f32 -0.5, %v3598_v19  ;;  %vm522_vm13 = vcmp.lt.f32.partialorder %v521_v0, 0.0004427343  ;;  %vm3771_vm14 = vcmp.lt.f32.partialorder %v485_v38, 0.0004427343 }
 0x10c   :  { %v433_v33 = vsel %vm3764_vm12, %v430_v32, %v427_v25  ;;  %v447_v8 = vadd.f32 1.0, %v446_v13  ;;  %691 = vmatprep.subr.mxu0 %v537_v21  ;;  %v523_v17 = vsel %vm522_vm13, %v520_v3, %v517_v16  ;;  %v5390_v61 = vmax.f32 %v3526_v35, 0.0 }
 0x10d   :  { %v487_v50 = vsel %vm3771_vm14, %v484_v39, %v481_v26  ;;  %v449_v2 = vand.u32 2147483647, %v3694_v44  ;;  %v311_v53 = vmax.f32 %v3528_v37, 0.0  ;;  %v5391_v38 = vmax.f32 %v3572_v31, 0.0  ;;  %692 = vmatpush1.msra.mxu0 %v536_v48 }
 0x10e   :  { %v533_v52 = vadd.f32 %v469_v9, %v5390_v61  ;;  %v410_v34 = vmul.f32 -0.5, %v3668_v12  ;;  %v5392_v51 = vmax.f32 %v3513_v20, 0.0  ;;  %v393_v35 = vadd.f32 1.0, %v392_v24 }
 0x10f   :  { %v539_v22 = vadd.f32 %v523_v17, %v5391_v38  ;;  %v2971_v62 = vpop.eup %2970  ;;  %v535_v40 = vadd.f32 %v487_v50, %v311_v53  ;;  %v448_v0 = vmul.f32 %v3694_v44, %v447_v8  ;;  %v395_v37 = vand.u32 2147483647, %v3598_v19 }
 0x110   :  { %693 = vmatprep.subr.mxu0 %v533_v52  ;;  %v529_v7 = vadd.f32 %v433_v33, %v5392_v51  ;;  %v445_v39 = vmul.f32 0.6931472, %v2971_v62  ;;  %v307_v31 = vmax.f32 %v3546_v1, 0.0  ;;  %vm450_vm15 = vcmp.lt.f32.partialorder %v449_v2, 0.0004427343 }
 0x111   :  { %780 = vmatprep.subr.mxu1 %v539_v22  ;;  %694 = vmatpush1.msra.mxu0 %v3709_v58  ;;  %v2973_v48 = vpop.eup %2972  ;;  %v411_v20 = vadd.f32 1.0, %v410_v34  ;;  %v394_v13 = vmul.f32 %v3598_v19, %v393_v35  ;;  %v413_v44 = vand.u32 2147483647, %v3668_v12  ;;  %v301_v29 = vmax.f32 %v3508_v11, 0.0  ;;  %v626_v19 = vld [vmem:[%s5332_s3] sm:$0xff] }
 0x112   :  { %781 = vmatpush1.msra.mxu1 %v538_v18  ;;  %695 = vmatprep.subr.mxu0 %v529_v7  ;;  %v451_v25 = vsel %vm450_vm15, %v448_v0, %v445_v39  ;;  %v391_v58 = vmul.f32 0.6931472, %v2973_v48  ;;  %vm396_vm0 = vcmp.lt.f32.partialorder %v395_v37, 0.0004427343  ;;  %v566_v26 = vmul.f32 %v3679_v43, %v529_v7 }
 0x113   :  { %782 = vmatprep.subr.mxu1 %v535_v40  ;;  %696 = vmatpush1.msra.mxu0 %v3674_v63  ;;  %v531_v15 = vadd.f32 %v451_v25, %v307_v31  ;;  %v303_v36 = vmax.f32 %v3536_v47, 0.0  ;;  %vm414_vm1 = vcmp.lt.f32.partialorder %v413_v44, 0.0004427343  ;;  %v570_v11 = vmul.f32 %v3711_v14, %v533_v52 }
 0x114   :  { %783 = vmatpush1.msra.mxu1 %v3721_v10  ;;  %v397_v18 = vsel %vm396_vm0, %v394_v13, %v391_v58  ;;  %v412_v10 = vmul.f32 %v3668_v12, %v411_v20  ;;  %v574_v12 = vmul.f32 %v3749_v46, %v537_v21  ;;  %v572_v54 = vmul.f32 %v3711_v14, %v535_v40  ;;  %v628_v14 = vld [vmem:[%s5332_s3 + $0x10] sm:$0xff] }
 0x115   :  { %v2975_v1 = vpop.eup %2974  ;;  %784 = vmatprep.subr.mxu1 %v531_v15  ;;  %v525_v63 = vadd.f32 %v397_v18, %v301_v29  ;;  %v5393_v24 = vmov 0.0   ;;  %v598_v7 = vrot.slane %v3768_v49, 4 }
 0x116   :  { %785 = vmatpush1.msra.mxu1 %v3683_v23  ;;  %v409_v32 = vmul.f32 0.6931472, %v2975_v1  ;;  %v568_v23 = vmul.f32 %v3679_v43, %v531_v15 }
 0x117   :  { %v562_v59 = vmul.f32 %v3670_v60, %v525_v63  ;;  %697 = vmatprep.subr.mxu0 %v525_v63  ;;  %v599_v44 = vadd.f32 %v598_v7, %v3768_v49  ;;  %v5348_v49 = vlaneseq }
 0x118   :  { %v415_v3 = vsel %vm414_vm1, %v412_v10, %v409_v32  ;;  %698 = vmatpush1.msra.mxu0 %v3655_v41  ;;  %v576_v41 = vmul.f32 %v3749_v46, %v539_v22  ;;  %v3842_v46 = vpop.permute.xlu0 %1092  ;;  %v580_v22 = vrot.slane %v3756_v55, 4 }
 0x119   :  { %v527_v9 = vadd.f32 %v415_v3, %v303_v36  ;;  %v586_v47 = vadd.f32 %v566_v26, %v562_v59  ;;  %2873 = vmatmul.mubr.msk.f32.vlgmr.msra.gmra.mxu0 %vm654_vm2, %v626_v19 }
 0x11a   :  { %737 = vmatprep.mubr.f32.mxu0 %v5393_v24  ;;  %v581_v20 = vadd.f32 %v580_v22, %v3756_v55 }
 0x11b   :  { %v564_v16 = vmul.f32 %v3670_v60, %v527_v9  ;;  %786 = vmatprep.subr.mxu1 %v527_v9  ;;  %v587_v43 = vadd.f32 %v586_v47, %v570_v11 }
 0x11c   :  { %787 = vmatpush1.msra.mxu1 %v3663_v4  ;;  %v629_v4 = vld [vmem:[%s5332_s3 + $0x18] sm:$0xff]  ;;  %v3844_v17 = vpop.permute.xlu0 %1097  ;;  %v582_v59 = vrot.slane %v581_v20, 2 }
 0x11d   :  { %v604_v21 = vadd.f32 %v568_v23, %v564_v16  ;;  %2877 = vmatmul.mubr.msk.f32.vlgmr.msra.gmra.mxu1 %vm654_vm2, %v626_v19  ;;  %v3819_v33 = vadd.f32 %v587_v43, %v574_v12  ;;  %2874 = vmatmul.mubr.msk.f32.gmra.mxu0 %vm654_vm2, %v627_v30  ;;  %v600_v12 = vrot.slane %v599_v44, 2 }
 0x11e   :  { %826 = vmatprep.mubr.f32.mxu1 %v5393_v24  ;;  %743 = vmatprep.mubr.f32.mxu0 %v5393_v24 }
 0x11f   :  { %v605_v60 = vadd.f32 %v604_v21, %v572_v54  ;;  %v601_v22 = vadd.f32 %v600_v12, %v599_v44 }
 0x120   :  { %v3846_v61 = vpop.permute.xlu0 %1626 }
 0x121   :  { %v3827_v8 = vadd.f32 %v605_v60, %v576_v41  ;;  %2878 = vmatmul.mubr.msk.f32.gmra.mxu1 %vm654_vm2, %v627_v30  ;;  %2875 = vmatmul.mubr.msk.f32.gmra.mxu0 %vm654_vm2, %v628_v14  ;;  %5394 = vst [vmem:[#allocation13_spill] sm:$0xff] %v3846_v61 }
 0x122   :  { %832 = vmatprep.mubr.f32.mxu1 %v5393_v24  ;;  %749 = vmatprep.mubr.f32.mxu0 %v5393_v24 }
 0x124   :  { %v3848_v52 = vpop.permute.xlu0 %1631 }
 0x125   :  { %2879 = vmatmul.mubr.msk.f32.gmra.mxu1 %vm654_vm2, %v628_v14  ;;  %2876 = vmatmul.mubr.msk.f32.gmra.mxu0 %vm654_vm2, %v629_v4  ;;  %5395 = vst [vmem:[#allocation14_spill] sm:$0xff] %v3848_v52  ;;  %v583_v14 = vadd.f32 %v582_v59, %v581_v20 }
 0x126   :  { %838 = vmatprep.mubr.f32.mxu1 %v5393_v24  ;;  %1265 = vmatprep.mubr.f32.mxu0 %v5393_v24 }
 0x128   :  { %v3850_v50 = vpop.permute.xlu0 %2160 }
 0x129   :  { %2880 = vmatmul.mubr.msk.f32.gmra.mxu1 %vm654_vm2, %v629_v4  ;;  %5396 = vst [vmem:[#allocation15_spill] sm:$0xff] %v3850_v50 }
 0x12a   :  { %1354 = vmatprep.mubr.f32.mxu1 %v5393_v24 }
 0x12c   :  { %v3857_v51 = vpop.permute.xlu0 %2165 }
 0x12d   :  { %5397 = vst [vmem:[#allocation16_spill] sm:$0xff] %v3857_v51 }
 0x130   :  { %v3876_v32 = vpop.permute.xlu0 %2694 }
 0x131   :  { %5398 = vst [vmem:[#allocation17_spill] sm:$0xff] %v3876_v32 }
 0x1d9   :  { %v733_v2 = vpop.f32.mrf.mxu0 }
 0x1da   :  { %v3853_v53 = vadd.f32 %v733_v2, %v3500_v6 }
 0x1db   :  { %v735_v38 = vpop.f32.mrf.mxu0 }
 0x1dc   :  { %v861_v34 = vand.u32 2147483647, %v3853_v53  ;;  %v3868_v48 = vadd.f32 %v735_v38, %v3500_v6  ;;  %v3898_v38 = vpop.permute.xlu0 %2699 }
 0x1dd   :  { %v822_v62 = vpop.f32.mrf.mxu1  ;;  %v739_v40 = vpop.f32.mrf.mxu0  ;;  %5400 = vst [vmem:[#allocation19_spill] sm:$0xff] %v3898_v38 }
 0x1de   :  { %v3861_v35 = vadd.f32 %v822_v62, %v3500_v6  ;;  %v877_v39 = vsub.f32 0.0, %v861_v34  ;;  %v3864_v37 = vadd.f32 %v739_v40, %v3498_v5  ;;  %v862_v36 = vand.u32 2147483647, %v3868_v48 }
 0x1df   :  { %v824_v0 = vpop.f32.mrf.mxu1  ;;  %v741_v25 = vpop.f32.mrf.mxu0 }
 0x1e0   :  { %v863_v31 = vand.u32 2147483647, %v3861_v35  ;;  %v893_v15 = vmul.f32 1.442695, %v877_v39  ;;  %v865_v58 = vand.u32 2147483647, %v3864_v37  ;;  %v3881_v19 = vadd.f32 %v741_v25, %v3498_v5  ;;  %v616_v59 = vpop.permute.xlu0 %615 }
 0x1e1   :  { %v828_v13 = vpop.f32.mrf.mxu1  ;;  %v745_v18 = vpop.f32.mrf.mxu0  ;;  %v3884_v3 = vadd.f32 %v824_v0, %v3500_v6  ;;  %v878_v30 = vsub.f32 0.0, %v862_v36  ;;  %v3894_v6 = vshrl.u32 %v5348_v49, 7 }
 0x1e2   :  { %v879_v29 = vsub.f32 0.0, %v863_v31  ;;  %v3874_v1 = vadd.f32 %v828_v13, %v3498_v5  ;;  %2976 = vpow2.f32 %v893_v15  ;;  %v881_v26 = vsub.f32 0.0, %v865_v58 }
 0x1e3   :  { %v830_v63 = vpop.f32.mrf.mxu1  ;;  %v747_v11 = vpop.f32.mrf.mxu0  ;;  %v3887_v54 = vadd.f32 %v745_v18, %v3490_v57  ;;  %v866_v41 = vand.u32 2147483647, %v3881_v19  ;;  %5399 = vst [vmem:[#allocation18_spill] sm:$0xff] %v3894_v6  ;;  %v864_v4 = vand.u32 2147483647, %v3884_v3  ;;  %v620_v13 = vsub.s32 0, %v3894_v6 }
 0x1e4   :  { %v897_v10 = vmul.f32 1.442695, %v879_v29  ;;  %v867_v55 = vand.u32 2147483647, %v3874_v1  ;;  %v901_v23 = vmul.f32 1.442695, %v881_v26  ;;  %v3902_v62 = vadd.f32 %v747_v11, %v3490_v57 }
 0x1e5   :  { %v834_v9 = vpop.f32.mrf.mxu1  ;;  %v751_v60 = vpop.f32.mrf.mxu0  ;;  %v869_v2 = vand.u32 2147483647, %v3887_v54  ;;  %v3905_v7 = vadd.f32 %v830_v63, %v3498_v5  ;;  %v895_v31 = vmul.f32 1.442695, %v878_v30  ;;  %v882_v25 = vsub.f32 0.0, %v866_v41 }
 0x1e6   :  { %2978 = vpow2.f32 %v897_v10  ;;  %v883_v47 = vsub.f32 0.0, %v867_v55  ;;  %v3890_v16 = vadd.f32 %v834_v9, %v3490_v57  ;;  %v3911_v0 = vadd.f32 %v751_v60, %v3488_v56 }
 0x1e7   :  { %2980 = vpow2.f32 %v901_v23  ;;  %v836_v21 = vpop.f32.mrf.mxu1  ;;  %v885_v40 = vsub.f32 0.0, %v869_v2  ;;  %v870_v15 = vand.u32 2147483647, %v3902_v62  ;;  %v880_v44 = vsub.f32 0.0, %v864_v4 }
 0x1e8   :  { %v905_v43 = vmul.f32 1.442695, %v883_v47  ;;  %v871_v34 = vand.u32 2147483647, %v3890_v16  ;;  %v3908_v39 = vadd.f32 %v836_v21, %v3490_v57  ;;  %v584_v18 = vrot.slane %v583_v14, 1  ;;  %v753_v47 = vpop.f32.mrf.mxu0 }
 0x1e9   :  { %v840_v58 = vpop.f32.mrf.mxu1  ;;  %v909_v29 = vmul.f32 1.442695, %v885_v40  ;;  %v886_v63 = vsub.f32 0.0, %v870_v15  ;;  %v873_v57 = vand.u32 2147483647, %v3911_v0  ;;  %v602_v10 = vrot.slane %v601_v22, 1 }
 0x1ea   :  { %2982 = vpow2.f32 %v905_v43  ;;  %v887_v20 = vsub.f32 0.0, %v871_v34  ;;  %v872_v5 = vand.u32 2147483647, %v3908_v39  ;;  %v868_v36 = vand.u32 2147483647, %v3905_v7 }
 0x1eb   :  { %2984 = vpow2.f32 %v909_v29  ;;  %v3919_v55 = vadd.f32 %v840_v58, %v3488_v56  ;;  %v903_v23 = vmul.f32 1.442695, %v882_v25  ;;  %v911_v9 = vmul.f32 1.442695, %v886_v63  ;;  %v842_v15 = vpop.f32.mrf.mxu1 }
 0x1ec   :  { %v913_v26 = vmul.f32 1.442695, %v887_v20  ;;  %v888_v12 = vsub.f32 0.0, %v872_v5  ;;  %v899_v43 = vmul.f32 1.442695, %v880_v44  ;;  %v889_v41 = vsub.f32 0.0, %v873_v57 }
 0x1ed   :  { %v875_v21 = vand.u32 2147483647, %v3919_v55  ;;  %v3927_v4 = vrot.slane %v616_v59, %v620_v13  ;;  %v3929_v2 = vadd.f32 %v584_v18, %v583_v14  ;;  %v3932_v34 = vadd.f32 %v753_v47, %v3488_v56 }
 0x1ee   :  { %2986 = vpow2.f32 %v913_v26  ;;  %v915_v20 = vmul.f32 1.442695, %v888_v12  ;;  %v3937_v58 = vadd.f32 %v602_v10, %v601_v22  ;;  %v917_v44 = vmul.f32 1.442695, %v889_v41 }
 0x1ef   :  { %v3921_v11 = vpop.eup %2976  ;;  %2988 = vpow2.f32 %v895_v31  ;;  %v884_v31 = vsub.f32 0.0, %v868_v36  ;;  %v891_v5 = vsub.f32 0.0, %v875_v21  ;;  %v874_v63 = vand.u32 2147483647, %v3932_v34 }
 0x1f0   :  { %v925_v30 = vadd.f32 1.0, %v3921_v11  ;;  %2990 = vpow2.f32 %v911_v9  ;;  %v3947_v22 = vadd.f32 %v842_v15, %v3488_v56  ;;  %v928_v59 = vmul.f32 -0.5, %v3921_v11 }
 0x1f1   :  { %v907_v36 = vmul.f32 1.442695, %v884_v31  ;;  %v890_v9 = vsub.f32 0.0, %v874_v63  ;;  %v5417_v51 = vmax.f32 %v3887_v54, 0.0 }
 0x1f2   :  { %2992 = vlog2.f32 %v925_v30  ;;  %v876_v41 = vand.u32 2147483647, %v3947_v22 }
 0x1f3   :  { %v3925_v60 = vpop.eup %2978  ;;  %2994 = vpow2.f32 %v903_v23  ;;  %v921_v23 = vmul.f32 1.442695, %v891_v5 }
 0x1f4   :  { %v3934_v40 = vpop.eup %2980  ;;  %v943_v25 = vadd.f32 1.0, %v3925_v60  ;;  %2996 = vpow2.f32 %v899_v43  ;;  %v946_v56 = vmul.f32 -0.5, %v3925_v60  ;;  %v919_v43 = vmul.f32 1.442695, %v890_v9 }
 0x1f5   :  { %v961_v13 = vadd.f32 1.0, %v3934_v40  ;;  %v892_v9 = vsub.f32 0.0, %v876_v41  ;;  %v967_v12 = vand.u32 2147483647, %v3934_v40 }
 0x1f6   :  { %2998 = vlog2.f32 %v943_v25  ;;  %v964_v25 = vmul.f32 -0.5, %v3934_v40 }
 0x1f7   :  { %v3942_v18 = vpop.eup %2982  ;;  %3000 = vlog2.f32 %v961_v13  ;;  %v929_v13 = vadd.f32 1.0, %v928_v59  ;;  %v923_v47 = vmul.f32 1.442695, %v892_v9  ;;  %vm3994_vm5 = vcmp.lt.f32.partialorder %v967_v12, 0.0004427343 }
 0x1f8   :  { %v979_v10 = vadd.f32 1.0, %v3942_v18  ;;  %3002 = vpow2.f32 %v915_v20  ;;  %v3957_v21 = vpop.eup %2984  ;;  %v947_v20 = vadd.f32 1.0, %v946_v56  ;;  %v965_v30 = vadd.f32 1.0, %v964_v25 }
 0x1f9   :  { %3004 = vpow2.f32 %v917_v44  ;;  %v982_v44 = vmul.f32 -0.5, %v3942_v18  ;;  %v997_v5 = vadd.f32 1.0, %v3957_v21  ;;  %v930_v26 = vmul.f32 %v3921_v11, %v929_v13 }
 0x1fa   :  { %3006 = vlog2.f32 %v979_v10  ;;  %v931_v10 = vand.u32 2147483647, %v3921_v11  ;;  %v985_v14 = vand.u32 2147483647, %v3942_v18  ;;  %v1000_v59 = vmul.f32 -0.5, %v3957_v21 }
 0x1fb   :  { %3008 = vpow2.f32 %v921_v23  ;;  %v3962_v15 = vpop.eup %2986  ;;  %v949_v23 = vand.u32 2147483647, %v3925_v60  ;;  %v983_v41 = vadd.f32 1.0, %v982_v44 }
 0x1fc   :  { %3010 = vpow2.f32 %v907_v36  ;;  %v3966_v63 = vpop.eup %2988  ;;  %v1015_v36 = vadd.f32 1.0, %v3962_v15  ;;  %vm3982_vm3 = vcmp.lt.f32.partialorder %v931_v10, 0.0004427343  ;;  %vm4005_vm6 = vcmp.lt.f32.partialorder %v985_v14, 0.0004427343 }
 0x1fd   :  { %3012 = vpow2.f32 %v919_v43  ;;  %v3971_v49 = vpop.eup %2990  ;;  %vm3986_vm4 = vcmp.lt.f32.partialorder %v949_v23, 0.0004427343  ;;  %v966_v43 = vmul.f32 %v3934_v40, %v965_v30 }
 0x1fe   :  { %3014 = vlog2.f32 %v997_v5  ;;  %v1006_v44 = vadd.f32 1.0, %v3971_v49 }
 0x1ff   :  { %v2993_v31 = vpop.eup %2992  ;;  %3016 = vlog2.f32 %v1015_v36 }
 0x200   :  { %v3976_v57 = vpop.eup %2994  ;;  %v927_v29 = vmul.f32 0.6931472, %v2993_v31  ;;  %3018 = vpow2.f32 %v923_v47  ;;  %v948_v31 = vmul.f32 %v3925_v60, %v947_v20  ;;  %v5409_v20 = vmax.f32 %v3853_v53, 0.0 }
 0x201   :  { %v3980_v56 = vpop.eup %2996  ;;  %v970_v47 = vadd.f32 1.0, %v3976_v57  ;;  %3020 = vlog2.f32 %v1006_v44  ;;  %v5410_v53 = vmax.f32 %v3864_v37, 0.0  ;;  %v1009_v60 = vmul.f32 -0.5, %v3971_v49 }
 0x202   :  { %v933_v11 = vsel %vm3982_vm3, %v930_v26, %v927_v29  ;;  %v984_v29 = vmul.f32 %v3942_v18, %v983_v41  ;;  %v973_v26 = vmul.f32 -0.5, %v3976_v57  ;;  %v1021_v41 = vand.u32 2147483647, %v3962_v15 }
 0x203   :  { %v2999_v9 = vpop.eup %2998  ;;  %v4014_v40 = vadd.f32 %v933_v11, %v5409_v20  ;;  %3022 = vlog2.f32 %v970_v47  ;;  %v5411_v20 = vmax.f32 %v3861_v35, 0.0  ;;  %v5412_v35 = vmax.f32 %v3874_v1, 0.0 }
 0x204   :  { %v3001_v10 = vpop.eup %3000  ;;  %v945_v23 = vmul.f32 0.6931472, %v2999_v9  ;;  %v1003_v9 = vand.u32 2147483647, %v3957_v21  ;;  %vm4054_vm8 = vcmp.lt.f32.partialorder %v1021_v41, 0.0004427343 }
 0x205   :  { %v4002_v36 = vpop.eup %3002  ;;  %v963_v5 = vmul.f32 0.6931472, %v3001_v10  ;;  %v1018_v10 = vmul.f32 -0.5, %v3962_v15  ;;  %v1105_v37 = vmul.f32 %v3727_v28, %v4014_v40 }
 0x206   :  { %v4010_v12 = vpop.eup %3004  ;;  %v951_v30 = vsel %vm3986_vm4, %v948_v31, %v945_v23  ;;  %v1001_v31 = vadd.f32 1.0, %v1000_v59  ;;  %v1024_v44 = vadd.f32 1.0, %v4002_v36  ;;  %vm4050_vm7 = vcmp.lt.f32.partialorder %v1003_v9, 0.0004427343 }
 0x207   :  { %v3007_v18 = vpop.eup %3006  ;;  %v969_v14 = vsel %vm3994_vm5, %v966_v43, %v963_v5  ;;  %v1033_v6 = vadd.f32 1.0, %v4010_v12  ;;  %v4034_v13 = vadd.f32 %v951_v30, %v5411_v20 }
 0x208   :  { %v4024_v38 = vpop.eup %3008  ;;  %v4028_v11 = vadd.f32 %v969_v14, %v5410_v53  ;;  %v981_v25 = vmul.f32 0.6931472, %v3007_v18  ;;  %v1019_v18 = vadd.f32 1.0, %v1018_v10  ;;  %v1002_v32 = vmul.f32 %v3957_v21, %v1001_v31 }
 0x209   :  { %v4030_v23 = vpop.eup %3010  ;;  %3024 = vlog2.f32 %v1033_v6  ;;  %v1051_v43 = vadd.f32 1.0, %v4024_v38  ;;  %v1107_v9 = vmul.f32 %v3727_v28, %v4034_v13  ;;  %v974_v6 = vadd.f32 1.0, %v973_v26 }
 0x20a   :  { %v4038_v5 = vpop.eup %3012  ;;  %v1109_v59 = vmul.f32 %v3842_v46, %v4028_v11  ;;  %v987_v47 = vsel %vm4005_vm6, %v984_v29, %v981_v25  ;;  %v1039_v26 = vand.u32 2147483647, %v4010_v12 }
 0x20b   :  { %v4048_v30 = vadd.f32 %v987_v47, %v5412_v35  ;;  %3026 = vlog2.f32 %v1051_v43  ;;  %v3015_v53 = vpop.eup %3014  ;;  %v1042_v29 = vadd.f32 1.0, %v4038_v5  ;;  %v1020_v43 = vmul.f32 %v3962_v15, %v1019_v18 }
 0x20c   :  { %v1121_v20 = vadd.f32 %v1109_v59, %v1105_v37  ;;  %v3017_v1 = vpop.eup %3016  ;;  %v999_v41 = vmul.f32 0.6931472, %v3015_v53  ;;  %3028 = vlog2.f32 %v1024_v44  ;;  %v1027_v37 = vmul.f32 -0.5, %v4002_v36 }
 0x20d   :  { %v1111_v10 = vmul.f32 %v3842_v46, %v4048_v30  ;;  %v1017_v25 = vmul.f32 0.6931472, %v3017_v1  ;;  %3030 = vlog2.f32 %v1042_v29  ;;  %v4067_v21 = vpop.eup %3018  ;;  %v1036_v47 = vmul.f32 -0.5, %v4010_v12 }
 0x20e   :  { %v1005_v59 = vsel %vm4050_vm7, %v1002_v32, %v999_v41  ;;  %v1012_v35 = vand.u32 2147483647, %v3971_v49  ;;  %v1054_v44 = vmul.f32 -0.5, %v4024_v38  ;;  %v1060_v18 = vadd.f32 1.0, %v4067_v21 }
 0x20f   :  { %v1139_v31 = vadd.f32 %v1111_v10, %v1107_v9  ;;  %v4075_v53 = vadd.f32 %v1005_v59, %v5417_v51  ;;  %v1023_v15 = vsel %vm4054_vm8, %v1020_v43, %v1017_v25  ;;  %v5418_v29 = vmax.f32 %v3890_v16, 0.0  ;;  %v3021_v43 = vpop.eup %3020 }
 0x210   :  { %v1010_v32 = vadd.f32 1.0, %v1009_v60  ;;  %v988_v9 = vadd.f32 1.0, %v4030_v23  ;;  %v1045_v51 = vmul.f32 -0.5, %v4038_v5  ;;  %3032 = vlog2.f32 %v1060_v18  ;;  %v4099_v18 = vpop.permute.xlu1 %1621 }
 0x211   :  { %v4083_v1 = vadd.f32 %v1023_v15, %v5418_v29  ;;  %v1113_v54 = vmul.f32 %v3844_v17, %v4075_v53  ;;  %v1028_v14 = vadd.f32 1.0, %v1027_v37  ;;  %v1037_v41 = vadd.f32 1.0, %v1036_v47  ;;  %v3023_v37 = vpop.eup %3022  ;;  %5421 = vst [vmem:[#allocation20_spill] sm:$0xff] %v4099_v18 }
 0x212   :  { %v976_v16 = vand.u32 2147483647, %v3976_v57  ;;  %v1055_v59 = vadd.f32 1.0, %v1054_v44  ;;  %v1057_v15 = vand.u32 2147483647, %v4024_v38  ;;  %v1011_v47 = vmul.f32 %v3971_v49, %v1010_v32 }
 0x213   :  { %v1115_v10 = vmul.f32 %v3844_v17, %v4083_v1  ;;  %v1122_v60 = vadd.f32 %v1121_v20, %v1113_v54  ;;  %vm4095_vm9 = vcmp.lt.f32.partialorder %v1012_v35, 0.0004427343  ;;  %v1030_v25 = vand.u32 2147483647, %v4002_v36 }
 0x214   :  { %3034 = vlog2.f32 %v988_v9  ;;  %v1046_v20 = vadd.f32 1.0, %v1045_v51  ;;  %v1048_v54 = vand.u32 2147483647, %v4038_v5  ;;  %v4105_v44 = vmul.f32 %v4002_v36, %v1028_v14 }
 0x215   :  { %v1140_v50 = vadd.f32 %v1139_v31, %v1115_v10  ;;  %v975_v35 = vmul.f32 %v3976_v57, %v974_v6  ;;  %v1038_v27 = vmul.f32 %v4010_v12, %v1037_v41  ;;  %v1063_v18 = vmul.f32 -0.5, %v4067_v21 }
 0x216   :  { %v3025_v52 = vpop.eup %3024  ;;  %v934_v31 = vadd.f32 1.0, %v3966_v63  ;;  %vm1040_vm10 = vcmp.lt.f32.partialorder %v1039_v26, 0.0004427343  ;;  %v1056_v32 = vmul.f32 %v4024_v38, %v1055_v59  ;;  %vm4112_vm11 = vcmp.lt.f32.partialorder %v1057_v15, 0.0004427343  ;;  %v4124_v59 = vpop.permute.xlu1 %1102 }
 0x217   :  { %v1035_v61 = vmul.f32 0.6931472, %v3025_v52  ;;  %v1008_v51 = vmul.f32 0.6931472, %v3021_v43  ;;  %v972_v10 = vmul.f32 0.6931472, %v3023_v37  ;;  %v1047_v6 = vmul.f32 %v4038_v5, %v1046_v20 }
 0x218   :  { %v3027_v49 = vpop.eup %3026  ;;  %3036 = vlog2.f32 %v934_v31  ;;  %v5424_v57 = vmax.f32 %v3911_v0, 0.0  ;;  %vm4119_vm12 = vcmp.lt.f32.partialorder %v1048_v54, 0.0004427343  ;;  %v991_v38 = vmul.f32 -0.5, %v4030_v23 }
 0x219   :  { %v1041_v36 = vsel %vm1040_vm10, %v1038_v27, %v1035_v61  ;;  %v1053_v14 = vmul.f32 0.6931472, %v3027_v49  ;;  %v3029_v52 = vpop.eup %3028  ;;  %v1064_v61 = vadd.f32 1.0, %v1063_v18  ;;  %v1066_v43 = vand.u32 2147483647, %v4067_v21 }
 0x21a   :  { %v1081_v12 = vadd.f32 %v1041_v36, %v5424_v57  ;;  %v3031_v26 = vpop.eup %3030  ;;  %v952_v0 = vadd.f32 1.0, %v3980_v56  ;;  %v5427_v5 = vmax.f32 %v3919_v55, 0.0  ;;  %vm4133_vm13 = vcmp.lt.f32.partialorder %v976_v16, 0.0004427343 }
 0x21b   :  { %v1059_v27 = vsel %vm4112_vm11, %v1056_v32, %v1053_v14  ;;  %v1044_v20 = vmul.f32 0.6931472, %v3031_v26  ;;  %v1014_v31 = vsel %vm4095_vm9, %v1011_v47, %v1008_v51  ;;  %v1026_v49 = vmul.f32 0.6931472, %v3029_v52 }
 0x21c   :  { %v1117_v15 = vmul.f32 %v4124_v59, %v1081_v12  ;;  %v1083_v37 = vadd.f32 %v1059_v27, %v5427_v5  ;;  %v978_v18 = vsel %vm4133_vm13, %v975_v35, %v972_v10  ;;  %3038 = vlog2.f32 %v952_v0 }
 0x21d   :  { %v1050_v55 = vsel %vm4119_vm12, %v1047_v6, %v1044_v20  ;;  %v992_v36 = vadd.f32 1.0, %v991_v38  ;;  %v3033_v14 = vpop.eup %3032  ;;  %v5430_v16 = vmax.f32 %v3932_v34, 0.0  ;;  %v1065_v29 = vmul.f32 %v4067_v21, %v1064_v61 }
 0x21e   :  { %v1123_v32 = vadd.f32 %v1122_v60, %v1117_v15  ;;  %v1119_v9 = vmul.f32 %v4124_v59, %v1083_v37  ;;  %vm4149_vm14 = vcmp.lt.f32.partialorder %v1030_v25, 0.0004427343  ;;  %v937_v35 = vmul.f32 -0.5, %v3966_v63 }
 0x21f   :  { %v4146_v57 = vadd.f32 %v1050_v55, %v5430_v16  ;;  %v1062_v10 = vmul.f32 0.6931472, %v3033_v14  ;;  %v994_v52 = vand.u32 2147483647, %v4030_v23  ;;  %vm1067_vm15 = vcmp.lt.f32.partialorder %v1066_v43, 0.0004427343 }
 0x220   :  { %v1124_v60 = vrot.slane %v1123_v32, 4  ;;  %v1141_v51 = vadd.f32 %v1140_v50, %v1119_v9  ;;  %v5433_v34 = vmax.f32 %v3902_v62, 0.0  ;;  %v1032_v21 = vsel %vm4149_vm14, %v4105_v44, %v1026_v49 }
 0x221   :  { %1225 = vmatprep.subr.mxu0 %v4146_v57  ;;  %v5434_v25 = vmax.f32 %v3881_v19, 0.0  ;;  %v3035_v38 = vpop.eup %3034  ;;  %v1068_v50 = vsel %vm1067_vm15, %v1065_v29, %v1062_v10  ;;  %v993_v61 = vmul.f32 %v4030_v23, %v992_v36  ;;  %v5435_v0 = vmax.f32 %v3947_v22, 0.0 }
 0x222   :  { %v1078_v6 = vadd.f32 %v1014_v31, %v5433_v34  ;;  %v1125_v26 = vadd.f32 %v1124_v60, %v1123_v32  ;;  %v1142_v27 = vrot.slane %v1141_v51, 4  ;;  %1226 = vmatpush1.msra.mxu0 %v1081_v12  ;;  %v990_v62 = vmul.f32 0.6931472, %v3035_v38 }
 0x223   :  { %v1074_v41 = vadd.f32 %v978_v18, %v5434_v25  ;;  %v4166_v43 = vadd.f32 %v1068_v50, %v5435_v0  ;;  %v938_v15 = vadd.f32 1.0, %v937_v35  ;;  %v955_v5 = vmul.f32 -0.5, %v3980_v56 }
 0x224   :  { %1227 = vmatprep.subr.mxu0 %v1078_v6  ;;  %v1126_v44 = vrot.slane %v1125_v26, 2  ;;  %v1143_v20 = vadd.f32 %v1142_v27, %v1141_v51  ;;  %vm4170_vm0 = vcmp.lt.f32.partialorder %v994_v52, 0.0004427343  ;;  %v940_v12 = vand.u32 2147483647, %v3966_v63 }
 0x225   :  { %1228 = vmatpush1.msra.mxu0 %v4075_v53  ;;  %v589_v23 = vrot.slane %v3819_v33, 4  ;;  %v852_v22 = vmax.f32 %v3905_v7, 0.0  ;;  %1314 = vmatprep.subr.mxu1 %v4166_v43  ;;  %v5438_v54 = vmax.f32 %v3908_v39, 0.0  ;;  %v996_v49 = vsel %vm4170_vm0, %v993_v61, %v990_v62  ;;  %v3037_v53 = vpop.eup %3036 }
 0x226   :  { %1229 = vmatprep.subr.mxu0 %v1074_v41  ;;  %v622_v18 = vadd.f32 %v3927_v4, %v3929_v2  ;;  %v846_v32 = vmax.f32 %v3868_v48, 0.0  ;;  %v1127_v9 = vadd.f32 %v1126_v44, %v1125_v26  ;;  %v1144_v55 = vrot.slane %v1143_v20, 2  ;;  %1315 = vmatpush1.msra.mxu1 %v1083_v37 }
 0x227   :  { %v1080_v31 = vadd.f32 %v1032_v21, %v5438_v54  ;;  %1230 = vmatpush1.msra.mxu0 %v4028_v11  ;;  %v1076_v7 = vadd.f32 %v996_v49, %v852_v22  ;;  %v936_v36 = vmul.f32 0.6931472, %v3037_v53  ;;  %v939_v39 = vmul.f32 %v3966_v63, %v938_v15 }
 0x228   :  { %v956_v14 = vadd.f32 1.0, %v955_v5  ;;  %v1128_v16 = vrot.slane %v1127_v9, 1  ;;  %v1145_v29 = vadd.f32 %v1144_v55, %v1143_v20  ;;  %vm941_vm1 = vcmp.lt.f32.partialorder %v940_v12, 0.0004427343 }
 0x229   :  { %1316 = vmatprep.subr.mxu1 %v1080_v31  ;;  %v958_v2 = vand.u32 2147483647, %v3980_v56  ;;  %v624_v48 = vadd.f32 %v3927_v4, %v3937_v58  ;;  %v590_v37 = vadd.f32 %v589_v23, %v3819_v33  ;;  %v607_v11 = vrot.slane %v3827_v8, 4  ;;  %v3039_v35 = vpop.eup %3038  ;;  %v1161_v33 = vld [vmem:[%s5333_s5] sm:$0xff] }
 0x22a   :  { %1317 = vmatpush1.msra.mxu1 %v4083_v1  ;;  %v942_v47 = vsel %vm941_vm1, %v939_v39, %v936_v36  ;;  %v1129_v60 = vadd.f32 %v1128_v16, %v1127_v9  ;;  %v1146_v63 = vrot.slane %v1145_v29, 1  ;;  %v1110_v51 = vmul.f32 %v3842_v46, %v1074_v41 }
 0x22b   :  { %1318 = vmatprep.subr.mxu1 %v1076_v7  ;;  %v1070_v1 = vadd.f32 %v942_v47, %v846_v32  ;;  %v848_v10 = vmax.f32 %v3884_v3, 0.0  ;;  %v1114_v52 = vmul.f32 %v3844_v17, %v1078_v6  ;;  %v954_v34 = vmul.f32 0.6931472, %v3039_v35 }
 0x22c   :  { %1319 = vmatpush1.msra.mxu1 %v4048_v30  ;;  %v957_v58 = vmul.f32 %v3980_v56, %v956_v14  ;;  %v4201_v21 = vadd.f32 %v1129_v60, %v622_v18  ;;  %v1147_v25 = vadd.f32 %v1146_v63, %v1145_v29  ;;  %vm959_vm3 = vcmp.lt.f32.partialorder %v958_v2, 0.0004427343 }
 0x22d   :  { %v1106_v38 = vmul.f32 %v3727_v28, %v1070_v1  ;;  %1231 = vmatprep.subr.mxu0 %v1070_v1  ;;  %v591_v30 = vrot.slane %v590_v37, 2  ;;  %v608_v41 = vadd.f32 %v607_v11, %v3827_v8  ;;  %v1118_v3 = vmul.f32 %v4124_v59, %v4146_v57  ;;  %v1162_v8 = vld [vmem:[%s5333_s5 + $0x8] sm:$0xff] }
 0x22e   :  { %v960_v6 = vsel %vm959_vm3, %v957_v58, %v954_v34  ;;  %1232 = vmatpush1.msra.mxu0 %v4014_v40  ;;  %v4208_v56 = vadd.f32 %v1147_v25, %v624_v48  ;;  %v1112_v26 = vmul.f32 %v3842_v46, %v1076_v7  ;;  %v1116_v61 = vmul.f32 %v3844_v17, %v1080_v31 }
 0x22f   :  { %v1130_v27 = vadd.f32 %v1110_v51, %v1106_v38  ;;  %v1072_v50 = vadd.f32 %v960_v6, %v848_v10  ;;  %2881 = vmatmul.mubr.msk.f32.vlgmr.msra.gmra.mxu0 %vm654_vm2, %v1161_v33  ;;  %v592_v40 = vadd.f32 %v591_v30, %v590_v37  ;;  %v609_v46 = vrot.slane %v608_v41, 2 }
 0x230   :  { %1271 = vmatprep.mubr.f32.mxu0 %v5393_v24  ;;  %v1120_v62 = vmul.f32 %v4124_v59, %v4166_v43  ;;  %v1164_v43 = vld [vmem:[%s5333_s5 + $0x18] sm:$0xff] }
 0x231   :  { %v1131_v57 = vadd.f32 %v1130_v27, %v1114_v52  ;;  %v1108_v0 = vmul.f32 %v3727_v28, %v1072_v50  ;;  %1320 = vmatprep.subr.mxu1 %v1072_v50  ;;  %v1163_v28 = vld [vmem:[%s5333_s5 + $0x10] sm:$0xff]  ;;  %v593_v44 = vrot.slane %v592_v40, 1  ;;  %v610_v20 = vadd.f32 %v609_v46, %v608_v41 }
 0x232   :  { %1321 = vmatpush1.msra.mxu1 %v4034_v13 }
 0x233   :  { %v1132_v15 = vadd.f32 %v1131_v57, %v1118_v3  ;;  %v1148_v5 = vadd.f32 %v1112_v26, %v1108_v0  ;;  %2885 = vmatmul.mubr.msk.f32.vlgmr.msra.gmra.mxu1 %vm654_vm2, %v1161_v33  ;;  %2882 = vmatmul.mubr.msk.f32.gmra.mxu0 %vm654_vm2, %v1162_v8  ;;  %v594_v22 = vadd.f32 %v593_v44, %v592_v40  ;;  %v611_v54 = vrot.slane %v610_v20, 1 }
 0x234   :  { %1360 = vmatprep.mubr.f32.mxu1 %v5393_v24  ;;  %1277 = vmatprep.mubr.f32.mxu0 %v5393_v24 }
 0x235   :  { %v1133_v17 = vrot.slane %v1132_v15, 4  ;;  %v1149_v13 = vadd.f32 %v1148_v5, %v1116_v61  ;;  %v623_v32 = vadd.f32 %v3927_v4, %v594_v22  ;;  %v612_v9 = vadd.f32 %v611_v54, %v610_v20 }
 0x237   :  { %v1134_v19 = vadd.f32 %v1133_v17, %v1132_v15  ;;  %v1150_v59 = vadd.f32 %v1149_v13, %v1120_v62  ;;  %2886 = vmatmul.mubr.msk.f32.gmra.mxu1 %vm654_vm2, %v1162_v8  ;;  %2883 = vmatmul.mubr.msk.f32.gmra.mxu0 %vm654_vm2, %v1163_v28  ;;  %v625_v14 = vadd.f32 %v3927_v4, %v612_v9  ;;  %v5439_v62 = vld [vmem:[#allocation4_spill] sm:$0xff] }
 0x238   :  { %1366 = vmatprep.mubr.f32.mxu1 %v5393_v24  ;;  %1283 = vmatprep.mubr.f32.mxu0 %v5393_v24 }
 0x239   :  { %v1135_v12 = vrot.slane %v1134_v19, 2  ;;  %v1151_v23 = vrot.slane %v1150_v59, 4 }
 0x23b   :  { %v1136_v31 = vadd.f32 %v1135_v12, %v1134_v19  ;;  %v1152_v49 = vadd.f32 %v1151_v23, %v1150_v59  ;;  %2887 = vmatmul.mubr.msk.f32.gmra.mxu1 %vm654_vm2, %v1163_v28  ;;  %2884 = vmatmul.mubr.msk.f32.gmra.mxu0 %vm654_vm2, %v1164_v43 }
 0x23c   :  { %1372 = vmatprep.mubr.f32.mxu1 %v5393_v24  ;;  %1799 = vmatprep.mubr.f32.mxu0 %v5393_v24 }
 0x23d   :  { %v1137_v53 = vrot.slane %v1136_v31, 1  ;;  %v1153_v18 = vrot.slane %v1152_v49, 2 }
 0x23f   :  { %v1138_v55 = vadd.f32 %v1137_v53, %v1136_v31  ;;  %v1154_v7 = vadd.f32 %v1153_v18, %v1152_v49  ;;  %2888 = vmatmul.mubr.msk.f32.gmra.mxu1 %vm654_vm2, %v1164_v43  ;;  %v5440_v18 = vld [vmem:[#allocation3_spill] sm:$0xff] }
 0x240   :  { %1888 = vmatprep.mubr.f32.mxu1 %v5393_v24 }
 0x241   :  { %v4242_v36 = vadd.f32 %v1138_v55, %v623_v32  ;;  %v1155_v39 = vrot.slane %v1154_v7, 1 }
 0x243   :  { %v1156_v16 = vadd.f32 %v1155_v39, %v1154_v7 }
 0x245   :  { %v4245_v29 = vadd.f32 %v1156_v16, %v625_v14 }
 0x2ef   :  { %v1267_v2 = vpop.f32.mrf.mxu0 }
 0x2f0   :  { %v4248_v48 = vadd.f32 %v1267_v2, %v3534_v45 }
 0x2f1   :  { %v1269_v37 = vpop.f32.mrf.mxu0 }
 0x2f2   :  { %v1395_v11 = vand.u32 2147483647, %v4248_v48  ;;  %v4252_v35 = vadd.f32 %v1269_v37, %v3534_v45 }
 0x2f3   :  { %v1356_v47 = vpop.f32.mrf.mxu1  ;;  %v1273_v60 = vpop.f32.mrf.mxu0 }
 0x2f4   :  { %v1411_v63 = vsub.f32 0.0, %v1395_v11  ;;  %v4255_v51 = vadd.f32 %v1356_v47, %v3534_v45  ;;  %v4258_v1 = vadd.f32 %v1273_v60, %v3531_v42  ;;  %v1396_v58 = vand.u32 2147483647, %v4252_v35 }
 0x2f5   :  { %v1358_v4 = vpop.f32.mrf.mxu1  ;;  %v1275_v10 = vpop.f32.mrf.mxu0 }
 0x2f6   :  { %v1427_v52 = vmul.f32 1.442695, %v1411_v63  ;;  %v1397_v34 = vand.u32 2147483647, %v4255_v51  ;;  %v4263_v33 = vadd.f32 %v1358_v4, %v3534_v45  ;;  %v1399_v25 = vand.u32 2147483647, %v4258_v1 }
 0x2f7   :  { %v1362_v38 = vpop.f32.mrf.mxu1  ;;  %v1279_v30 = vpop.f32.mrf.mxu0  ;;  %v4270_v26 = vadd.f32 %v1275_v10, %v3531_v42  ;;  %v1412_v57 = vsub.f32 0.0, %v1396_v58 }
 0x2f8   :  { %3040 = vpow2.f32 %v1427_v52  ;;  %v1413_v41 = vsub.f32 0.0, %v1397_v34  ;;  %v4267_v3 = vadd.f32 %v1362_v38, %v3531_v42  ;;  %v1415_v6 = vsub.f32 0.0, %v1399_v25 }
 0x2f9   :  { %v1364_v27 = vpop.f32.mrf.mxu1  ;;  %v1398_v8 = vand.u32 2147483647, %v4263_v33  ;;  %v1281_v61 = vpop.f32.mrf.mxu0  ;;  %v4275_v15 = vadd.f32 %v1279_v30, %v5439_v62  ;;  %v1400_v28 = vand.u32 2147483647, %v4270_v26  ;;  %v1429_v12 = vmul.f32 1.442695, %v1412_v57 }
 0x2fa   :  { %v1431_v50 = vmul.f32 1.442695, %v1413_v41  ;;  %v1401_v45 = vand.u32 2147483647, %v4267_v3  ;;  %v1435_v0 = vmul.f32 1.442695, %v1415_v6  ;;  %v4282_v20 = vadd.f32 %v1364_v27, %v3531_v42 }
 0x2fb   :  { %v1368_v40 = vpop.f32.mrf.mxu1  ;;  %v1414_v13 = vsub.f32 0.0, %v1398_v8  ;;  %v1285_v19 = vpop.f32.mrf.mxu0  ;;  %v1403_v59 = vand.u32 2147483647, %v4275_v15  ;;  %v4287_v23 = vadd.f32 %v1281_v61, %v5439_v62  ;;  %v1416_v31 = vsub.f32 0.0, %v1400_v28 }
 0x2fc   :  { %3042 = vpow2.f32 %v1431_v50  ;;  %v1417_v46 = vsub.f32 0.0, %v1401_v45  ;;  %v4278_v5 = vadd.f32 %v1368_v40, %v5439_v62  ;;  %v4293_v42 = vadd.f32 %v1285_v19, %v5440_v18 }
 0x2fd   :  { %3044 = vpow2.f32 %v1435_v0  ;;  %v1370_v17 = vpop.f32.mrf.mxu1  ;;  %v1419_v49 = vsub.f32 0.0, %v1403_v59  ;;  %v1433_v32 = vmul.f32 1.442695, %v1414_v13  ;;  %v1402_v9 = vand.u32 2147483647, %v4282_v20  ;;  %v1287_v52 = vpop.f32.mrf.mxu0 }
 0x2fe   :  { %v1439_v44 = vmul.f32 1.442695, %v1417_v46  ;;  %v1405_v43 = vand.u32 2147483647, %v4278_v5  ;;  %v4290_v22 = vadd.f32 %v1370_v17, %v5439_v62  ;;  %v1404_v55 = vand.u32 2147483647, %v4287_v23 }
 0x2ff   :  { %v1374_v54 = vpop.f32.mrf.mxu1  ;;  %v1443_v7 = vmul.f32 1.442695, %v1419_v49  ;;  %v1407_v37 = vand.u32 2147483647, %v4293_v42  ;;  %v1437_v47 = vmul.f32 1.442695, %v1416_v31  ;;  %v4309_v41 = vadd.f32 %v1287_v52, %v5440_v18 }
 0x300   :  { %3046 = vpow2.f32 %v1439_v44  ;;  %v1421_v53 = vsub.f32 0.0, %v1405_v43  ;;  %v1406_v14 = vand.u32 2147483647, %v4290_v22  ;;  %v4299_v16 = vadd.f32 %v1374_v54, %v5440_v18 }
 0x301   :  { %3048 = vpow2.f32 %v1429_v12  ;;  %v1420_v2 = vsub.f32 0.0, %v1404_v55  ;;  %v1418_v10 = vsub.f32 0.0, %v1402_v9  ;;  %v1423_v25 = vsub.f32 0.0, %v1407_v37  ;;  %v1376_v6 = vpop.f32.mrf.mxu1 }
 0x302   :  { %v1447_v39 = vmul.f32 1.442695, %v1421_v53  ;;  %3050 = vpow2.f32 %v1443_v7  ;;  %v1422_v60 = vsub.f32 0.0, %v1406_v14  ;;  %v1409_v63 = vand.u32 2147483647, %v4299_v16 }
 0x303   :  { %v1445_v34 = vmul.f32 1.442695, %v1420_v2  ;;  %v1441_v8 = vmul.f32 1.442695, %v1418_v10  ;;  %v1451_v61 = vmul.f32 1.442695, %v1423_v25  ;;  %v4317_v0 = vadd.f32 %v1376_v6, %v5440_v18 }
 0x304   :  { %3052 = vpow2.f32 %v1447_v39  ;;  %v1449_v58 = vmul.f32 1.442695, %v1422_v60  ;;  %v1425_v30 = vsub.f32 0.0, %v1409_v63  ;;  %v1379_v57 = vmax.f32 %v4248_v48, 0.0 }
 0x305   :  { %v4302_v11 = vpop.eup %3040  ;;  %3054 = vpow2.f32 %v1433_v32  ;;  %v1381_v46 = vmax.f32 %v4255_v51, 0.0  ;;  %v1408_v28 = vand.u32 2147483647, %v4309_v41  ;;  %v1383_v13 = vmax.f32 %v4258_v1, 0.0  ;;  %v5451_v1 = vld [vmem:[#allocation20_spill] sm:$0xff] }
 0x306   :  { %v1459_v4 = vadd.f32 1.0, %v4302_v11  ;;  %v1455_v62 = vmul.f32 1.442695, %v1425_v30  ;;  %v1462_v17 = vmul.f32 -0.5, %v4302_v11  ;;  %v1385_v19 = vmax.f32 %v4267_v3, 0.0 }
 0x307   :  { %v1424_v43 = vsub.f32 0.0, %v1408_v28  ;;  %v1410_v31 = vand.u32 2147483647, %v4317_v0  ;;  %v1387_v53 = vmax.f32 %v4275_v15, 0.0  ;;  %v1389_v18 = vmax.f32 %v4278_v5, 0.0 }
 0x308   :  { %3056 = vlog2.f32 %v1459_v4  ;;  %v1463_v55 = vadd.f32 1.0, %v1462_v17  ;;  %v1465_v7 = vand.u32 2147483647, %v4302_v11  ;;  %v1391_v6 = vmax.f32 %v4293_v42, 0.0 }
 0x309   :  { %v4306_v38 = vpop.eup %3042  ;;  %3058 = vpow2.f32 %v1437_v47  ;;  %v1453_v32 = vmul.f32 1.442695, %v1424_v43  ;;  %v1426_v14 = vsub.f32 0.0, %v1410_v31 }
 0x30a   :  { %v4311_v27 = vpop.eup %3044  ;;  %v1477_v50 = vadd.f32 1.0, %v4306_v38  ;;  %3060 = vpow2.f32 %v1445_v34  ;;  %v1480_v12 = vmul.f32 -0.5, %v4306_v38  ;;  %v1483_v37 = vand.u32 2147483647, %v4306_v38 }
 0x30b   :  { %v1495_v45 = vadd.f32 1.0, %v4311_v27  ;;  %3062 = vpow2.f32 %v1449_v58  ;;  %v1498_v39 = vmul.f32 -0.5, %v4311_v27  ;;  %v1501_v10 = vand.u32 2147483647, %v4311_v27 }
 0x30c   :  { %3064 = vlog2.f32 %v1477_v50  ;;  %v1481_v4 = vadd.f32 1.0, %v1480_v12  ;;  %v1457_v34 = vmul.f32 1.442695, %v1426_v14  ;;  %v1464_v28 = vmul.f32 %v4302_v11, %v1463_v55 }
 0x30d   :  { %v4319_v40 = vpop.eup %3046  ;;  %3066 = vlog2.f32 %v1495_v45  ;;  %v1499_v45 = vadd.f32 1.0, %v1498_v39  ;;  %vm4357_vm4 = vcmp.lt.f32.partialorder %v1465_v7, 0.0004427343  ;;  %vm4364_vm5 = vcmp.lt.f32.partialorder %v1483_v37, 0.0004427343 }
 0x30e   :  { %v1513_v44 = vadd.f32 1.0, %v4319_v40  ;;  %3068 = vpow2.f32 %v1441_v8  ;;  %v4331_v49 = vpop.eup %3048  ;;  %v1516_v47 = vmul.f32 -0.5, %v4319_v40  ;;  %v1519_v25 = vand.u32 2147483647, %v4319_v40 }
 0x30f   :  { %3070 = vpow2.f32 %v1451_v61  ;;  %v4335_v9 = vpop.eup %3050  ;;  %v1393_v61 = vmax.f32 %v4299_v16, 0.0  ;;  %v1482_v12 = vmul.f32 %v4306_v38, %v1481_v4  ;;  %vm4368_vm6 = vcmp.lt.f32.partialorder %v1501_v10, 0.0004427343 }
 0x310   :  { %3072 = vlog2.f32 %v1513_v44  ;;  %v1531_v60 = vadd.f32 1.0, %v4335_v9  ;;  %v1517_v44 = vadd.f32 1.0, %v1516_v47  ;;  %vm4375_vm7 = vcmp.lt.f32.partialorder %v1519_v25, 0.0004427343 }
 0x311   :  { %3074 = vpow2.f32 %v1455_v62  ;;  %v4339_v2 = vpop.eup %3052  ;;  %v1534_v38 = vmul.f32 -0.5, %v4335_v9  ;;  %v1537_v4 = vand.u32 2147483647, %v4335_v9 }
 0x312   :  { %3076 = vpow2.f32 %v1453_v32  ;;  %v4344_v63 = vpop.eup %3054  ;;  %v1549_v52 = vadd.f32 1.0, %v4339_v2  ;;  %v1552_v25 = vmul.f32 -0.5, %v4339_v2 }
 0x313   :  { %3078 = vlog2.f32 %v1531_v60  ;;  %v1500_v60 = vmul.f32 %v4311_v27, %v1499_v45  ;;  %v1555_v45 = vand.u32 2147483647, %v4339_v2  ;;  %vm4408_vm8 = vcmp.lt.f32.partialorder %v1537_v4, 0.0004427343 }
 0x314   :  { %3080 = vlog2.f32 %v1549_v52  ;;  %v1553_v32 = vadd.f32 1.0, %v1552_v25 }
 0x315   :  { %v3057_v58 = vpop.eup %3056  ;;  %3082 = vpow2.f32 %v1457_v34  ;;  %vm4429_vm9 = vcmp.lt.f32.partialorder %v1555_v45, 0.0004427343 }
 0x316   :  { %v4351_v50 = vpop.eup %3058  ;;  %v1461_v8 = vmul.f32 0.6931472, %v3057_v58  ;;  %v1518_v58 = vmul.f32 %v4319_v40, %v1517_v44  ;;  %v1535_v44 = vadd.f32 1.0, %v1534_v38  ;;  %v1554_v45 = vmul.f32 %v4339_v2, %v1553_v32 }
 0x317   :  { %v4354_v62 = vpop.eup %3060  ;;  %v1504_v14 = vadd.f32 1.0, %v4351_v50 }
 0x318   :  { %v4361_v43 = vpop.eup %3062  ;;  %v1467_v7 = vsel %vm4357_vm4, %v1464_v28, %v1461_v8  ;;  %v1540_v10 = vadd.f32 1.0, %v4354_v62  ;;  %v1507_v8 = vmul.f32 -0.5, %v4351_v50  ;;  %v1543_v39 = vmul.f32 -0.5, %v4354_v62 }
 0x319   :  { %v3065_v55 = vpop.eup %3064  ;;  %v4393_v17 = vadd.f32 %v1467_v7, %v1379_v57  ;;  %3084 = vlog2.f32 %v1504_v14  ;;  %v5452_v14 = vld [vmem:[#allocation13_spill] sm:$0xff] }
 0x31a   :  { %v3067_v37 = vpop.eup %3066  ;;  %v1479_v47 = vmul.f32 0.6931472, %v3065_v55  ;;  %v1558_v55 = vadd.f32 1.0, %v4361_v43  ;;  %3086 = vlog2.f32 %v1540_v10 }
 0x31b   :  { %v4384_v52 = vpop.eup %3068  ;;  %v1497_v34 = vmul.f32 0.6931472, %v3067_v37 }
 0x31c   :  { %v4389_v28 = vpop.eup %3070  ;;  %v1485_v27 = vsel %vm4364_vm5, %v1482_v12, %v1479_v47 }
 0x31d   :  { %v3073_v37 = vpop.eup %3072  ;;  %v1503_v40 = vsel %vm4368_vm6, %v1500_v60, %v1497_v34  ;;  %v1567_v54 = vadd.f32 1.0, %v4389_v28  ;;  %v4414_v31 = vadd.f32 %v1485_v27, %v1381_v46  ;;  %v1536_v34 = vmul.f32 %v4335_v9, %v1535_v44 }
 0x31e   :  { %v4402_v59 = vpop.eup %3074  ;;  %v4406_v48 = vadd.f32 %v1503_v40, %v1383_v13  ;;  %v1515_v57 = vmul.f32 0.6931472, %v3073_v37  ;;  %v1639_v13 = vmul.f32 %v5451_v1, %v4393_v17  ;;  %v1546_v9 = vand.u32 2147483647, %v4354_v62 }
 0x31f   :  { %3088 = vlog2.f32 %v1567_v54  ;;  %v1585_v7 = vadd.f32 1.0, %v4402_v59  ;;  %v4417_v38 = vpop.eup %3076  ;;  %v1508_v54 = vadd.f32 1.0, %v1507_v8  ;;  %v1641_v3 = vmul.f32 %v5451_v1, %v4414_v31 }
 0x320   :  { %v1643_v47 = vmul.f32 %v5452_v14, %v4406_v48  ;;  %v1521_v60 = vsel %vm4375_vm7, %v1518_v58, %v1515_v57  ;;  %3090 = vlog2.f32 %v1558_v55  ;;  %v3079_v4 = vpop.eup %3078  ;;  %v1576_v25 = vadd.f32 1.0, %v4417_v38 }
 0x321   :  { %v4427_v51 = vadd.f32 %v1521_v60, %v1385_v19  ;;  %3092 = vlog2.f32 %v1585_v7  ;;  %v3081_v58 = vpop.eup %3080  ;;  %v1533_v27 = vmul.f32 0.6931472, %v3079_v4  ;;  %v1561_v37 = vmul.f32 -0.5, %v4361_v43 }
 0x322   :  { %v1655_v10 = vadd.f32 %v1643_v47, %v1639_v13  ;;  %v4441_v55 = vpop.eup %3082  ;;  %v1551_v8 = vmul.f32 0.6931472, %v3081_v58  ;;  %3094 = vlog2.f32 %v1576_v25  ;;  %v1570_v57 = vmul.f32 -0.5, %v4389_v28 }
 0x323   :  { %v1645_v19 = vmul.f32 %v5452_v14, %v4427_v51  ;;  %v1539_v44 = vsel %vm4408_vm8, %v1536_v34, %v1533_v27  ;;  %v1594_v7 = vadd.f32 1.0, %v4441_v55  ;;  %v1588_v32 = vmul.f32 -0.5, %v4402_v59  ;;  %v5455_v34 = vld [vmem:[#allocation14_spill] sm:$0xff] }
 0x324   :  { %v4451_v13 = vadd.f32 %v1539_v44, %v1387_v53  ;;  %v1557_v2 = vsel %vm4429_vm9, %v1554_v45, %v1551_v8  ;;  %v1544_v47 = vadd.f32 1.0, %v1543_v39  ;;  %v1522_v4 = vadd.f32 1.0, %v4384_v52 }
 0x325   :  { %v1673_v40 = vadd.f32 %v1645_v19, %v1641_v3  ;;  %v4458_v60 = vadd.f32 %v1557_v2, %v1389_v18  ;;  %3096 = vlog2.f32 %v1594_v7  ;;  %v1573_v53 = vand.u32 2147483647, %v4389_v28  ;;  %v4478_v7 = vpop.permute.xlu1 %2155 }
 0x326   :  { %v1647_v15 = vmul.f32 %v5455_v34, %v4451_v13  ;;  %v1562_v25 = vadd.f32 1.0, %v1561_v37  ;;  %v1510_v46 = vand.u32 2147483647, %v4351_v50  ;;  %v1571_v58 = vadd.f32 1.0, %v1570_v57  ;;  %v3085_v3 = vpop.eup %3084 }
 0x327   :  { %v1649_v39 = vmul.f32 %v5455_v34, %v4458_v60  ;;  %v1579_v5 = vmul.f32 -0.5, %v4417_v38  ;;  %v4470_v18 = vmul.f32 %v4351_v50, %v1508_v54  ;;  %v1589_v27 = vadd.f32 1.0, %v1588_v32  ;;  %v3087_v44 = vpop.eup %3086 }
 0x328   :  { %v1656_v19 = vadd.f32 %v1655_v10, %v1647_v15  ;;  %v1591_v45 = vand.u32 2147483647, %v4402_v59  ;;  %v1545_v8 = vmul.f32 %v4354_v62, %v1544_v47  ;;  %vm4474_vm10 = vcmp.lt.f32.partialorder %v1546_v9, 0.0004427343 }
 0x329   :  { %v1674_v57 = vadd.f32 %v1673_v40, %v1649_v39  ;;  %v1597_v2 = vmul.f32 -0.5, %v4441_v55  ;;  %v1564_v50 = vand.u32 2147483647, %v4361_v43  ;;  %3098 = vlog2.f32 %v1522_v4 }
 0x32a   :  { %vm4482_vm11 = vcmp.lt.f32.partialorder %v1573_v53, 0.0004427343  ;;  %v1582_v62 = vand.u32 2147483647, %v4417_v38  ;;  %v1563_v9 = vmul.f32 %v4361_v43, %v1562_v25  ;;  %vm4488_vm12 = vcmp.lt.f32.partialorder %v1510_v46, 0.0004427343 }
 0x32b   :  { %v1572_v15 = vmul.f32 %v4389_v28, %v1571_v58  ;;  %v1580_v39 = vadd.f32 1.0, %v1579_v5  ;;  %v1468_v4 = vadd.f32 1.0, %v4331_v49  ;;  %v1590_v53 = vmul.f32 %v4402_v59, %v1589_v27 }
 0x32c   :  { %v3089_v54 = vpop.eup %3088  ;;  %vm4495_vm13 = vcmp.lt.f32.partialorder %v1591_v45, 0.0004427343  ;;  %v1600_v43 = vand.u32 2147483647, %v4441_v55  ;;  %v1542_v25 = vmul.f32 0.6931472, %v3087_v44  ;;  %v4509_v45 = vpop.permute.xlu1 %1636 }
 0x32d   :  { %v3091_v47 = vpop.eup %3090  ;;  %v1569_v40 = vmul.f32 0.6931472, %v3089_v54  ;;  %v1598_v54 = vadd.f32 1.0, %v1597_v2  ;;  %3100 = vlog2.f32 %v1468_v4  ;;  %vm4504_vm14 = vcmp.lt.f32.partialorder %v1582_v62, 0.0004427343 }
 0x32e   :  { %v3093_v12 = vpop.eup %3092  ;;  %v1506_v59 = vmul.f32 0.6931472, %v3085_v3  ;;  %v1486_v5 = vadd.f32 1.0, %v4344_v63  ;;  %v1560_v2 = vmul.f32 0.6931472, %v3091_v47  ;;  %v1525_v10 = vmul.f32 -0.5, %v4384_v52 }
 0x32f   :  { %v1575_v46 = vsel %vm4482_vm11, %v1572_v15, %v1569_v40  ;;  %v1587_v11 = vmul.f32 0.6931472, %v3093_v12  ;;  %v3095_v27 = vpop.eup %3094  ;;  %v1581_v12 = vmul.f32 %v4417_v38, %v1580_v39  ;;  %v1599_v3 = vmul.f32 %v4441_v55, %v1598_v54 }
 0x330   :  { %v1615_v28 = vadd.f32 %v1575_v46, %v1391_v6  ;;  %v1578_v62 = vmul.f32 0.6931472, %v3095_v27  ;;  %3102 = vlog2.f32 %v1486_v5  ;;  %vm4519_vm15 = vcmp.lt.f32.partialorder %v1600_v43, 0.0004427343 }
 0x331   :  { %v1593_v44 = vsel %vm4495_vm13, %v1590_v53, %v1587_v11  ;;  %v1548_v30 = vsel %vm4474_vm10, %v1545_v8, %v1542_v25  ;;  %vm4525_vm0 = vcmp.lt.f32.partialorder %v1564_v50, 0.0004427343  ;;  %v1512_v55 = vsel %vm4488_vm12, %v4470_v18, %v1506_v59 }
 0x332   :  { %v1651_v42 = vmul.f32 %v4509_v45, %v1615_v28  ;;  %v1617_v6 = vadd.f32 %v1593_v44, %v1393_v61  ;;  %v3097_v38 = vpop.eup %3096  ;;  %v1584_v61 = vsel %vm4504_vm14, %v1581_v12, %v1578_v62  ;;  %v5470_v15 = vmax.f32 %v4309_v41, 0.0 }
 0x333   :  { %v1596_v8 = vmul.f32 0.6931472, %v3097_v38  ;;  %v1526_v37 = vadd.f32 1.0, %v1525_v10  ;;  %v1471_v50 = vmul.f32 -0.5, %v4331_v49  ;;  %v1528_v43 = vand.u32 2147483647, %v4384_v52 }
 0x334   :  { %v1657_v47 = vadd.f32 %v1656_v19, %v1651_v42  ;;  %v1653_v16 = vmul.f32 %v4509_v45, %v1617_v6  ;;  %v4537_v39 = vadd.f32 %v1584_v61, %v5470_v15  ;;  %v1566_v19 = vsel %vm4525_vm0, %v1563_v9, %v1560_v2 }
 0x335   :  { %v1390_v25 = vmax.f32 %v4290_v22, 0.0  ;;  %v1602_v41 = vsel %vm4519_vm15, %v1599_v3, %v1596_v8  ;;  %v5471_v18 = vmax.f32 %v4287_v23, 0.0  ;;  %v1489_v46 = vmul.f32 -0.5, %v4344_v63 }
 0x336   :  { %v1658_v4 = vrot.slane %v1657_v47, 4  ;;  %v1675_v53 = vadd.f32 %v1674_v57, %v1653_v16  ;;  %1759 = vmatprep.subr.mxu0 %v4537_v39  ;;  %v3099_v54 = vpop.eup %3098  ;;  %v5472_v59 = vmax.f32 %v4317_v0, 0.0  ;;  %v5473_v22 = vmax.f32 %v4270_v26, 0.0 }
 0x337   :  { %v1612_v32 = vadd.f32 %v1548_v30, %v5471_v18  ;;  %1760 = vmatpush1.msra.mxu0 %v1615_v28  ;;  %v1614_v27 = vadd.f32 %v1566_v19, %v1390_v25  ;;  %v1524_v44 = vmul.f32 0.6931472, %v3099_v54  ;;  %v1527_v12 = vmul.f32 %v4384_v52, %v1526_v37  ;;  %v1695_v37 = vld [vmem:[%s5334_s7] sm:$0xff]  ;;  %v1698_v54 = vld [vmem:[%s5334_s7 + $0x18] sm:$0xff] }
 0x338   :  { %v1659_v58 = vadd.f32 %v1658_v4, %v1657_v47  ;;  %v1676_v57 = vrot.slane %v1675_v53, 4  ;;  %v4552_v9 = vadd.f32 %v1602_v41, %v5472_v59  ;;  %v1608_v5 = vadd.f32 %v1512_v55, %v5473_v22 }
 0x339   :  { %1761 = vmatprep.subr.mxu0 %v1612_v32  ;;  %v1472_v23 = vadd.f32 1.0, %v1471_v50  ;;  %vm1529_vm1 = vcmp.lt.f32.partialorder %v1528_v43, 0.0004427343  ;;  %v1474_v0 = vand.u32 2147483647, %v4331_v49  ;;  %v1490_v26 = vadd.f32 1.0, %v1489_v46 }
 0x33a   :  { %v1660_v2 = vrot.slane %v1659_v58, 2  ;;  %v1677_v10 = vadd.f32 %v1676_v57, %v1675_v53  ;;  %1848 = vmatprep.subr.mxu1 %v4552_v9  ;;  %1762 = vmatpush1.msra.mxu0 %v4451_v13  ;;  %v1530_v28 = vsel %vm1529_vm1, %v1527_v12, %v1524_v44  ;;  %v3101_v42 = vpop.eup %3100  ;;  %v5474_v52 = vmax.f32 %v4282_v20, 0.0 }
 0x33b   :  { %1849 = vmatpush1.msra.mxu1 %v1617_v6  ;;  %1763 = vmatprep.subr.mxu0 %v1608_v5  ;;  %v1470_v30 = vmul.f32 0.6931472, %v3101_v42  ;;  %v1473_v13 = vmul.f32 %v4331_v49, %v1472_v23  ;;  %v1492_v11 = vand.u32 2147483647, %v4344_v63  ;;  %v1380_v6 = vmax.f32 %v4252_v35, 0.0 }
 0x33c   :  { %v1661_v62 = vadd.f32 %v1660_v2, %v1659_v58  ;;  %v1678_v3 = vrot.slane %v1677_v10, 2  ;;  %1850 = vmatprep.subr.mxu1 %v1614_v27  ;;  %v1610_v40 = vadd.f32 %v1530_v28, %v5474_v52  ;;  %1764 = vmatpush1.msra.mxu0 %v4406_v48  ;;  %vm1475_vm3 = vcmp.lt.f32.partialorder %v1474_v0, 0.0004427343  ;;  %v5475_v0 = vld [vmem:[#allocation8_spill] sm:$0xff] }
 0x33d   :  { %1851 = vmatpush1.msra.mxu1 %v4458_v60  ;;  %v3103_v16 = vpop.eup %3102  ;;  %v1644_v61 = vmul.f32 %v5452_v14, %v1608_v5  ;;  %v1476_v20 = vsel %vm1475_vm3, %v1473_v13, %v1470_v30  ;;  %v1491_v48 = vmul.f32 %v4344_v63, %v1490_v26  ;;  %v1382_v8 = vmax.f32 %v4263_v33, 0.0 }
 0x33e   :  { %v1662_v38 = vrot.slane %v1661_v62, 1  ;;  %v1679_v47 = vadd.f32 %v1678_v3, %v1677_v10  ;;  %1852 = vmatprep.subr.mxu1 %v1610_v40  ;;  %v1604_v15 = vadd.f32 %v1476_v20, %v1380_v6  ;;  %v1488_v49 = vmul.f32 0.6931472, %v3103_v16 }
 0x33f   :  { %1853 = vmatpush1.msra.mxu1 %v4427_v51  ;;  %v1648_v35 = vmul.f32 %v5455_v34, %v1612_v32  ;;  %vm1493_vm4 = vcmp.lt.f32.partialorder %v1492_v11, 0.0004427343  ;;  %v1646_v53 = vmul.f32 %v5452_v14, %v1610_v40  ;;  %v1652_v43 = vmul.f32 %v4509_v45, %v4537_v39 }
 0x340   :  { %v1663_v60 = vadd.f32 %v1662_v38, %v1661_v62  ;;  %v1680_v55 = vrot.slane %v1679_v47, 1  ;;  %v1640_v4 = vmul.f32 %v5451_v1, %v1604_v15  ;;  %1765 = vmatprep.subr.mxu0 %v1604_v15  ;;  %v1494_v63 = vsel %vm1493_vm4, %v1491_v48, %v1488_v49 }
 0x341   :  { %v1606_v19 = vadd.f32 %v1494_v63, %v1382_v8  ;;  %1766 = vmatpush1.msra.mxu0 %v4393_v17  ;;  %v1696_v17 = vld [vmem:[%s5334_s7 + $0x8] sm:$0xff] }
 0x342   :  { %v4576_v50 = vadd.f32 %v1663_v60, %v4201_v21  ;;  %v1681_v51 = vadd.f32 %v1680_v55, %v1679_v47  ;;  %v1664_v25 = vadd.f32 %v1644_v61, %v1640_v4  ;;  %2889 = vmatmul.mubr.msk.f32.vlgmr.msra.gmra.mxu0 %vm654_vm2, %v1695_v37  ;;  %v1650_v21 = vmul.f32 %v5455_v34, %v1614_v27  ;;  %v1697_v34 = vld [vmem:[%s5334_s7 + $0x10] sm:$0xff] }
 0x343   :  { %v1642_v41 = vmul.f32 %v5451_v1, %v1606_v19  ;;  %1854 = vmatprep.subr.mxu1 %v1606_v19  ;;  %1805 = vmatprep.mubr.f32.mxu0 %v5393_v24  ;;  %v5477_v19 = vld [vmem:[#allocation6_spill] sm:$0xff] }
 0x344   :  { %v4582_v33 = vadd.f32 %v1681_v51, %v4208_v56  ;;  %v1665_v14 = vadd.f32 %v1664_v25, %v1648_v35  ;;  %1855 = vmatpush1.msra.mxu1 %v4414_v31  ;;  %v1654_v56 = vmul.f32 %v4509_v45, %v4552_v9 }
 0x345   :  { %v1682_v39 = vadd.f32 %v1646_v53, %v1642_v41  ;;  %2893 = vmatmul.mubr.msk.f32.vlgmr.msra.gmra.mxu1 %vm654_vm2, %v1695_v37 }
 0x346   :  { %v1666_v18 = vadd.f32 %v1665_v14, %v1652_v43  ;;  %1894 = vmatprep.mubr.f32.mxu1 %v5393_v24  ;;  %2890 = vmatmul.mubr.msk.f32.gmra.mxu0 %vm654_vm2, %v1696_v17 }
 0x347   :  { %v1683_v1 = vadd.f32 %v1682_v39, %v1650_v21  ;;  %1811 = vmatprep.mubr.f32.mxu0 %v5393_v24 }
 0x348   :  { %v1667_v32 = vrot.slane %v1666_v18, 4 }
 0x349   :  { %v1684_v31 = vadd.f32 %v1683_v1, %v1654_v56  ;;  %2894 = vmatmul.mubr.msk.f32.gmra.mxu1 %vm654_vm2, %v1696_v17 }
 0x34a   :  { %v1668_v45 = vadd.f32 %v1667_v32, %v1666_v18  ;;  %1900 = vmatprep.mubr.f32.mxu1 %v5393_v24  ;;  %2891 = vmatmul.mubr.msk.f32.gmra.mxu0 %vm654_vm2, %v1697_v34 }
 0x34b   :  { %v1685_v46 = vrot.slane %v1684_v31, 4  ;;  %1817 = vmatprep.mubr.f32.mxu0 %v5393_v24 }
 0x34c   :  { %v1669_v58 = vrot.slane %v1668_v45, 2 }
 0x34d   :  { %v1686_v57 = vadd.f32 %v1685_v46, %v1684_v31  ;;  %2895 = vmatmul.mubr.msk.f32.gmra.mxu1 %vm654_vm2, %v1697_v34  ;;  %v5478_v46 = vld [vmem:[#allocation5_spill] sm:$0xff] }
 0x34e   :  { %v1670_v59 = vadd.f32 %v1669_v58, %v1668_v45  ;;  %1906 = vmatprep.mubr.f32.mxu1 %v5393_v24  ;;  %2892 = vmatmul.mubr.msk.f32.gmra.mxu0 %vm654_vm2, %v1698_v54 }
 0x34f   :  { %v1687_v9 = vrot.slane %v1686_v57, 2  ;;  %2333 = vmatprep.mubr.f32.mxu0 %v5393_v24 }
 0x350   :  { %v1671_v22 = vrot.slane %v1670_v59, 1 }
 0x351   :  { %v1688_v5 = vadd.f32 %v1687_v9, %v1686_v57  ;;  %2896 = vmatmul.mubr.msk.f32.gmra.mxu1 %vm654_vm2, %v1698_v54 }
 0x352   :  { %v1672_v27 = vadd.f32 %v1671_v22, %v1670_v59  ;;  %2422 = vmatprep.mubr.f32.mxu1 %v5393_v24 }
 0x353   :  { %v1689_v44 = vrot.slane %v1688_v5, 1 }
 0x354   :  { %v4617_v12 = vadd.f32 %v1672_v27, %v4242_v36  ;;  %v5476_v36 = vld [vmem:[#allocation7_spill] sm:$0xff] }
 0x355   :  { %v1690_v23 = vadd.f32 %v1689_v44, %v1688_v5 }
 0x357   :  { %v4620_v2 = vadd.f32 %v1690_v23, %v4245_v29 }
 0x402   :  { %v1801_v10 = vpop.f32.mrf.mxu0 }
 0x403   :  { %v4623_v28 = vadd.f32 %v1801_v10, %v5475_v0 }
 0x404   :  { %v1803_v26 = vpop.f32.mrf.mxu0 }
 0x405   :  { %v1929_v42 = vand.u32 2147483647, %v4623_v28  ;;  %v1890_v62 = vpop.f32.mrf.mxu1  ;;  %v4634_v11 = vadd.f32 %v1803_v26, %v5475_v0 }
 0x406   :  { %v4627_v3 = vadd.f32 %v1890_v62, %v5475_v0  ;;  %v1807_v52 = vpop.f32.mrf.mxu0 }
 0x407   :  { %v1945_v40 = vsub.f32 0.0, %v1929_v42  ;;  %v1892_v30 = vpop.f32.mrf.mxu1  ;;  %v4630_v13 = vadd.f32 %v1807_v52, %v5476_v36  ;;  %v1930_v49 = vand.u32 2147483647, %v4634_v11 }
 0x408   :  { %v1931_v29 = vand.u32 2147483647, %v4627_v3  ;;  %v1809_v6 = vpop.f32.mrf.mxu0  ;;  %v4646_v51 = vadd.f32 %v1892_v30, %v5475_v0 }
 0x409   :  { %v1961_v38 = vmul.f32 1.442695, %v1945_v40  ;;  %v1933_v47 = vand.u32 2147483647, %v4630_v13  ;;  %v1896_v16 = vpop.f32.mrf.mxu1  ;;  %v4643_v35 = vadd.f32 %v1809_v6, %v5476_v36  ;;  %v1946_v21 = vsub.f32 0.0, %v1930_v49 }
 0x40a   :  { %v1947_v61 = vsub.f32 0.0, %v1931_v29  ;;  %v4638_v20 = vadd.f32 %v1896_v16, %v5476_v36  ;;  %v1813_v48 = vpop.f32.mrf.mxu0  ;;  %v1932_v39 = vand.u32 2147483647, %v4646_v51 }
 0x40b   :  { %3104 = vpow2.f32 %v1961_v38  ;;  %v1949_v60 = vsub.f32 0.0, %v1933_v47  ;;  %v1898_v55 = vpop.f32.mrf.mxu1  ;;  %v4649_v43 = vadd.f32 %v1813_v48, %v5477_v19  ;;  %v1934_v17 = vand.u32 2147483647, %v4643_v35 }
 0x40c   :  { %v1965_v15 = vmul.f32 1.442695, %v1947_v61  ;;  %v1935_v8 = vand.u32 2147483647, %v4638_v20  ;;  %v1815_v37 = vpop.f32.mrf.mxu0  ;;  %v4662_v32 = vadd.f32 %v1898_v55, %v5476_v36  ;;  %v1963_v58 = vmul.f32 1.442695, %v1946_v21 }
 0x40d   :  { %v1969_v4 = vmul.f32 1.442695, %v1949_v60  ;;  %v1902_v63 = vpop.f32.mrf.mxu1  ;;  %v1937_v18 = vand.u32 2147483647, %v4649_v43  ;;  %v4659_v34 = vadd.f32 %v1815_v37, %v5477_v19  ;;  %v1950_v57 = vsub.f32 0.0, %v1934_v17 }
 0x40e   :  { %3106 = vpow2.f32 %v1965_v15  ;;  %v1951_v53 = vsub.f32 0.0, %v1935_v8  ;;  %v4652_v25 = vadd.f32 %v1902_v63, %v5477_v19  ;;  %v1819_v56 = vpop.f32.mrf.mxu0  ;;  %v1948_v5 = vsub.f32 0.0, %v1932_v39 }
 0x40f   :  { %3108 = vpow2.f32 %v1969_v4  ;;  %v1904_v14 = vpop.f32.mrf.mxu1  ;;  %v1953_v31 = vsub.f32 0.0, %v1937_v18  ;;  %v4668_v54 = vadd.f32 %v1819_v56, %v5478_v46  ;;  %v1938_v9 = vand.u32 2147483647, %v4659_v34 }
 0x410   :  { %v1973_v41 = vmul.f32 1.442695, %v1951_v53  ;;  %v1939_v1 = vand.u32 2147483647, %v4652_v25  ;;  %v4665_v45 = vadd.f32 %v1904_v14, %v5477_v19  ;;  %v1936_v26 = vand.u32 2147483647, %v4662_v32  ;;  %v1821_v36 = vpop.f32.mrf.mxu0 }
 0x411   :  { %v1908_v22 = vpop.f32.mrf.mxu1  ;;  %v1977_v27 = vmul.f32 1.442695, %v1953_v31  ;;  %v1954_v10 = vsub.f32 0.0, %v1938_v9  ;;  %v1941_v0 = vand.u32 2147483647, %v4668_v54  ;;  %v4684_v61 = vadd.f32 %v1821_v36, %v5478_v46 }
 0x412   :  { %3110 = vpow2.f32 %v1973_v41  ;;  %v1955_v59 = vsub.f32 0.0, %v1939_v1  ;;  %v1940_v44 = vand.u32 2147483647, %v4665_v45  ;;  %v4675_v42 = vadd.f32 %v1908_v22, %v5478_v46 }
 0x413   :  { %3112 = vpow2.f32 %v1977_v27  ;;  %v1971_v52 = vmul.f32 1.442695, %v1950_v57  ;;  %v1979_v40 = vmul.f32 1.442695, %v1954_v10  ;;  %v1967_v6 = vmul.f32 1.442695, %v1948_v5  ;;  %v1910_v49 = vpop.f32.mrf.mxu1 }
 0x414   :  { %v1981_v23 = vmul.f32 1.442695, %v1955_v59  ;;  %v1956_v30 = vsub.f32 0.0, %v1940_v44  ;;  %v1957_v38 = vsub.f32 0.0, %v1941_v0  ;;  %v1943_v47 = vand.u32 2147483647, %v4675_v42 }
 0x415   :  { %v1952_v55 = vsub.f32 0.0, %v1936_v26  ;;  %v1913_v4 = vmax.f32 %v4623_v28, 0.0  ;;  %v1915_v63 = vmax.f32 %v4627_v3, 0.0  ;;  %v1917_v21 = vmax.f32 %v4630_v13, 0.0 }
 0x416   :  { %3114 = vpow2.f32 %v1981_v23  ;;  %v1983_v15 = vmul.f32 1.442695, %v1956_v30  ;;  %v1985_v37 = vmul.f32 1.442695, %v1957_v38  ;;  %v1959_v53 = vsub.f32 0.0, %v1943_v47 }
 0x417   :  { %3116 = vpow2.f32 %v1963_v58  ;;  %v1942_v41 = vand.u32 2147483647, %v4684_v61  ;;  %v4697_v17 = vadd.f32 %v1910_v49, %v5478_v46  ;;  %v1919_v14 = vmax.f32 %v4638_v20, 0.0 }
 0x418   :  { %v4677_v62 = vpop.eup %3104  ;;  %3118 = vpow2.f32 %v1979_v40  ;;  %v1975_v39 = vmul.f32 1.442695, %v1952_v55  ;;  %v1989_v1 = vmul.f32 1.442695, %v1959_v53  ;;  %v1921_v57 = vmax.f32 %v4649_v43, 0.0 }
 0x419   :  { %v1993_v29 = vadd.f32 1.0, %v4677_v62  ;;  %v1996_v18 = vmul.f32 -0.5, %v4677_v62  ;;  %v1958_v31 = vsub.f32 0.0, %v1942_v41  ;;  %v1923_v59 = vmax.f32 %v4652_v25, 0.0 }
 0x41a   :  { %v1944_v22 = vand.u32 2147483647, %v4697_v17  ;;  %v1999_v30 = vand.u32 2147483647, %v4677_v62  ;;  %v1925_v55 = vmax.f32 %v4668_v54, 0.0 }
 0x41b   :  { %v4681_v16 = vpop.eup %3106  ;;  %3120 = vlog2.f32 %v1993_v29  ;;  %v1987_v9 = vmul.f32 1.442695, %v1958_v31  ;;  %v1997_v0 = vadd.f32 1.0, %v1996_v18 }
 0x41c   :  { %v4686_v48 = vpop.eup %3108  ;;  %v2011_v60 = vadd.f32 1.0, %v4681_v16  ;;  %3122 = vpow2.f32 %v1971_v52  ;;  %v2014_v46 = vmul.f32 -0.5, %v4681_v16  ;;  %v2017_v36 = vand.u32 2147483647, %v4681_v16 }
 0x41d   :  { %3124 = vpow2.f32 %v1967_v6  ;;  %v2029_v8 = vadd.f32 1.0, %v4686_v48  ;;  %v2032_v27 = vmul.f32 -0.5, %v4686_v48  ;;  %v1960_v6 = vsub.f32 0.0, %v1944_v22 }
 0x41e   :  { %3126 = vlog2.f32 %v2011_v60  ;;  %v2015_v47 = vadd.f32 1.0, %v2014_v46  ;;  %v2035_v60 = vand.u32 2147483647, %v4686_v48  ;;  %vm4732_vm5 = vcmp.lt.f32.partialorder %v1999_v30, 0.0004427343 }
 0x41f   :  { %v4692_v19 = vpop.eup %3110  ;;  %3128 = vlog2.f32 %v2029_v8  ;;  %v2033_v49 = vadd.f32 1.0, %v2032_v27  ;;  %v1927_v8 = vmax.f32 %v4675_v42, 0.0  ;;  %vm4736_vm6 = vcmp.lt.f32.partialorder %v2017_v36, 0.0004427343 }
 0x420   :  { %v2047_v56 = vadd.f32 1.0, %v4692_v19  ;;  %3130 = vpow2.f32 %v1983_v15  ;;  %v4707_v5 = vpop.eup %3112  ;;  %v2050_v26 = vmul.f32 -0.5, %v4692_v19  ;;  %v2053_v18 = vand.u32 2147483647, %v4692_v19 }
 0x421   :  { %3132 = vpow2.f32 %v1985_v37  ;;  %v2065_v52 = vadd.f32 1.0, %v4707_v5  ;;  %v1991_v37 = vmul.f32 1.442695, %v1960_v6  ;;  %v2016_v27 = vmul.f32 %v4681_v16, %v2015_v47 }
 0x422   :  { %3134 = vlog2.f32 %v2047_v56  ;;  %v1998_v56 = vmul.f32 %v4677_v62, %v1997_v0  ;;  %vm4744_vm7 = vcmp.lt.f32.partialorder %v2035_v60, 0.0004427343  ;;  %v2034_v36 = vmul.f32 %v4686_v48, %v2033_v49 }
 0x423   :  { %3136 = vpow2.f32 %v1989_v1  ;;  %v4712_v10 = vpop.eup %3114  ;;  %vm4755_vm8 = vcmp.lt.f32.partialorder %v2053_v18, 0.0004427343 }
 0x424   :  { %3138 = vpow2.f32 %v1975_v39  ;;  %v4716_v40 = vpop.eup %3116  ;;  %v2083_v29 = vadd.f32 1.0, %v4712_v10  ;;  %v2051_v39 = vadd.f32 1.0, %v2050_v26  ;;  %v2086_v31 = vmul.f32 -0.5, %v4712_v10 }
 0x425   :  { %3140 = vpow2.f32 %v1987_v9  ;;  %v4721_v38 = vpop.eup %3118  ;;  %v2089_v18 = vand.u32 2147483647, %v4712_v10 }
 0x426   :  { %3142 = vlog2.f32 %v2065_v52  ;;  %v2074_v26 = vadd.f32 1.0, %v4721_v38  ;;  %v2077_v16 = vmul.f32 -0.5, %v4721_v38 }
 0x427   :  { %3144 = vlog2.f32 %v2083_v29  ;;  %v2068_v29 = vmul.f32 -0.5, %v4707_v5  ;;  %vm4804_vm10 = vcmp.lt.f32.partialorder %v2089_v18, 0.0004427343 }
 0x428   :  { %v3121_v15 = vpop.eup %3120  ;;  %3146 = vpow2.f32 %v1991_v37 }
 0x429   :  { %v4726_v53 = vpop.eup %3122  ;;  %v1995_v41 = vmul.f32 0.6931472, %v3121_v15  ;;  %3148 = vlog2.f32 %v2074_v26  ;;  %v2069_v46 = vadd.f32 1.0, %v2068_v29 }
 0x42a   :  { %v4730_v1 = vpop.eup %3124  ;;  %v2038_v6 = vadd.f32 1.0, %v4726_v53  ;;  %v2041_v47 = vmul.f32 -0.5, %v4726_v53  ;;  %v2044_v25 = vand.u32 2147483647, %v4726_v53 }
 0x42b   :  { %v3127_v22 = vpop.eup %3126  ;;  %v2001_v62 = vsel %vm4732_vm5, %v1998_v56, %v1995_v41  ;;  %v2052_v41 = vmul.f32 %v4692_v19, %v2051_v39  ;;  %v2071_v56 = vand.u32 2147483647, %v4707_v5  ;;  %v2020_v54 = vadd.f32 1.0, %v4730_v1 }
 0x42c   :  { %v3129_v52 = vpop.eup %3128  ;;  %v2013_v30 = vmul.f32 0.6931472, %v3127_v22  ;;  %v4764_v48 = vadd.f32 %v2001_v62, %v1913_v4  ;;  %3150 = vlog2.f32 %v2038_v6  ;;  %v2087_v6 = vadd.f32 1.0, %v2086_v31 }
 0x42d   :  { %v4752_v15 = vpop.eup %3130  ;;  %v2031_v37 = vmul.f32 0.6931472, %v3129_v52  ;;  %vm4800_vm9 = vcmp.lt.f32.partialorder %v2071_v56, 0.0004427343  ;;  %vm4883_vm15 = vcmp.lt.f32.partialorder %v2044_v25, 0.0004427343 }
 0x42e   :  { %v4760_v60 = vpop.eup %3132  ;;  %v2019_v49 = vsel %vm4736_vm6, %v2016_v27, %v2013_v30  ;;  %v2092_v26 = vadd.f32 1.0, %v4752_v15  ;;  %v2173_v13 = vmul.f32 %v4478_v7, %v4764_v48  ;;  %v2098_v23 = vand.u32 2147483647, %v4752_v15 }
 0x42f   :  { %v3135_v19 = vpop.eup %3134  ;;  %v2037_v39 = vsel %vm4744_vm7, %v2034_v36, %v2031_v37  ;;  %v2101_v22 = vadd.f32 1.0, %v4760_v60  ;;  %v4784_v27 = vadd.f32 %v2019_v49, %v1915_v63  ;;  %v2078_v63 = vadd.f32 1.0, %v2077_v16 }
 0x430   :  { %v4774_v52 = vpop.eup %3136  ;;  %v4778_v28 = vadd.f32 %v2037_v39, %v1917_v21  ;;  %v2049_v4 = vmul.f32 0.6931472, %v3135_v19  ;;  %v5487_v21 = vld [vmem:[#allocation15_spill] sm:$0xff]  ;;  %v2070_v39 = vmul.f32 %v4707_v5, %v2069_v46  ;;  %v5501_v25 = vmax.f32 %v4684_v61, 0.0 }
 0x431   :  { %v4780_v62 = vpop.eup %3138  ;;  %3152 = vlog2.f32 %v2101_v22  ;;  %v2119_v0 = vadd.f32 1.0, %v4774_v52  ;;  %v2088_v22 = vmul.f32 %v4712_v10, %v2087_v6  ;;  %vm4899_vm0 = vcmp.lt.f32.partialorder %v2098_v23, 0.0004427343 }
 0x432   :  { %v4788_v30 = vpop.eup %3140  ;;  %v2177_v36 = vmul.f32 %v5487_v21, %v4778_v28  ;;  %v2055_v29 = vsel %vm4755_vm8, %v2052_v41, %v2049_v4  ;;  %v2095_v4 = vmul.f32 -0.5, %v4752_v15  ;;  %v5504_v61 = vmax.f32 %v4659_v34, 0.0 }
 0x433   :  { %v4798_v3 = vadd.f32 %v2055_v29, %v1919_v14  ;;  %3154 = vlog2.f32 %v2119_v0  ;;  %v3143_v49 = vpop.eup %3142  ;;  %v2110_v41 = vadd.f32 1.0, %v4788_v30  ;;  %v2175_v14 = vmul.f32 %v4478_v7, %v4784_v27 }
 0x434   :  { %v2189_v19 = vadd.f32 %v2177_v36, %v2173_v13  ;;  %v3145_v20 = vpop.eup %3144  ;;  %v2067_v31 = vmul.f32 0.6931472, %v3143_v49  ;;  %3156 = vlog2.f32 %v2092_v26  ;;  %v2104_v13 = vmul.f32 -0.5, %v4760_v60 }
 0x435   :  { %v2179_v56 = vmul.f32 %v5487_v21, %v4798_v3  ;;  %v2085_v18 = vmul.f32 0.6931472, %v3145_v20  ;;  %3158 = vlog2.f32 %v2110_v41  ;;  %v4817_v5 = vpop.eup %3146  ;;  %v2080_v36 = vand.u32 2147483647, %v4721_v38  ;;  %v5492_v20 = vld [vmem:[#allocation16_spill] sm:$0xff] }
 0x436   :  { %v2073_v0 = vsel %vm4800_vm9, %v2070_v39, %v2067_v31  ;;  %v2122_v26 = vmul.f32 -0.5, %v4774_v52  ;;  %v2128_v6 = vadd.f32 1.0, %v4817_v5  ;;  %v2042_v39 = vadd.f32 1.0, %v2041_v47 }
 0x437   :  { %v2207_v46 = vadd.f32 %v2179_v56, %v2175_v14  ;;  %v4825_v29 = vadd.f32 %v2073_v0, %v1921_v57  ;;  %v2091_v10 = vsel %vm4804_vm10, %v2088_v22, %v2085_v18  ;;  %v2056_v41 = vadd.f32 1.0, %v4780_v62 }
 0x438   :  { %v4833_v49 = vadd.f32 %v2091_v10, %v1923_v59  ;;  %v2113_v57 = vmul.f32 -0.5, %v4788_v30  ;;  %3160 = vlog2.f32 %v2128_v6  ;;  %v2096_v37 = vadd.f32 1.0, %v2095_v4  ;;  %v3149_v59 = vpop.eup %3148  ;;  %v4849_v10 = vpop.permute.xlu1 %2689 }
 0x439   :  { %v2181_v43 = vmul.f32 %v5492_v20, %v4825_v29  ;;  %v2105_v56 = vadd.f32 1.0, %v2104_v13  ;;  %v2107_v47 = vand.u32 2147483647, %v4760_v60  ;;  %v2123_v18 = vadd.f32 1.0, %v2122_v26  ;;  %v3151_v4 = vpop.eup %3150 }
 0x43a   :  { %v2183_v14 = vmul.f32 %v5492_v20, %v4833_v49  ;;  %v2125_v22 = vand.u32 2147483647, %v4774_v52  ;;  %vm4845_vm11 = vcmp.lt.f32.partialorder %v2080_v36, 0.0004427343  ;;  %v2079_v13 = vmul.f32 %v4721_v38, %v2078_v63 }
 0x43b   :  { %v2190_v16 = vadd.f32 %v2189_v19, %v2181_v43  ;;  %3162 = vlog2.f32 %v2056_v41  ;;  %v2114_v19 = vadd.f32 1.0, %v2113_v57  ;;  %v2116_v43 = vand.u32 2147483647, %v4788_v30 }
 0x43c   :  { %v2208_v6 = vadd.f32 %v2207_v46, %v2183_v14  ;;  %v4855_v26 = vmul.f32 %v4752_v15, %v2096_v37  ;;  %v2043_v36 = vmul.f32 %v4726_v53, %v2042_v39  ;;  %v2106_v44 = vmul.f32 %v4760_v60, %v2105_v56 }
 0x43d   :  { %v2131_v9 = vmul.f32 -0.5, %v4817_v5  ;;  %v2002_v46 = vadd.f32 1.0, %v4716_v40  ;;  %vm2108_vm12 = vcmp.lt.f32.partialorder %v2107_v47, 0.0004427343  ;;  %v2124_v63 = vmul.f32 %v4774_v52, %v2123_v18  ;;  %v4874_v47 = vpop.permute.xlu1 %2170 }
 0x43e   :  { %v3153_v31 = vpop.eup %3152  ;;  %vm4862_vm13 = vcmp.lt.f32.partialorder %v2125_v22, 0.0004427343  ;;  %v2076_v57 = vmul.f32 0.6931472, %v3149_v59  ;;  %v2040_v14 = vmul.f32 0.6931472, %v3151_v4  ;;  %v2115_v39 = vmul.f32 %v4788_v30, %v2114_v19 }
 0x43f   :  { %v2103_v58 = vmul.f32 0.6931472, %v3153_v31  ;;  %3164 = vlog2.f32 %v2002_v46  ;;  %vm4869_vm14 = vcmp.lt.f32.partialorder %v2116_v43, 0.0004427343  ;;  %v2059_v52 = vmul.f32 -0.5, %v4780_v62 }
 0x440   :  { %v3155_v38 = vpop.eup %3154  ;;  %v2134_v59 = vand.u32 2147483647, %v4817_v5  ;;  %v2082_v4 = vsel %vm4845_vm11, %v2079_v13, %v2076_v57  ;;  %3166 = vlog2.f32 %v2020_v54  ;;  %v1914_v22 = vmax.f32 %v4634_v11, 0.0 }
 0x441   :  { %v2109_v15 = vsel %vm2108_vm12, %v2106_v44, %v2103_v58  ;;  %v2121_v37 = vmul.f32 0.6931472, %v3155_v38  ;;  %v3157_v53 = vpop.eup %3156  ;;  %v2132_v44 = vadd.f32 1.0, %v2131_v9  ;;  %v2046_v9 = vsel %vm4883_vm15, %v2043_v36, %v2040_v14 }
 0x442   :  { %v2149_v60 = vadd.f32 %v2109_v15, %v1925_v55  ;;  %v3159_v31 = vpop.eup %3158  ;;  %v2094_v19 = vmul.f32 0.6931472, %v3157_v53  ;;  %v2005_v36 = vmul.f32 -0.5, %v4716_v40  ;;  %v2062_v15 = vand.u32 2147483647, %v4780_v62 }
 0x443   :  { %v2127_v58 = vsel %vm4862_vm13, %v2124_v63, %v2121_v37  ;;  %v2112_v18 = vmul.f32 0.6931472, %v3159_v31  ;;  %v2133_v0 = vmul.f32 %v4817_v5, %v2132_v44  ;;  %vm2135_vm1 = vcmp.lt.f32.partialorder %v2134_v59, 0.0004427343 }
 0x444   :  { %v2185_v55 = vmul.f32 %v4874_v47, %v2149_v60  ;;  %v2151_v30 = vadd.f32 %v2127_v58, %v1927_v8  ;;  %v2060_v8 = vadd.f32 1.0, %v2059_v52  ;;  %v2146_v37 = vadd.f32 %v2082_v4, %v5504_v61 }
 0x445   :  { %v2118_v42 = vsel %vm4869_vm14, %v2115_v39, %v2112_v18  ;;  %v3161_v38 = vpop.eup %3160  ;;  %v2100_v23 = vsel %vm4899_vm0, %v4855_v26, %v2094_v19  ;;  %v5505_v5 = vmax.f32 %v4643_v35, 0.0  ;;  %v5506_v31 = vmax.f32 %v4697_v17, 0.0 }
 0x446   :  { %v2191_v43 = vadd.f32 %v2190_v16, %v2185_v55  ;;  %v2187_v46 = vmul.f32 %v4874_v47, %v2151_v30  ;;  %v4896_v63 = vadd.f32 %v2118_v42, %v5501_v25  ;;  %v2130_v57 = vmul.f32 0.6931472, %v3161_v38 }
 0x447   :  { %v2142_v14 = vadd.f32 %v2046_v9, %v5505_v5  ;;  %v2061_v52 = vmul.f32 %v4780_v62, %v2060_v8  ;;  %v2006_v44 = vadd.f32 1.0, %v2005_v36  ;;  %v2023_v59 = vmul.f32 -0.5, %v4730_v1  ;;  %v2229_v36 = vld [vmem:[%s5335_s9] sm:$0xff] }
 0x448   :  { %v2192_v16 = vrot.slane %v2191_v43, 4  ;;  %v2209_v41 = vadd.f32 %v2208_v6, %v2187_v46  ;;  %2293 = vmatprep.subr.mxu0 %v4896_v63  ;;  %v3163_v53 = vpop.eup %3162  ;;  %v2136_v6 = vsel %vm2135_vm1, %v2133_v0, %v2130_v57  ;;  %vm2063_vm3 = vcmp.lt.f32.partialorder %v2062_v15, 0.0004427343 }
 0x449   :  { %2294 = vmatpush1.msra.mxu0 %v2149_v60  ;;  %v4916_v58 = vadd.f32 %v2136_v6, %v5506_v31  ;;  %v2058_v34 = vmul.f32 0.6931472, %v3163_v53  ;;  %v2008_v35 = vand.u32 2147483647, %v4716_v40  ;;  %v1920_v60 = vmax.f32 %v4662_v32, 0.0 }
 0x44a   :  { %v2193_v39 = vadd.f32 %v2192_v16, %v2191_v43  ;;  %v2210_v56 = vrot.slane %v2209_v41, 4  ;;  %2295 = vmatprep.subr.mxu0 %v2146_v37  ;;  %v5507_v17 = vmax.f32 %v4665_v45, 0.0  ;;  %v2007_v32 = vmul.f32 %v4716_v40, %v2006_v44 }
 0x44b   :  { %2296 = vmatpush1.msra.mxu0 %v4825_v29  ;;  %2382 = vmatprep.subr.mxu1 %v4916_v58  ;;  %v2064_v55 = vsel %vm2063_vm3, %v2061_v52, %v2058_v34  ;;  %v2024_v43 = vadd.f32 1.0, %v2023_v59  ;;  %vm2009_vm4 = vcmp.lt.f32.partialorder %v2008_v35, 0.0004427343  ;;  %v2026_v45 = vand.u32 2147483647, %v4730_v1 }
 0x44c   :  { %v2194_v26 = vrot.slane %v2193_v39, 2  ;;  %v2211_v54 = vadd.f32 %v2210_v56, %v2209_v41  ;;  %v2148_v62 = vadd.f32 %v2100_v23, %v5507_v17  ;;  %2297 = vmatprep.subr.mxu0 %v2142_v14  ;;  %v3165_v18 = vpop.eup %3164  ;;  %2383 = vmatpush1.msra.mxu1 %v2151_v30  ;;  %v2144_v29 = vadd.f32 %v2064_v55, %v1920_v60 }
 0x44d   :  { %2298 = vmatpush1.msra.mxu0 %v4778_v28  ;;  %v2004_v9 = vmul.f32 0.6931472, %v3165_v18  ;;  %v3167_v8 = vpop.eup %3166  ;;  %v2178_v28 = vmul.f32 %v5487_v21, %v2142_v14  ;;  %v1916_v40 = vmax.f32 %v4646_v51, 0.0  ;;  %v2182_v0 = vmul.f32 %v5492_v20, %v2146_v37 }
 0x44e   :  { %v2195_v4 = vadd.f32 %v2194_v26, %v2193_v39  ;;  %v2212_v19 = vrot.slane %v2211_v54, 2  ;;  %2384 = vmatprep.subr.mxu1 %v2148_v62  ;;  %v2022_v13 = vmul.f32 0.6931472, %v3167_v8  ;;  %vm2027_vm5 = vcmp.lt.f32.partialorder %v2026_v45, 0.0004427343 }
 0x44f   :  { %2385 = vmatpush1.msra.mxu1 %v4833_v49  ;;  %v2010_v11 = vsel %vm2009_vm4, %v2007_v32, %v2004_v9  ;;  %v2025_v49 = vmul.f32 %v4730_v1, %v2024_v43  ;;  %v2186_v51 = vmul.f32 %v4874_v47, %v4896_v63  ;;  %v2180_v15 = vmul.f32 %v5487_v21, %v2144_v29  ;;  %v5510_v9 = vld [vmem:[#allocation10_spill] sm:$0xff] }
 0x450   :  { %v2196_v46 = vrot.slane %v2195_v4, 1  ;;  %v2213_v42 = vadd.f32 %v2212_v19, %v2211_v54  ;;  %2386 = vmatprep.subr.mxu1 %v2144_v29  ;;  %v2138_v25 = vadd.f32 %v2010_v11, %v1914_v22  ;;  %v2184_v63 = vmul.f32 %v5492_v20, %v2148_v62  ;;  %v5509_v22 = vld [vmem:[#allocation9_spill] sm:$0xff]  ;;  %v5511_v11 = vld [vmem:[#allocation11_spill] sm:$0xff] }
 0x451   :  { %2387 = vmatpush1.msra.mxu1 %v4798_v3  ;;  %v2028_v3 = vsel %vm2027_vm5, %v2025_v49, %v2022_v13 }
 0x452   :  { %v2197_v38 = vadd.f32 %v2196_v46, %v2195_v4  ;;  %v2214_v30 = vrot.slane %v2213_v42, 1  ;;  %v2174_v57 = vmul.f32 %v4478_v7, %v2138_v25  ;;  %2299 = vmatprep.subr.mxu0 %v2138_v25  ;;  %v2140_v37 = vadd.f32 %v2028_v3, %v1916_v40 }
 0x453   :  { %2300 = vmatpush1.msra.mxu0 %v4764_v48 }
 0x454   :  { %v4939_v16 = vadd.f32 %v2197_v38, %v4576_v50  ;;  %v2215_v41 = vadd.f32 %v2214_v30, %v2213_v42  ;;  %v2198_v61 = vadd.f32 %v2178_v28, %v2174_v57  ;;  %2897 = vmatmul.mubr.msk.f32.vlgmr.msra.gmra.mxu0 %vm654_vm2, %v2229_v36  ;;  %v2230_v50 = vld [vmem:[%s5335_s9 + $0x8] sm:$0xff]  ;;  %v2176_v48 = vmul.f32 %v4478_v7, %v2140_v37  ;;  %v2231_v7 = vld [vmem:[%s5335_s9 + $0x10] sm:$0xff] }
 0x455   :  { %2339 = vmatprep.mubr.f32.mxu0 %v5393_v24  ;;  %2388 = vmatprep.subr.mxu1 %v2140_v37 }
 0x456   :  { %v4946_v1 = vadd.f32 %v2215_v41, %v4582_v33  ;;  %v2199_v23 = vadd.f32 %v2198_v61, %v2182_v0  ;;  %2389 = vmatpush1.msra.mxu1 %v4784_v27  ;;  %v2188_v33 = vmul.f32 %v4874_v47, %v4916_v58  ;;  %v2216_v5 = vadd.f32 %v2180_v15, %v2176_v48  ;;  %v2232_v47 = vld [vmem:[%s5335_s9 + $0x18] sm:$0xff] }
 0x457   :  { %2901 = vmatmul.mubr.msk.f32.vlgmr.msra.gmra.mxu1 %vm654_vm2, %v2229_v36 }
 0x458   :  { %v2200_v21 = vadd.f32 %v2199_v23, %v2186_v51  ;;  %2898 = vmatmul.mubr.msk.f32.gmra.mxu0 %vm654_vm2, %v2230_v50  ;;  %2428 = vmatprep.mubr.f32.mxu1 %v5393_v24  ;;  %v2217_v14 = vadd.f32 %v2216_v5, %v2184_v63 }
 0x459   :  { %2345 = vmatprep.mubr.f32.mxu0 %v5393_v24 }
 0x45a   :  { %v2201_v20 = vrot.slane %v2200_v21, 4  ;;  %v2218_v53 = vadd.f32 %v2217_v14, %v2188_v33 }
 0x45b   :  { %2902 = vmatmul.mubr.msk.f32.gmra.mxu1 %vm654_vm2, %v2230_v50 }
 0x45c   :  { %v2202_v27 = vadd.f32 %v2201_v20, %v2200_v21  ;;  %2899 = vmatmul.mubr.msk.f32.gmra.mxu0 %vm654_vm2, %v2231_v7  ;;  %2434 = vmatprep.mubr.f32.mxu1 %v5393_v24  ;;  %v2219_v56 = vrot.slane %v2218_v53, 4 }
 0x45d   :  { %2351 = vmatprep.mubr.f32.mxu0 %v5393_v24 }
 0x45e   :  { %v2203_v39 = vrot.slane %v2202_v27, 2  ;;  %v2220_v52 = vadd.f32 %v2219_v56, %v2218_v53 }
 0x45f   :  { %2903 = vmatmul.mubr.msk.f32.gmra.mxu1 %vm654_vm2, %v2231_v7 }
 0x460   :  { %v2204_v6 = vadd.f32 %v2203_v39, %v2202_v27  ;;  %2900 = vmatmul.mubr.msk.f32.gmra.mxu0 %vm654_vm2, %v2232_v47  ;;  %2440 = vmatprep.mubr.f32.mxu1 %v5393_v24  ;;  %v2221_v58 = vrot.slane %v2220_v52, 2 }
 0x462   :  { %v2205_v31 = vrot.slane %v2204_v6, 1  ;;  %v2222_v44 = vadd.f32 %v2221_v58, %v2220_v52 }
 0x463   :  { %2904 = vmatmul.mubr.msk.f32.gmra.mxu1 %vm654_vm2, %v2232_v47 }
 0x464   :  { %v2206_v34 = vadd.f32 %v2205_v31, %v2204_v6  ;;  %v2223_v26 = vrot.slane %v2222_v44, 1 }
 0x466   :  { %v4978_v59 = vadd.f32 %v2206_v34, %v4617_v12  ;;  %v2224_v54 = vadd.f32 %v2223_v26, %v2222_v44  ;;  %v5512_v34 = vld [vmem:[#allocation12_spill] sm:$0xff] }
 0x468   :  { %v4981_v35 = vadd.f32 %v2224_v54, %v4620_v2 }
 0x46a   :  { %5508 = vst [vmem:[#allocation4_spill] sm:$0xff] %v4981_v35 }
 0x514   :  { %v2335_v60 = vpop.f32.mrf.mxu0 }
 0x515   :  { %v4984_v4 = vadd.f32 %v2335_v60, %v5509_v22 }
 0x516   :  { %v2337_v17 = vpop.f32.mrf.mxu0 }
 0x517   :  { %v2424_v62 = vpop.f32.mrf.mxu1  ;;  %v4987_v19 = vadd.f32 %v2337_v17, %v5509_v22  ;;  %v2463_v43 = vand.u32 2147483647, %v4984_v4 }
 0x518   :  { %v2341_v55 = vpop.f32.mrf.mxu0  ;;  %v4990_v12 = vadd.f32 %v2424_v62, %v5509_v22 }
 0x519   :  { %v2426_v18 = vpop.f32.mrf.mxu1  ;;  %v4993_v32 = vadd.f32 %v2341_v55, %v5510_v9  ;;  %v2464_v42 = vand.u32 2147483647, %v4987_v19  ;;  %v2479_v30 = vsub.f32 0.0, %v2463_v43 }
 0x51a   :  { %v2343_v24 = vpop.f32.mrf.mxu0  ;;  %v2465_v45 = vand.u32 2147483647, %v4990_v12  ;;  %v5010_v57 = vadd.f32 %v2426_v18, %v5509_v22 }
 0x51b   :  { %v2430_v29 = vpop.f32.mrf.mxu1  ;;  %v2467_v38 = vand.u32 2147483647, %v4993_v32  ;;  %v2480_v25 = vsub.f32 0.0, %v2464_v42  ;;  %v2495_v41 = vmul.f32 1.442695, %v2479_v30  ;;  %v5014_v15 = vadd.f32 %v2343_v24, %v5510_v9 }
 0x51c   :  { %v2347_v2 = vpop.f32.mrf.mxu0  ;;  %v5003_v40 = vadd.f32 %v2430_v29, %v5510_v9  ;;  %v2481_v0 = vsub.f32 0.0, %v2465_v45  ;;  %v2466_v48 = vand.u32 2147483647, %v5010_v57 }
 0x51d   :  { %v2432_v46 = vpop.f32.mrf.mxu1  ;;  %v4999_v8 = vadd.f32 %v2347_v2, %v5511_v11  ;;  %v2483_v49 = vsub.f32 0.0, %v2467_v38  ;;  %v2497_v51 = vmul.f32 1.442695, %v2480_v25  ;;  %3168 = vpow2.f32 %v2495_v41 }
 0x51e   :  { %v2469_v3 = vand.u32 2147483647, %v5003_v40  ;;  %v2499_v61 = vmul.f32 1.442695, %v2481_v0  ;;  %v2349_v50 = vpop.f32.mrf.mxu0  ;;  %v2468_v21 = vand.u32 2147483647, %v5014_v15  ;;  %v5023_v20 = vadd.f32 %v2432_v46, %v5510_v9 }
 0x51f   :  { %v2436_v28 = vpop.f32.mrf.mxu1  ;;  %v2471_v13 = vand.u32 2147483647, %v4999_v8  ;;  %v2503_v63 = vmul.f32 1.442695, %v2483_v49  ;;  %3170 = vpow2.f32 %v2497_v51  ;;  %v5020_v5 = vadd.f32 %v2349_v50, %v5511_v11 }
 0x520   :  { %v5007_v36 = vadd.f32 %v2436_v28, %v5511_v11  ;;  %v2485_v33 = vsub.f32 0.0, %v2469_v3  ;;  %3172 = vpow2.f32 %v2499_v61  ;;  %v2482_v27 = vsub.f32 0.0, %v2466_v48  ;;  %v2353_v56 = vpop.f32.mrf.mxu0 }
 0x521   :  { %v2487_v37 = vsub.f32 0.0, %v2471_v13  ;;  %3174 = vpow2.f32 %v2503_v63  ;;  %v2484_v47 = vsub.f32 0.0, %v2468_v21  ;;  %v2472_v39 = vand.u32 2147483647, %v5020_v5  ;;  %v2438_v6 = vpop.f32.mrf.mxu1 }
 0x522   :  { %v2473_v23 = vand.u32 2147483647, %v5007_v36  ;;  %v2507_v53 = vmul.f32 1.442695, %v2485_v33  ;;  %v2470_v52 = vand.u32 2147483647, %v5023_v20  ;;  %v5028_v44 = vadd.f32 %v2353_v56, %v5512_v34 }
 0x523   :  { %v2511_v7 = vmul.f32 1.442695, %v2487_v37  ;;  %v2501_v58 = vmul.f32 1.442695, %v2482_v27  ;;  %v2505_v26 = vmul.f32 1.442695, %v2484_v47  ;;  %v5031_v60 = vadd.f32 %v2438_v6, %v5511_v11  ;;  %v2442_v62 = vpop.f32.mrf.mxu1  ;;  %v2355_v27 = vpop.f32.mrf.mxu0 }
 0x524   :  { %v2489_v14 = vsub.f32 0.0, %v2473_v23  ;;  %v2488_v54 = vsub.f32 0.0, %v2472_v39  ;;  %v2486_v17 = vsub.f32 0.0, %v2470_v52  ;;  %v2475_v55 = vand.u32 2147483647, %v5028_v44 }
 0x525   :  { %3176 = vpow2.f32 %v2511_v7  ;;  %v2474_v22 = vand.u32 2147483647, %v5031_v60  ;;  %v5040_v9 = vadd.f32 %v2442_v62, %v5512_v34  ;;  %v2444_v6 = vpop.f32.mrf.mxu1 }
 0x526   :  { %v2515_v31 = vmul.f32 1.442695, %v2489_v14  ;;  %3178 = vpow2.f32 %v2507_v53  ;;  %v2513_v24 = vmul.f32 1.442695, %v2488_v54  ;;  %v2509_v43 = vmul.f32 1.442695, %v2486_v17 }
 0x527   :  { %v2491_v45 = vsub.f32 0.0, %v2475_v55  ;;  %v2490_v38 = vsub.f32 0.0, %v2474_v22  ;;  %v2477_v28 = vand.u32 2147483647, %v5040_v9  ;;  %v5079_v55 = vadd.f32 %v2355_v27, %v5512_v34 }
 0x528   :  { %3180 = vpow2.f32 %v2515_v31 }
 0x529   :  { %3182 = vpow2.f32 %v2501_v58  ;;  %v2519_v3 = vmul.f32 1.442695, %v2491_v45  ;;  %v2517_v50 = vmul.f32 1.442695, %v2490_v38  ;;  %v2493_v33 = vsub.f32 0.0, %v2477_v28 }
 0x52a   :  { %v5034_v18 = vpop.eup %3168  ;;  %3184 = vpow2.f32 %v2505_v26 }
 0x52b   :  { %v2527_v42 = vadd.f32 1.0, %v5034_v18  ;;  %3186 = vpow2.f32 %v2513_v24  ;;  %v2530_v61 = vmul.f32 -0.5, %v5034_v18  ;;  %v2523_v62 = vmul.f32 1.442695, %v2493_v33 }
 0x52c   :  { %v5037_v29 = vpop.eup %3170  ;;  %3188 = vpow2.f32 %v2509_v43  ;;  %v2533_v45 = vand.u32 2147483647, %v5034_v18 }
 0x52d   :  { %v5042_v2 = vpop.eup %3172  ;;  %v2536_v11 = vadd.f32 1.0, %v5037_v29  ;;  %3190 = vlog2.f32 %v2527_v42  ;;  %v2531_v31 = vadd.f32 1.0, %v2530_v61  ;;  %v2539_v58 = vmul.f32 -0.5, %v5037_v29 }
 0x52e   :  { %v5044_v46 = vpop.eup %3174  ;;  %v2545_v30 = vadd.f32 1.0, %v5042_v2  ;;  %v2548_v17 = vmul.f32 -0.5, %v5042_v2  ;;  %v5085_v42 = vadd.f32 %v2444_v6, %v5512_v34  ;;  %vm5106_vm2 = vcmp.lt.f32.partialorder %v2533_v45, 0.0004427343 }
 0x52f   :  { %v2563_v49 = vadd.f32 1.0, %v5044_v46  ;;  %3192 = vlog2.f32 %v2536_v11  ;;  %v2566_v24 = vmul.f32 -0.5, %v5044_v46  ;;  %v5096_v61 = vmul.f32 %v5034_v18, %v2531_v31 }
 0x530   :  { %3194 = vlog2.f32 %v2545_v30  ;;  %v2542_v30 = vand.u32 2147483647, %v5037_v29  ;;  %v2549_v34 = vadd.f32 1.0, %v2548_v17  ;;  %v2478_v6 = vand.u32 2147483647, %v5085_v42 }
 0x531   :  { %3196 = vlog2.f32 %v2563_v49  ;;  %v2476_v49 = vand.u32 2147483647, %v5079_v55  ;;  %v2567_v33 = vadd.f32 1.0, %v2566_v24  ;;  %v2569_v7 = vand.u32 2147483647, %v5044_v46 }
 0x532   :  { %v5050_v25 = vpop.eup %3176  ;;  %3198 = vpow2.f32 %v2519_v3  ;;  %v2494_v17 = vsub.f32 0.0, %v2478_v6  ;;  %vm5118_vm6 = vcmp.lt.f32.partialorder %v2542_v30, 0.0004427343 }
 0x533   :  { %v5059_v63 = vpop.eup %3178  ;;  %v2599_v48 = vadd.f32 1.0, %v5050_v25  ;;  %3200 = vpow2.f32 %v2517_v50  ;;  %v2540_v50 = vadd.f32 1.0, %v2539_v58  ;;  %v2492_v27 = vsub.f32 0.0, %v2476_v49 }
 0x534   :  { %v2581_v26 = vadd.f32 1.0, %v5059_v63  ;;  %v2584_v37 = vmul.f32 -0.5, %v5059_v63  ;;  %v5123_v45 = vmul.f32 %v5044_v46, %v2567_v33  ;;  %vm5130_vm8 = vcmp.lt.f32.partialorder %v2569_v7, 0.0004427343 }
 0x535   :  { %v5066_v53 = vpop.eup %3180  ;;  %3202 = vlog2.f32 %v2599_v48  ;;  %v2521_v58 = vmul.f32 1.442695, %v2492_v27  ;;  %v5111_v49 = vmul.f32 %v5037_v29, %v2540_v50  ;;  %v2587_v30 = vand.u32 2147483647, %v5059_v63 }
 0x536   :  { %v5071_v52 = vpop.eup %3182  ;;  %v2617_v22 = vadd.f32 1.0, %v5066_v53  ;;  %3204 = vpow2.f32 %v2523_v62  ;;  %v2605_v14 = vand.u32 2147483647, %v5050_v25 }
 0x537   :  { %v5075_v54 = vpop.eup %3184  ;;  %v2557_v11 = vmul.f32 -0.5, %v5071_v52  ;;  %3206 = vlog2.f32 %v2581_v26  ;;  %v2554_v48 = vadd.f32 1.0, %v5071_v52  ;;  %v2551_v26 = vand.u32 2147483647, %v5042_v2 }
 0x538   :  { %v2572_v28 = vadd.f32 1.0, %v5075_v54  ;;  %v5093_v3 = vpop.eup %3186  ;;  %3208 = vlog2.f32 %v2617_v22  ;;  %v2575_v39 = vmul.f32 -0.5, %v5075_v54  ;;  %v2578_v33 = vand.u32 2147483647, %v5075_v54 }
 0x539   :  { %v5100_v62 = vpop.eup %3188  ;;  %v2558_v56 = vadd.f32 1.0, %v2557_v11  ;;  %v2608_v31 = vadd.f32 1.0, %v5093_v3  ;;  %vm5126_vm7 = vcmp.lt.f32.partialorder %v2551_v26, 0.0004427343  ;;  %v2525_v26 = vmul.f32 1.442695, %v2494_v17 }
 0x53a   :  { %v3191_v18 = vpop.eup %3190  ;;  %3210 = vlog2.f32 %v2572_v28  ;;  %v5116_v28 = vmul.f32 %v5042_v2, %v2549_v34  ;;  %v2590_v6 = vadd.f32 1.0, %v5100_v62  ;;  %v2585_v2 = vadd.f32 1.0, %v2584_v37 }
 0x53b   :  { %3212 = vlog2.f32 %v2554_v48  ;;  %v2602_v34 = vmul.f32 -0.5, %v5050_v25  ;;  %v5139_v46 = vmul.f32 %v5071_v52, %v2558_v56  ;;  %v2576_v7 = vadd.f32 1.0, %v2575_v39 }
 0x53c   :  { %v3193_v24 = vpop.eup %3192  ;;  %3214 = vpow2.f32 %v2521_v58  ;;  %v2593_v23 = vmul.f32 -0.5, %v5100_v62  ;;  %v2529_v11 = vmul.f32 0.6931472, %v3191_v18  ;;  %v2620_v56 = vmul.f32 -0.5, %v5066_v53 }
 0x53d   :  { %v3195_v38 = vpop.eup %3194  ;;  %3216 = vlog2.f32 %v2608_v31  ;;  %v2538_v51 = vmul.f32 0.6931472, %v3193_v24  ;;  %v2586_v31 = vmul.f32 %v5059_v63, %v2585_v2  ;;  %vm5150_vm9 = vcmp.lt.f32.partialorder %v2587_v30, 0.0004427343 }
 0x53e   :  { %v3197_v29 = vpop.eup %3196  ;;  %3218 = vlog2.f32 %v2590_v6  ;;  %v2603_v39 = vadd.f32 1.0, %v2602_v34  ;;  %v2547_v37 = vmul.f32 0.6931472, %v3195_v38  ;;  %v5158_v0 = vmul.f32 %v5075_v54, %v2576_v7 }
 0x53f   :  { %v5136_v43 = vpop.eup %3198  ;;  %v2565_v41 = vmul.f32 0.6931472, %v3197_v29  ;;  %v2594_v24 = vadd.f32 1.0, %v2593_v23  ;;  %v2535_v2 = vsel %vm5106_vm2, %v5096_v61, %v2529_v11  ;;  %vm5164_vm10 = vcmp.lt.f32.partialorder %v2605_v14, 0.0004427343 }
 0x540   :  { %v5142_v58 = vpop.eup %3200  ;;  %v2635_v47 = vadd.f32 1.0, %v5136_v43  ;;  %v2621_v38 = vadd.f32 1.0, %v2620_v56  ;;  %v2623_v29 = vand.u32 2147483647, %v5066_v53  ;;  %v2544_v54 = vsel %vm5118_vm6, %v5111_v49, %v2538_v51 }
 0x541   :  { %v2626_v18 = vadd.f32 1.0, %v5142_v58  ;;  %vm5172_vm11 = vcmp.lt.f32.partialorder %v2578_v33, 0.0004427343  ;;  %v2611_v61 = vmul.f32 -0.5, %v5093_v3  ;;  %v2553_v14 = vsel %vm5126_vm7, %v5116_v28, %v2547_v37 }
 0x542   :  { %v3203_v21 = vpop.eup %3202  ;;  %3220 = vlog2.f32 %v2635_v47  ;;  %v2571_v22 = vsel %vm5130_vm8, %v5123_v45, %v2565_v41  ;;  %v5527_v49 = vmax.f32 %v4984_v4, 0.0  ;;  %v5187_v34 = vmul.f32 %v5100_v62, %v2594_v24 }
 0x543   :  { %v5154_v13 = vpop.eup %3204  ;;  %3222 = vpow2.f32 %v2525_v26  ;;  %v2601_v35 = vmul.f32 0.6931472, %v3203_v21  ;;  %v2604_v21 = vmul.f32 %v5050_v25, %v2603_v39  ;;  %v2638_v33 = vmul.f32 -0.5, %v5136_v43 }
 0x544   :  { %v3207_v6 = vpop.eup %3206  ;;  %v2653_v63 = vadd.f32 1.0, %v5154_v13  ;;  %v2671_v27 = vadd.f32 %v2535_v2, %v5527_v49  ;;  %v2622_v26 = vmul.f32 %v5066_v53, %v2621_v38  ;;  %vm5193_vm12 = vcmp.lt.f32.partialorder %v2623_v29, 0.0004427343  ;;  %v5540_v49 = vld [vmem:[#allocation17_spill] sm:$0xff] }
 0x545   :  { %v3209_v30 = vpop.eup %3208  ;;  %v2583_v11 = vmul.f32 0.6931472, %v3207_v6  ;;  %v2607_v25 = vsel %vm5164_vm10, %v2604_v21, %v2601_v35  ;;  %v2614_v45 = vand.u32 2147483647, %v5093_v3  ;;  %v5530_v48 = vmax.f32 %v4990_v12, 0.0 }
 0x546   :  { %3224 = vlog2.f32 %v2653_v63  ;;  %v2619_v28 = vmul.f32 0.6931472, %v3209_v30  ;;  %v5531_v37 = vmax.f32 %v4987_v19, 0.0  ;;  %v5532_v56 = vmax.f32 %v4993_v32, 0.0 }
 0x547   :  { %3226 = vlog2.f32 %v2626_v18  ;;  %v3211_v51 = vpop.eup %3210  ;;  %v2673_v7 = vadd.f32 %v2553_v14, %v5530_v48  ;;  %v2612_v18 = vadd.f32 1.0, %v2611_v61  ;;  %v2589_v53 = vsel %vm5150_vm9, %v2586_v31, %v2583_v11 }
 0x548   :  { %v3213_v50 = vpop.eup %3212  ;;  %v2672_v35 = vadd.f32 %v2544_v54, %v5531_v37  ;;  %v2675_v39 = vadd.f32 %v2571_v22, %v5532_v56  ;;  %v2574_v6 = vmul.f32 0.6931472, %v3211_v51  ;;  %v5533_v24 = vmax.f32 %v4999_v8, 0.0 }
 0x549   :  { %v5198_v4 = vpop.eup %3214  ;;  %v2707_v12 = vmul.f32 %v4849_v10, %v2671_v27  ;;  %v5212_v38 = vmul.f32 0.6931472, %v3213_v50  ;;  %v2639_v19 = vadd.f32 1.0, %v2638_v33  ;;  %v2656_v29 = vmul.f32 -0.5, %v5154_v13  ;;  %v5544_v50 = vld [vmem:[#allocation19_spill] sm:$0xff] }
 0x54a   :  { %v2679_v63 = vadd.f32 %v2607_v25, %v5533_v24  ;;  %v2644_v2 = vadd.f32 1.0, %v5198_v4  ;;  %v3217_v47 = vpop.eup %3216  ;;  %v2625_v32 = vsel %vm5193_vm12, %v2622_v26, %v2619_v28  ;;  %vm5217_vm13 = vcmp.lt.f32.partialorder %v2614_v45, 0.0004427343 }
 0x54b   :  { %v2641_v8 = vand.u32 2147483647, %v5136_v43  ;;  %v3219_v31 = vpop.eup %3218  ;;  %v2709_v30 = vmul.f32 %v4849_v10, %v2673_v7  ;;  %v5224_v54 = vmul.f32 %v4849_v10, %v2672_v35  ;;  %v5536_v21 = vand.u32 2147483647, %v5071_v52 }
 0x54c   :  { %3228 = vlog2.f32 %v2644_v2  ;;  %v5539_v14 = vmax.f32 %v5003_v40, 0.0  ;;  %v2613_v11 = vmul.f32 %v5093_v3, %v2612_v18  ;;  %v2711_v27 = vmul.f32 %v5540_v49, %v2675_v39  ;;  %v5260_v2 = vpop.permute.xlu1 %2704 }
 0x54d   :  { %vm5228_vm14 = vcmp.lt.f32.partialorder %v5536_v21, 0.0004427343  ;;  %v2580_v25 = vsel %vm5172_vm11, %v5158_v0, %v2574_v6  ;;  %v5541_v33 = vand.u32 2147483647, %v5100_v62  ;;  %v2715_v28 = vmul.f32 %v5544_v50, %v2679_v63 }
 0x54e   :  { %v2677_v22 = vadd.f32 %v2589_v53, %v5539_v14  ;;  %v2610_v26 = vmul.f32 0.6931472, %v3217_v47  ;;  %v5545_v3 = vmax.f32 %v5007_v36, 0.0  ;;  %v2640_v48 = vmul.f32 %v5136_v43, %v2639_v19 }
 0x54f   :  { %v3221_v51 = vpop.eup %3220  ;;  %vm5241_vm15 = vcmp.lt.f32.partialorder %v5541_v33, 0.0004427343  ;;  %v2657_v7 = vadd.f32 1.0, %v2656_v29  ;;  %v2629_v0 = vmul.f32 -0.5, %v5142_v58  ;;  %vm2642_vm0 = vcmp.lt.f32.partialorder %v2641_v8, 0.0004427343 }
 0x550   :  { %v5246_v40 = vpop.eup %3222  ;;  %v2681_v41 = vadd.f32 %v2625_v32, %v5545_v3  ;;  %v2637_v45 = vmul.f32 0.6931472, %v3221_v51  ;;  %v2659_v62 = vand.u32 2147483647, %v5154_v13  ;;  %v2713_v37 = vmul.f32 %v5540_v49, %v2677_v22 }
 0x551   :  { %v2662_v23 = vadd.f32 1.0, %v5246_v40  ;;  %v2592_v35 = vmul.f32 0.6931472, %v3219_v31  ;;  %v2647_v39 = vmul.f32 -0.5, %v5198_v4  ;;  %v2723_v36 = vadd.f32 %v2711_v27, %v2707_v12 }
 0x552   :  { %v2643_v56 = vsel %vm2642_vm0, %v2640_v48, %v2637_v45  ;;  %v5546_v53 = vmax.f32 %v5014_v15, 0.0  ;;  %v5547_v43 = vmax.f32 %v5028_v44, 0.0  ;;  %v2717_v47 = vmul.f32 %v5544_v50, %v2681_v41 }
 0x553   :  { %v3225_v18 = vpop.eup %3224  ;;  %3230 = vlog2.f32 %v2662_v23  ;;  %v2616_v19 = vsel %vm5217_vm13, %v2613_v11, %v2610_v26  ;;  %v2658_v32 = vmul.f32 %v5154_v13, %v2657_v7  ;;  %v2724_v8 = vadd.f32 %v2723_v36, %v2715_v28 }
 0x554   :  { %v2676_v6 = vadd.f32 %v2580_v25, %v5546_v53  ;;  %v2683_v24 = vadd.f32 %v2643_v56, %v5547_v43  ;;  %v3227_v63 = vpop.eup %3226  ;;  %v2655_v29 = vmul.f32 0.6931472, %v3225_v18  ;;  %v2630_v12 = vadd.f32 1.0, %v2629_v0 }
 0x555   :  { %vm2660_vm1 = vcmp.lt.f32.partialorder %v2659_v62, 0.0004427343  ;;  %v2741_v31 = vadd.f32 %v2713_v37, %v2709_v30  ;;  %v2632_v44 = vand.u32 2147483647, %v5142_v58  ;;  %v2648_v14 = vadd.f32 1.0, %v2647_v39 }
 0x556   :  { %v2719_v15 = vmul.f32 %v5260_v2, %v2683_v24  ;;  %v2661_v21 = vsel %vm2660_vm1, %v2658_v32, %v2655_v29  ;;  %v2562_v22 = vsel %vm5228_vm14, %v5139_v46, %v5212_v38  ;;  %v2628_v17 = vmul.f32 0.6931472, %v3227_v63 }
 0x557   :  { %v5548_v51 = vmax.f32 %v5040_v9, 0.0  ;;  %v2598_v27 = vsel %vm5241_vm15, %v5187_v34, %v2592_v35  ;;  %v2742_v25 = vadd.f32 %v2741_v31, %v2717_v47  ;;  %v5549_v30 = vmax.f32 %v5020_v5, 0.0 }
 0x558   :  { %v2725_v11 = vadd.f32 %v2724_v8, %v2719_v15  ;;  %v2650_v28 = vand.u32 2147483647, %v5198_v4  ;;  %v2631_v26 = vmul.f32 %v5142_v58, %v2630_v12  ;;  %v2665_v38 = vmul.f32 -0.5, %v5246_v40 }
 0x559   :  { %v2685_v13 = vadd.f32 %v2661_v21, %v5548_v51  ;;  %v2680_v33 = vadd.f32 %v2616_v19, %v5549_v30  ;;  %v3229_v61 = vpop.eup %3228  ;;  %v5550_v9 = vmax.f32 %v5010_v57, 0.0  ;;  %v2712_v52 = vmul.f32 %v5540_v49, %v2676_v6 }
 0x55a   :  { %v2726_v3 = vrot.slane %v2725_v11, 4  ;;  %vm2633_vm3 = vcmp.lt.f32.partialorder %v2632_v44, 0.0004427343  ;;  %v2649_v34 = vmul.f32 %v5198_v4, %v2648_v14  ;;  %v2646_v7 = vmul.f32 0.6931472, %v3229_v61 }
 0x55b   :  { %v2721_v46 = vmul.f32 %v5260_v2, %v2685_v13  ;;  %v2674_v41 = vadd.f32 %v2562_v22, %v5550_v9  ;;  %v2634_v5 = vsel %vm2633_vm3, %v2631_v26, %v2628_v17  ;;  %v5551_v58 = vmax.f32 %v5023_v20, 0.0 }
 0x55c   :  { %v2727_v45 = vadd.f32 %v2726_v3, %v2725_v11  ;;  %v2716_v62 = vmul.f32 %v5544_v50, %v2680_v33  ;;  %v2460_v23 = vmax.f32 %v5079_v55, 0.0  ;;  %vm2651_vm4 = vcmp.lt.f32.partialorder %v2650_v28, 0.0004427343 }
 0x55d   :  { %v2743_v48 = vadd.f32 %v2742_v25, %v2721_v46  ;;  %v2678_v0 = vadd.f32 %v2598_v27, %v5551_v58  ;;  %v2652_v35 = vsel %vm2651_vm4, %v2649_v34, %v2646_v7  ;;  %v2666_v56 = vadd.f32 1.0, %v2665_v38 }
 0x55e   :  { %v2728_v37 = vrot.slane %v2727_v45, 2  ;;  %v2732_v39 = vadd.f32 %v2712_v52, %v5224_v54  ;;  %v5552_v4 = vmax.f32 %v5031_v60, 0.0  ;;  %v2684_v36 = vadd.f32 %v2652_v35, %v2460_v23 }
 0x55f   :  { %v2744_v57 = vrot.slane %v2743_v48, 4  ;;  %v2668_v53 = vand.u32 2147483647, %v5246_v40  ;;  %v2710_v24 = vmul.f32 %v4849_v10, %v2674_v41  ;;  %v2714_v55 = vmul.f32 %v5540_v49, %v2678_v0 }
 0x560   :  { %v2682_v18 = vadd.f32 %v2634_v5, %v5552_v4  ;;  %v2729_v6 = vadd.f32 %v2728_v37, %v2727_v45  ;;  %v3231_v43 = vpop.eup %3230  ;;  %v2733_v63 = vadd.f32 %v2732_v39, %v2716_v62  ;;  %v2720_v47 = vmul.f32 %v5260_v2, %v2684_v36 }
 0x561   :  { %v2745_v20 = vadd.f32 %v2744_v57, %v2743_v48  ;;  %v2664_v32 = vmul.f32 0.6931472, %v3231_v43  ;;  %v2667_v54 = vmul.f32 %v5246_v40, %v2666_v56  ;;  %v2462_v12 = vmax.f32 %v5085_v42, 0.0  ;;  %v5553_v48 = vld [vmem:[#allocation4_spill] sm:$0xff] }
 0x562   :  { %v2730_v19 = vrot.slane %v2729_v6, 1  ;;  %v2718_v60 = vmul.f32 %v5544_v50, %v2682_v18  ;;  %v2734_v8 = vadd.f32 %v2733_v63, %v2720_v47  ;;  %vm2669_vm5 = vcmp.lt.f32.partialorder %v2668_v53, 0.0004427343 }
 0x563   :  { %v2746_v29 = vrot.slane %v2745_v20, 2  ;;  %v2670_v44 = vsel %vm2669_vm5, %v2667_v54, %v2664_v32  ;;  %v2750_v10 = vadd.f32 %v2714_v55, %v2710_v24  ;;  %v3250_v54 = vmov 1966171168  }
 0x564   :  { %v2731_v15 = vadd.f32 %v2730_v19, %v2729_v6  ;;  %v2735_v21 = vrot.slane %v2734_v8, 4  ;;  %v2686_v49 = vadd.f32 %v2670_v44, %v2462_v12 }
 0x565   :  { %v2747_v31 = vadd.f32 %v2746_v29, %v2745_v20  ;;  %v2751_v17 = vadd.f32 %v2750_v10, %v2718_v60  ;;  %v2830_v60 = vunpack.c.l.s4 %v3250_v54 }
 0x566   :  { %v5302_v14 = vadd.f32 %v2731_v15, %v4939_v16  ;;  %v2736_v11 = vadd.f32 %v2735_v21, %v2734_v8  ;;  %v2722_v40 = vmul.f32 %v5260_v2, %v2686_v49 }
 0x567   :  { %v2748_v22 = vrot.slane %v2747_v31, 1 }
 0x568   :  { %v2767_v50 = vand.u32 2147483647, %v5302_v14  ;;  %v2737_v13 = vrot.slane %v2736_v11, 2  ;;  %v2752_v42 = vadd.f32 %v2751_v17, %v2722_v40  ;;  %v2763_v44 = vmax.f32 %v5302_v14, 0.0 }
 0x569   :  { %v2749_v51 = vadd.f32 %v2748_v22, %v2747_v31 }
 0x56a   :  { %v2771_v27 = vsub.f32 0.0, %v2767_v50  ;;  %v2738_v30 = vadd.f32 %v2737_v13, %v2736_v11  ;;  %v2753_v33 = vrot.slane %v2752_v42, 4  ;;  %v2831_v11 = vunpack.c.0.s8 %v2830_v60 }
 0x56b   :  { %v5307_v25 = vadd.f32 %v2749_v51, %v4946_v1 }
 0x56c   :  { %v2775_v28 = vmul.f32 1.442695, %v2771_v27  ;;  %v2739_v26 = vrot.slane %v2738_v30, 1  ;;  %v2754_v3 = vadd.f32 %v2753_v33, %v2752_v42 }
 0x56d   :  { %v2769_v16 = vand.u32 2147483647, %v5307_v25  ;;  %v2765_v14 = vmax.f32 %v5307_v25, 0.0 }
 0x56e   :  { %3232 = vpow2.f32 %v2775_v28  ;;  %v2740_v38 = vadd.f32 %v2739_v26, %v2738_v30  ;;  %v2755_v2 = vrot.slane %v2754_v3, 2 }
 0x56f   :  { %v2773_v46 = vsub.f32 0.0, %v2769_v16  ;;  %v5554_v16 = vld [vmem:[#allocation18_spill] sm:$0xff] }
 0x570   :  { %v2760_v9 = vadd.f32 %v2740_v38, %v4978_v59  ;;  %v2756_v41 = vadd.f32 %v2755_v2, %v2754_v3  ;;  %v2834_v26 = vsub.s32 %v2831_v11, %v5554_v16 }
 0x571   :  { %v2779_v61 = vmul.f32 1.442695, %v2773_v46 }
 0x572   :  { %v2768_v52 = vand.u32 2147483647, %v2760_v9  ;;  %v2757_v34 = vrot.slane %v2756_v41, 1  ;;  %v2764_v21 = vmax.f32 %v2760_v9, 0.0 }
 0x573   :  { %3234 = vpow2.f32 %v2779_v61 }
 0x574   :  { %v2772_v1 = vsub.f32 0.0, %v2768_v52  ;;  %v2758_v5 = vadd.f32 %v2757_v34, %v2756_v41  ;;  %v5555_v34 = vlaneseq }
 0x576   :  { %v2777_v45 = vmul.f32 1.442695, %v2772_v1  ;;  %v5312_v7 = vadd.f32 %v2758_v5, %v5553_v48  ;;  %vm2854_vm9 = vcmp.lt.s32.totalorder %v5555_v34, 512 }
 0x578   :  { %3236 = vpow2.f32 %v2777_v45  ;;  %v2770_v58 = vand.u32 2147483647, %v5312_v7  ;;  %v2766_v3 = vmax.f32 %v5312_v7, 0.0 }
 0x57a   :  { %v2774_v0 = vsub.f32 0.0, %v2770_v58 }
 0x57b   :  { %v3233_v62 = vpop.eup %3232 }
 0x57c   :  { %v2781_v23 = vmul.f32 1.442695, %v2774_v0  ;;  %v2783_v37 = vadd.f32 1.0, %v3233_v62  ;;  %v2786_v4 = vmul.f32 -0.5, %v3233_v62  ;;  %v2789_v20 = vand.u32 2147483647, %v3233_v62 }
 0x57e   :  { %3238 = vpow2.f32 %v2781_v23  ;;  %v2787_v6 = vadd.f32 1.0, %v2786_v4  ;;  %vm2790_vm2 = vcmp.lt.f32.partialorder %v2789_v20, 0.0004427343 }
 0x57f   :  { %3240 = vlog2.f32 %v2783_v37 }
 0x580   :  { %v3235_v57 = vpop.eup %3234  ;;  %v2788_v19 = vmul.f32 %v3233_v62, %v2787_v6 }
 0x581   :  { %v2801_v59 = vadd.f32 1.0, %v3235_v57  ;;  %v2804_v24 = vmul.f32 -0.5, %v3235_v57  ;;  %v2807_v10 = vand.u32 2147483647, %v3235_v57 }
 0x583   :  { %3242 = vlog2.f32 %v2801_v59  ;;  %v2805_v12 = vadd.f32 1.0, %v2804_v24  ;;  %vm2808_vm7 = vcmp.lt.f32.partialorder %v2807_v10, 0.0004427343 }
 0x585   :  { %v3237_v35 = vpop.eup %3236  ;;  %v2806_v13 = vmul.f32 %v3235_v57, %v2805_v12 }
 0x586   :  { %v2792_v56 = vadd.f32 1.0, %v3237_v35  ;;  %v2795_v36 = vmul.f32 -0.5, %v3237_v35  ;;  %v2798_v63 = vand.u32 2147483647, %v3237_v35 }
 0x588   :  { %3244 = vlog2.f32 %v2792_v56  ;;  %v2796_v55 = vadd.f32 1.0, %v2795_v36  ;;  %vm2799_vm6 = vcmp.lt.f32.partialorder %v2798_v63, 0.0004427343 }
 0x58a   :  { %v2797_v31 = vmul.f32 %v3237_v35, %v2796_v55 }
 0x58b   :  { %v3239_v39 = vpop.eup %3238 }
 0x58c   :  { %v2810_v18 = vadd.f32 1.0, %v3239_v39  ;;  %v3241_v53 = vpop.eup %3240  ;;  %v2813_v29 = vmul.f32 -0.5, %v3239_v39  ;;  %v2816_v51 = vand.u32 2147483647, %v3239_v39 }
 0x58d   :  { %v2785_v43 = vmul.f32 0.6931472, %v3241_v53 }
 0x58e   :  { %3246 = vlog2.f32 %v2810_v18  ;;  %v2814_v17 = vadd.f32 1.0, %v2813_v29  ;;  %vm2817_vm8 = vcmp.lt.f32.partialorder %v2816_v51, 0.0004427343 }
 0x58f   :  { %v2791_v8 = vsel %vm2790_vm2, %v2788_v19, %v2785_v43 }
 0x590   :  { %v3243_v47 = vpop.eup %3242  ;;  %v2819_v40 = vadd.f32 %v2791_v8, %v2763_v44  ;;  %v2815_v28 = vmul.f32 %v3239_v39, %v2814_v17 }
 0x591   :  { %v2803_v49 = vmul.f32 0.6931472, %v3243_v47 }
 0x593   :  { %v2809_v30 = vsel %vm2808_vm7, %v2806_v13, %v2803_v49 }
 0x594   :  { %v2821_v38 = vadd.f32 %v2809_v30, %v2765_v14 }
 0x595   :  { %v3245_v32 = vpop.eup %3244 }
 0x596   :  { %v2794_v15 = vmul.f32 0.6931472, %v3245_v32 }
 0x598   :  { %v2800_v22 = vsel %vm2799_vm6, %v2797_v31, %v2794_v15 }
 0x599   :  { %v2820_v50 = vadd.f32 %v2800_v22, %v2764_v21 }
 0x59b   :  { %v3247_v42 = vpop.eup %3246  ;;  %v2827_v27 = vcombine.low %v2819_v40, %v2820_v50 }
 0x59c   :  { %v2812_v33 = vmul.f32 0.6931472, %v3247_v42 }
 0x59d   :  { %v2835_v61 = vrot.slane %v2827_v27, %v2834_v26 }
 0x59e   :  { %v2818_v46 = vsel %vm2817_vm8, %v2815_v28, %v2812_v33 }
 0x59f   :  { %v2822_v2 = vadd.f32 %v2818_v46, %v2766_v3 }
 0x5a1   :  { %v2828_v9 = vcombine.low %v2821_v38, %v2822_v2 }
 0x5a3   :  { %v2842_v41 = vrot.slane %v2828_v9, %v2834_v26 }
 0x5a5   :  { %v2843_v52 = vcombine.low %v2835_v61, %v2842_v41 }
 0x5a7   :  { %v2850_v1 = vrot.slane %v2843_v52, %v2834_v26 }
 0x5a9   :  { %2856 = vst.msk [vmem:[%s5336_s13] sm:$0xf] %vm2854_vm9, %v2850_v1 }

</bundles_post_ra>
